<compile_context>
chip_gen: v6e
topology: v6e:2x2x1
jax: 0.10.0
libtpu: 0.0.40
codegen_flags: <defaults>
</compile_context>

<pallas_src>
import functools
import jax
import jax.numpy as jnp
from jax.experimental import pallas as pl
from jax.experimental.pallas import tpu as pltpu


# ------------------------------- helpers -----------------------------------

def _round_up(x, m):
    return (x + m - 1) // m * m


def _row_tile(mp):
    # mp is always a multiple of 128.  Pick the largest row tile <= 512 that
    # keeps the single "parallel" row axis >= 2 cells (megacore / 2-TC v7x).
    if mp <= 128:
        return mp
    if mp <= 1024:
        return mp // 2                      # exactly 2 even cells
    for t in (512, 384, 256, 128):
        if mp % t == 0:
            return t
    return 128                              # unreachable (mp % 128 == 0)


def _maybe_pad_rows(a, mult=128):
    m = a.shape[0]
    mp = _round_up(m, mult)
    if mp != m:
        a = jnp.pad(a, ((0, mp - m), (0, 0)))
    return a, m, mp


_GELU_C = 0.7978845608028654                # sqrt(2/pi)


def _gelu_tanh(x):
    # tanh-form GELU (tanh runs on the EUP slot). nn.GELU default is the exact
    # erf form; |deviation| ~3e-4, below the bf16-matmul noise floor.
    return 0.5 * x * (1.0 + jnp.tanh(_GELU_C * (x + 0.044715 * (x * x * x))))


_VMEM_LIMIT = None   # bytes; raise (e.g. 48 << 20) only if tiles are enlarged.
_PAR_ROWS = pltpu.CompilerParams(dimension_semantics=("parallel",),
                                 vmem_limit_bytes=_VMEM_LIMIT)
_PAR_2D = pltpu.CompilerParams(dimension_semantics=("parallel", "parallel"),
                               vmem_limit_bytes=_VMEM_LIMIT)


# ----------------------------- Pallas kernels -------------------------------

def _matmul_bias_kernel(x_ref, w_ref, b_ref, o_ref):
    # x: (tm, K) f32/bf16, w: (K, N) bf16 (pre-cast, resident), b: (1, N) f32.
    acc = jnp.dot(x_ref[...].astype(jnp.bfloat16), w_ref[...],
                  preferred_element_type=jnp.float32)
    o_ref[...] = (acc + b_ref[...]).astype(o_ref.dtype)


def _ln_matmul_kernel(x_ref, g_ref, bt_ref, w_ref, b_ref, o_ref, *, eps, activation):
    # Fused LayerNorm (f32 stats, computed ONCE per row tile since N is untiled)
    # -> bf16 matmul against the resident bf16 weight -> bias (-> GELU).
    x = x_ref[...].astype(jnp.float32)                        # (tm, K)
    mean = jnp.mean(x, axis=-1, keepdims=True)
    xc = x - mean
    var = jnp.mean(xc * xc, axis=-1, keepdims=True)
    h = xc * jax.lax.rsqrt(var + eps) * g_ref[...] + bt_ref[...]
    acc = jnp.dot(h.astype(jnp.bfloat16), w_ref[...],
                  preferred_element_type=jnp.float32)         # (tm, N)
    acc = acc + b_ref[...]
    if activation == "gelu":
        acc = _gelu_tanh(acc)
    o_ref[...] = acc.astype(o_ref.dtype)


def _matmul_residual_kernel(x_ref, w_ref, b_ref, r_ref, o_ref):
    # x: (tm, K) bf16, w: (K, N) bf16 resident, r: (tm, N) f32 residual.
    acc = jnp.dot(x_ref[...].astype(jnp.bfloat16), w_ref[...],
                  preferred_element_type=jnp.float32)
    o_ref[...] = (acc + b_ref[...] + r_ref[...].astype(jnp.float32)).astype(o_ref.dtype)


def _attn_proj_kernel(qkv_ref, r_ref, w_ref, b_ref, o_ref,
                      *, num_heads, head_dim, seq_real, tq):
    # Multi-head attention for one (batch, query-tile) + fused out-proj + residual.
    #   qkv_ref: (S_pad, 3D) bf16 fused-QKV slab, resident per batch (scale
    #            already folded into the Q columns at prep time).
    #   r_ref:   (tq, D) f32 residual tile;  w_ref: (D, D) bf16 resident.
    d = num_heads * head_dim
    s_pad = qkv_ref.shape[0]
    row0 = pl.multiple_of(pl.program_id(1) * tq, tq)

    # Additive key-padding mask, built once per query tile (not per head).
    if seq_real < s_pad:
        key_pos = jax.lax.broadcasted_iota(jnp.int32, (1, s_pad), 1)
        neg = jnp.where(key_pos < seq_real, 0.0, -1e30).astype(jnp.float32)
    else:
        neg = None

    acc = jnp.zeros((tq, d), jnp.float32)
    for h in range(num_heads):                               # static unroll
        lo = h * head_dim
        q = qkv_ref[pl.ds(row0, tq), lo:lo + head_dim]                   # (tq, Dh)
        k = qkv_ref[:, d + lo:d + lo + head_dim]                         # (S_pad, Dh)
        v = qkv_ref[:, 2 * d + lo:2 * d + lo + head_dim]                 # (S_pad, Dh)
        s = jax.lax.dot_general(q, k, (((1,), (1,)), ((), ())),
                                preferred_element_type=jnp.float32)      # (tq, S_pad)
        if neg is not None:
            s = s + neg
        m = jnp.max(s, axis=-1, keepdims=True)
        p = jnp.exp(s - m)
        l = jnp.sum(p, axis=-1, keepdims=True)
        pv = jnp.dot(p.astype(jnp.bfloat16), v, preferred_element_type=jnp.float32)
        ctx = pv * pl.reciprocal(l, approx=True)                         # (tq, Dh) f32
        # Per-head output-projection accumulation (sublane slice of W) instead
        # of a lane-axis concat of all heads.
        acc = acc + jnp.dot(ctx.astype(jnp.bfloat16),
                            w_ref[lo:lo + head_dim, :],
                            preferred_element_type=jnp.float32)
    o_ref[...] = (acc + b_ref[...] + r_ref[...].astype(jnp.float32)).astype(o_ref.dtype)


def _head_kernel(x_ref, ng_ref, nb_ref, hg_ref, hb_ref, w_ref, b_ref, o_ref,
                 *, eps_norm, eps_head):
    # final norm (only tokens 0,1 needed) -> (tok0+tok1)/2 -> head LN -> Linear.
    x = x_ref[...].astype(jnp.float32)                        # (B, 2, D)
    mean = jnp.mean(x, axis=-1, keepdims=True)
    xc = x - mean
    var = jnp.mean(xc * xc, axis=-1, keepdims=True)
    xn = xc * jax.lax.rsqrt(var + eps_norm) * ng_ref[...] + nb_ref[...]
    pooled = (xn[:, 0, :] + xn[:, 1, :]) * 0.5                # (B, D)
    mean = jnp.mean(pooled, axis=-1, keepdims=True)
    pc = pooled - mean
    var = jnp.mean(pc * pc, axis=-1, keepdims=True)
    pn = pc * jax.lax.rsqrt(var + eps_head) * hg_ref[...] + hb_ref[...]
    logits = jnp.dot(pn.astype(jnp.bfloat16), w_ref[...],
                     preferred_element_type=jnp.float32) + b_ref[...]
    o_ref[...] = logits.astype(o_ref.dtype)


# ------------------------------ host wrappers --------------------------------

def matmul_bias(x, w, b, out_dtype=None):
    out_dtype = out_dtype or x.dtype
    x, m0, mp = _maybe_pad_rows(x)
    k, n = w.shape
    tm = _row_tile(mp)
    out = pl.pallas_call(
        _matmul_bias_kernel,
        out_shape=jax.ShapeDtypeStruct((mp, n), out_dtype),
        grid=(mp // tm,),
        in_specs=[pl.BlockSpec((tm, k), lambda i: (i, 0)),
                  pl.BlockSpec((k, n), lambda i: (0, 0)),    # weight resident (1 DMA)
                  pl.BlockSpec((1, n), lambda i: (0, 0))],
        out_specs=pl.BlockSpec((tm, n), lambda i: (i, 0)),
        compiler_params=_PAR_ROWS,
    )(x, w, b.reshape(1, n))
    return out if mp == m0 else out[:m0]


def ln_matmul(x, gamma, beta, w, b, *, eps, activation=None, out_dtype=None):
    out_dtype = out_dtype or x.dtype
    x, m0, mp = _maybe_pad_rows(x)
    k, n = w.shape
    tm = _row_tile(mp)
    kernel = functools.partial(_ln_matmul_kernel, eps=eps, activation=activation)
    out = pl.pallas_call(
        kernel,
        out_shape=jax.ShapeDtypeStruct((mp, n), out_dtype),
        grid=(mp // tm,),
        in_specs=[pl.BlockSpec((tm, k), lambda i: (i, 0)),
                  pl.BlockSpec((1, k), lambda i: (0, 0)),
                  pl.BlockSpec((1, k), lambda i: (0, 0)),
                  pl.BlockSpec((k, n), lambda i: (0, 0)),    # weight resident (1 DMA)
                  pl.BlockSpec((1, n), lambda i: (0, 0))],
        out_specs=pl.BlockSpec((tm, n), lambda i: (i, 0)),
        compiler_params=_PAR_ROWS,
    )(x, gamma.reshape(1, k), beta.reshape(1, k), w, b.reshape(1, n))
    return out if mp == m0 else out[:m0]


def matmul_residual(x, w, b, res, out_dtype=None):
    out_dtype = out_dtype or res.dtype
    x, m0, mp = _maybe_pad_rows(x)
    res, _, _ = _maybe_pad_rows(res)
    k, n = w.shape
    tm = _row_tile(mp)
    out = pl.pallas_call(
        _matmul_residual_kernel,
        out_shape=jax.ShapeDtypeStruct((mp, n), out_dtype),
        grid=(mp // tm,),
        in_specs=[pl.BlockSpec((tm, k), lambda i: (i, 0)),
                  pl.BlockSpec((k, n), lambda i: (0, 0)),    # weight resident (1 DMA)
                  pl.BlockSpec((1, n), lambda i: (0, 0)),
                  pl.BlockSpec((tm, n), lambda i: (i, 0))],
        out_specs=pl.BlockSpec((tm, n), lambda i: (i, 0)),
        compiler_params=_PAR_ROWS,
    )(x, w, b.reshape(1, n), res)
    return out if mp == m0 else out[:m0]


def attention_proj(qkv, res, w, b, *, num_heads, head_dim, seq_real):
    bsz, s_pad, three_d = qkv.shape
    d = num_heads * head_dim
    tq = min(128, s_pad)                                     # s_pad % 128 == 0
    kernel = functools.partial(_attn_proj_kernel, num_heads=num_heads,
                               head_dim=head_dim, seq_real=seq_real, tq=tq)
    return pl.pallas_call(
        kernel,
        out_shape=jax.ShapeDtypeStruct((bsz, s_pad, d), res.dtype),
        grid=(bsz, s_pad // tq),
        in_specs=[
            # Fused QKV slab: resident once per batch (constant over qi); the
            # query tile is sliced from it in-kernel -> no duplicate Q DMA.
            pl.BlockSpec((None, s_pad, three_d), lambda bi, qi: (bi, 0, 0)),
            pl.BlockSpec((None, tq, d), lambda bi, qi: (bi, qi, 0)),
            pl.BlockSpec((d, d), lambda bi, qi: (0, 0)),     # bf16 proj weight, resident
            pl.BlockSpec((1, d), lambda bi, qi: (0, 0)),
        ],
        out_specs=pl.BlockSpec((None, tq, d), lambda bi, qi: (bi, qi, 0)),
        compiler_params=_PAR_2D,
    )(qkv, res, w, b.reshape(1, d))


def head_pool(x2, norm_g, norm_b, head_g, head_b, w, b):
    bsz, _, d = x2.shape
    c = w.shape[1]
    kernel = functools.partial(_head_kernel, eps_norm=1e-6, eps_head=1e-5)
    return pl.pallas_call(
        kernel,
        out_shape=jax.ShapeDtypeStruct((bsz, c), jnp.float32),
        grid=(1,),
        in_specs=[pl.BlockSpec((bsz, 2, d), lambda i: (0, 0, 0)),
                  pl.BlockSpec((1, 1, d), lambda i: (0, 0, 0)),
                  pl.BlockSpec((1, 1, d), lambda i: (0, 0, 0)),
                  pl.BlockSpec((1, d), lambda i: (0, 0)),
                  pl.BlockSpec((1, d), lambda i: (0, 0)),
                  pl.BlockSpec((d, c), lambda i: (0, 0)),
                  pl.BlockSpec((1, c), lambda i: (0, 0))],
        out_specs=pl.BlockSpec((bsz, c), lambda i: (0, 0)),
    )(x2, norm_g.reshape(1, 1, d), norm_b.reshape(1, 1, d),
      head_g.reshape(1, d), head_b.reshape(1, d), w, b.reshape(1, c))


# --------------------------- parameter creation ------------------------------

def _dense_init(key, shape, std=0.02):
    return jax.random.normal(key, shape, jnp.float32) * std


def init_ast_params(key, cfg):
    """Float32, PyTorch-layout parameters (as a loaded checkpoint would be)."""
    D, depth = cfg["embed_dim"], cfg["depth"]
    P, Np, C = cfg["patch_size"], cfg["num_patches"], cfg["num_classes"]
    hidden = D * cfg["mlp_ratio"]
    keys = jax.random.split(key, 8 + depth)
    params = {
        "patch_w": _dense_init(keys[0], (P * P, D)),   # Conv2d(1,D,16,16) as matmul
        "patch_b": jnp.zeros((D,), jnp.float32),
        "cls_token": _dense_init(keys[1], (1, 1, D)),
        "dist_token": _dense_init(keys[2], (1, 1, D)),
        "pos_embed": _dense_init(keys[3], (1, Np + 2, D)),
        "norm_g": jnp.ones((D,), jnp.float32),
        "norm_b": jnp.zeros((D,), jnp.float32),
        "head_ln_g": jnp.ones((D,), jnp.float32),
        "head_ln_b": jnp.zeros((D,), jnp.float32),
        "head_w": _dense_init(keys[4], (D, C)),
        "head_b": jnp.zeros((C,), jnp.float32),
        "blocks": [],
    }
    for d in range(depth):
        bk = jax.random.split(keys[8 + d], 4)
        params["blocks"].append({
            "ln1_g": jnp.ones((D,), jnp.float32), "ln1_b": jnp.zeros((D,), jnp.float32),
            "qkv_w": _dense_init(bk[0], (D, 3 * D)),
            "qkv_b": jnp.zeros((3 * D,), jnp.float32),
            "proj_w": _dense_init(bk[1], (D, D)),
            "proj_b": jnp.zeros((D,), jnp.float32),
            "ln2_g": jnp.ones((D,), jnp.float32), "ln2_b": jnp.zeros((D,), jnp.float32),
            "fc1_w": _dense_init(bk[2], (D, hidden)),
            "fc1_b": jnp.zeros((hidden,), jnp.float32),
            "fc2_w": _dense_init(bk[3], (hidden, D)),
            "fc2_b": jnp.zeros((D,), jnp.float32),
        })
    return params


def prepare_params(params, cfg):
    """One-time checkpoint conversion for the TPU kernels.

    * folds the attention scale (head_dim ** -0.5) into the Q columns of the
      fused qkv weight / bias (removes a per-tile VPU multiply + casts),
    * pre-casts every matmul weight matrix to bf16 (halves the streamed HBM
      bytes of the dominant operand; deletes all in-kernel weight casts).
    LayerNorm params and biases stay f32 (tiny, and they add into the f32
    accumulator).
    """
    D, H = cfg["embed_dim"], cfg["num_heads"]
    scale = (D // H) ** -0.5
    p = dict(params)
    p["patch_w"] = params["patch_w"].astype(jnp.bfloat16)
    p["head_w"] = params["head_w"].astype(jnp.bfloat16)
    blocks = []
    for blk in params["blocks"]:
        nb = dict(blk)
        nb["qkv_w"] = blk["qkv_w"].at[:, :D].multiply(scale).astype(jnp.bfloat16)
        nb["qkv_b"] = blk["qkv_b"].at[:D].multiply(scale)
        nb["proj_w"] = blk["proj_w"].astype(jnp.bfloat16)
        nb["fc1_w"] = blk["fc1_w"].astype(jnp.bfloat16)
        nb["fc2_w"] = blk["fc2_w"].astype(jnp.bfloat16)
        blocks.append(nb)
    p["blocks"] = blocks
    return p


# ------------------------------ forward pass ---------------------------------

def ast_forward(params, x, cfg):
    B, T, F = x.shape
    P, fs, ts = cfg["patch_size"], cfg["fstride"], cfg["tstride"]
    D, H = cfg["embed_dim"], cfg["num_heads"]
    Dh = D // H

    f_dim = (F - P) // fs + 1
    t_dim = (T - P) // ts + 1
    Np = f_dim * t_dim

    # x.unsqueeze(1).transpose(2,3) -> (B,1,F,T); im2col via one strided-window
    # op (data movement only; channel order = (kh over F, kw over T), matching
    # Conv2d's (C=1, kh, kw) weight flatten).
    # TODO(synk): verify patch-row ordering against a real PyTorch checkpoint.
    xft = jnp.transpose(x, (0, 2, 1))[:, None, :, :]          # (B, 1, F, T)
    patches = jax.lax.conv_general_dilated_patches(
        xft, (P, P), (fs, ts), "VALID")                       # (B, P*P, f_dim, t_dim)
    patches = jnp.transpose(patches, (0, 2, 3, 1)).reshape(B * Np, P * P)

    tokens = matmul_bias(patches, params["patch_w"], params["patch_b"],
                         out_dtype=jnp.float32)
    tokens = tokens.reshape(B, Np, D)                         # flatten(2).transpose(1,2)

    cls = jnp.broadcast_to(params["cls_token"], (B, 1, D))
    dist = jnp.broadcast_to(params["dist_token"], (B, 1, D))
    xs = jnp.concatenate([cls, dist, tokens], axis=1) + params["pos_embed"]
    S = Np + 2
    S_pad = _round_up(S, 128)
    if S_pad != S:
        # pad token axis once; padded key positions are masked inside attention.
        xs = jnp.pad(xs, ((0, 0), (0, S_pad - S), (0, 0)))
    M = B * S_pad

    for blk in params["blocks"]:
        x2d = xs.reshape(M, D)
        qkv = ln_matmul(x2d, blk["ln1_g"], blk["ln1_b"], blk["qkv_w"], blk["qkv_b"],
                        eps=1e-6, out_dtype=jnp.bfloat16)     # (M, 3D), scale pre-folded
        xs = attention_proj(qkv.reshape(B, S_pad, 3 * D), xs,
                            blk["proj_w"], blk["proj_b"],
                            num_heads=H, head_dim=Dh, seq_real=S)
        x2d = xs.reshape(M, D)
        hid = ln_matmul(x2d, blk["ln2_g"], blk["ln2_b"], blk["fc1_w"], blk["fc1_b"],
                        eps=1e-6, activation="gelu", out_dtype=jnp.bfloat16)
        x2d = matmul_residual(hid, blk["fc2_w"], blk["fc2_b"], x2d)
        xs = x2d.reshape(B, S_pad, D)

    # Final norm + (tok0 + tok1)/2 + mlp_head (LN -> Linear), fused; LayerNorm is
    # row-wise so only tokens 0 and 1 are needed.
    logits = head_pool(xs[:, :2, :], params["norm_g"], params["norm_b"],
                       params["head_ln_g"], params["head_ln_b"],
                       params["head_w"], params["head_b"])

    # ASTModelWrapper.dropout(p=0.5) and all internal dropouts are identity in
    # eval/inference mode (training-mode RNG dropout intentionally not applied).
    return logits


# ---------------------------------- main -------------------------------------

if __name__ == "__main__":
    # Scaled-down AST 'tiny224' config for a small, fast test.  The real module
    # uses input_tdim=512, input_fdim=128, embed_dim=192, depth=12, num_heads=3;
    # the computation structure here is identical.
    cfg = dict(
        input_tdim=64, input_fdim=32, patch_size=16, fstride=10, tstride=10,
        embed_dim=48, depth=2, num_heads=3, mlp_ratio=4, num_classes=1,
    )
    f_dim = (cfg["input_fdim"] - cfg["patch_size"]) // cfg["fstride"] + 1
    t_dim = (cfg["input_tdim"] - cfg["patch_size"]) // cfg["tstride"] + 1
    cfg["num_patches"] = f_dim * t_dim

    key = jax.random.PRNGKey(0)
    pkey, xkey = jax.random.split(key)
    params = prepare_params(init_ast_params(pkey, cfg), cfg)
    # layout: x is (batch, time_frames, freq_bins), matching the PyTorch module.
    x = jax.random.normal(xkey, (2, cfg["input_tdim"], cfg["input_fdim"]), jnp.float32)

    fwd = jax.jit(functools.partial(ast_forward, cfg=cfg))
    out = jax.block_until_ready(fwd(params, x))
    assert out.shape == (2, cfg["num_classes"]), out.shape
    assert bool(jnp.all(jnp.isfinite(out)))
    print("KERNEL_OK")
</pallas_src>

<mosaic_0001>
module attributes {stable_mosaic.version = 11 : i64} {
  func.func @_matmul_bias_kernel(%arg0: i32, %arg1: memref<128x256xf32, #tpu.memory_space<vmem>>, %arg2: memref<256x48xbf16, #tpu.memory_space<vmem>>, %arg3: memref<1x48xf32, #tpu.memory_space<vmem>>, %arg4: memref<128x48xf32, #tpu.memory_space<vmem>>) attributes {dimension_semantics = [#tpu.dimension_semantics<parallel>], iteration_bounds = array<i64: 1>, scalar_prefetch = 0 : i64, scratch_operands = 0 : i64, tpu.core_type = #tpu.core_type<tc>, window_params = [{transform_indices = @transform_0, window_bounds = array<i64: 128, 256>}, {pipeline_mode = #tpu.pipeline_mode<synchronous>, transform_indices = @transform_1, window_bounds = array<i64: 256, 48>}, {pipeline_mode = #tpu.pipeline_mode<synchronous>, transform_indices = @transform_2, window_bounds = array<i64: 1, 48>}, {transform_indices = @transform_3, window_bounds = array<i64: 128, 48>}]} {
    %c0 = arith.constant 0 : index
    %c0_0 = arith.constant 0 : index
    %0 = vector.load %arg1[%c0, %c0_0] : memref<128x256xf32, #tpu.memory_space<vmem>>, vector<128x256xf32>
    %1 = arith.truncf %0 : vector<128x256xf32> to vector<128x256xbf16>
    %c0_1 = arith.constant 0 : index
    %c0_2 = arith.constant 0 : index
    %2 = vector.load %arg2[%c0_1, %c0_2] : memref<256x48xbf16, #tpu.memory_space<vmem>>, vector<256x48xbf16>
    %cst = arith.constant dense<0.000000e+00> : vector<128x48xf32>
    %3 = tpu.matmul %1, %2, %cst {dimension_numbers = #tpu.dot_dimension_numbers<[1], [0], [0], [1], [0, 0, 1, 1], [], []>} : vector<128x256xbf16>, vector<256x48xbf16>, vector<128x48xf32> -> vector<128x48xf32>
    %c0_3 = arith.constant 0 : index
    %c0_4 = arith.constant 0 : index
    %4 = vector.load %arg3[%c0_3, %c0_4] : memref<1x48xf32, #tpu.memory_space<vmem>>, vector<1x48xf32>
    %5 = vector.broadcast %4 : vector<1x48xf32> to vector<128x48xf32>
    %6 = arith.addf %3, %5 : vector<128x48xf32>
    %c0_5 = arith.constant 0 : index
    %c0_6 = arith.constant 0 : index
    %7 = vector.load %arg4[%c0_5, %c0_6] : memref<128x48xf32, #tpu.memory_space<vmem>>, vector<128x48xf32>
    tpu.vector_store %arg4[%c0_5, %c0_6], %6 {strides = array<i32>} : memref<128x48xf32, #tpu.memory_space<vmem>>, vector<128x48xf32>,
    return
  }
  func.func @transform_0(%arg0: i32) -> (i32, i32) {
    %c0_i32 = arith.constant 0 : i32
    %c0_i32_0 = arith.constant 0 : i32
    return %arg0, %c0_i32 : i32, i32
  }
  func.func @transform_1(%arg0: i32) -> (i32, i32) {
    %c0_i32 = arith.constant 0 : i32
    %c0_i32_0 = arith.constant 0 : i32
    %c0_i32_1 = arith.constant 0 : i32
    return %c0_i32, %c0_i32_0 : i32, i32
  }
  func.func @transform_2(%arg0: i32) -> (i32, i32) {
    %c0_i32 = arith.constant 0 : i32
    %c0_i32_0 = arith.constant 0 : i32
    %c0_i32_1 = arith.constant 0 : i32
    return %c0_i32, %c0_i32_0 : i32, i32
  }
  func.func @transform_3(%arg0: i32) -> (i32, i32) {
    %c0_i32 = arith.constant 0 : i32
    %c0_i32_0 = arith.constant 0 : i32
    return %arg0, %c0_i32 : i32, i32
  }
}

module attributes {stable_mosaic.version = 11 : i64} {
  func.func @_ln_matmul_kernel(%arg0: i32, %arg1: memref<128x48xf32, #tpu.memory_space<vmem>>, %arg2: memref<1x48xf32, #tpu.memory_space<vmem>>, %arg3: memref<1x48xf32, #tpu.memory_space<vmem>>, %arg4: memref<48x192xbf16, #tpu.memory_space<vmem>>, %arg5: memref<1x192xf32, #tpu.memory_space<vmem>>, %arg6: memref<128x192xbf16, #tpu.memory_space<vmem>>) attributes {dimension_semantics = [#tpu.dimension_semantics<parallel>], iteration_bounds = array<i64: 2>, scalar_prefetch = 0 : i64, scratch_operands = 0 : i64, tpu.core_type = #tpu.core_type<tc>, window_params = [{transform_indices = @transform_0, window_bounds = array<i64: 128, 48>}, {pipeline_mode = #tpu.pipeline_mode<synchronous>, transform_indices = @transform_1, window_bounds = array<i64: 1, 48>}, {pipeline_mode = #tpu.pipeline_mode<synchronous>, transform_indices = @transform_2, window_bounds = array<i64: 1, 48>}, {pipeline_mode = #tpu.pipeline_mode<synchronous>, transform_indices = @transform_3, window_bounds = array<i64: 48, 192>}, {pipeline_mode = #tpu.pipeline_mode<synchronous>, transform_indices = @transform_4, window_bounds = array<i64: 1, 192>}, {transform_indices = @transform_5, window_bounds = array<i64: 128, 192>}]} {
    %c0 = arith.constant 0 : index
    %c0_0 = arith.constant 0 : index
    %0 = vector.load %arg1[%c0, %c0_0] : memref<128x48xf32, #tpu.memory_space<vmem>>, vector<128x48xf32>
    %cst = arith.constant dense<0.000000e+00> : vector<128xf32>
    %1 = vector.multi_reduction <add>, %0, %cst [1] : vector<128x48xf32> to vector<128xf32>
    %2 = vector.shape_cast %1 : vector<128xf32> to vector<128x1xf32>
    %cst_1 = arith.constant 4.800000e+01 : f32
    %3 = vector.broadcast %cst_1 : f32 to vector<128x1xf32>
    %4 = arith.divf %2, %3 : vector<128x1xf32>
    %5 = vector.broadcast %4 : vector<128x1xf32> to vector<128x48xf32>
    %6 = arith.subf %0, %5 : vector<128x48xf32>
    %7 = arith.mulf %6, %6 : vector<128x48xf32>
    %cst_2 = arith.constant dense<0.000000e+00> : vector<128xf32>
    %8 = vector.multi_reduction <add>, %7, %cst_2 [1] : vector<128x48xf32> to vector<128xf32>
    %9 = vector.shape_cast %8 : vector<128xf32> to vector<128x1xf32>
    %cst_3 = arith.constant 4.800000e+01 : f32
    %10 = vector.broadcast %cst_3 : f32 to vector<128x1xf32>
    %11 = arith.divf %9, %10 : vector<128x1xf32>
    %cst_4 = arith.constant 9.99999997E-7 : f32
    %12 = vector.broadcast %cst_4 : f32 to vector<128x1xf32>
    %13 = arith.addf %11, %12 : vector<128x1xf32>
    %14 = math.rsqrt %13 : vector<128x1xf32>
    %15 = vector.broadcast %14 : vector<128x1xf32> to vector<128x48xf32>
    %16 = arith.mulf %6, %15 : vector<128x48xf32>
    %c0_5 = arith.constant 0 : index
    %c0_6 = arith.constant 0 : index
    %17 = vector.load %arg2[%c0_5, %c0_6] : memref<1x48xf32, #tpu.memory_space<vmem>>, vector<1x48xf32>
    %18 = vector.broadcast %17 : vector<1x48xf32> to vector<128x48xf32>
    %19 = arith.mulf %16, %18 : vector<128x48xf32>
    %c0_7 = arith.constant 0 : index
    %c0_8 = arith.constant 0 : index
    %20 = vector.load %arg3[%c0_7, %c0_8] : memref<1x48xf32, #tpu.memory_space<vmem>>, vector<1x48xf32>
    %21 = vector.broadcast %20 : vector<1x48xf32> to vector<128x48xf32>
    %22 = arith.addf %19, %21 : vector<128x48xf32>
    %23 = arith.truncf %22 : vector<128x48xf32> to vector<128x48xbf16>
    %c0_9 = arith.constant 0 : index
    %c0_10 = arith.constant 0 : index
    %24 = vector.load %arg4[%c0_9, %c0_10] : memref<48x192xbf16, #tpu.memory_space<vmem>>, vector<48x192xbf16>
    %cst_11 = arith.constant dense<0.000000e+00> : vector<128x192xf32>
    %25 = tpu.matmul %23, %24, %cst_11 {dimension_numbers = #tpu.dot_dimension_numbers<[1], [0], [0], [1], [0, 0, 1, 1], [], []>} : vector<128x48xbf16>, vector<48x192xbf16>, vector<128x192xf32> -> vector<128x192xf32>
    %c0_12 = arith.constant 0 : index
    %c0_13 = arith.constant 0 : index
    %26 = vector.load %arg5[%c0_12, %c0_13] : memref<1x192xf32, #tpu.memory_space<vmem>>, vector<1x192xf32>
    %27 = vector.broadcast %26 : vector<1x192xf32> to vector<128x192xf32>
    %28 = arith.addf %25, %27 : vector<128x192xf32>
    %cst_14 = arith.constant 5.000000e-01 : f32
    %29 = vector.broadcast %cst_14 : f32 to vector<128x192xf32>
    %30 = arith.mulf %29, %28 : vector<128x192xf32>
    %31 = arith.mulf %28, %28 : vector<128x192xf32>
    %32 = arith.mulf %31, %28 : vector<128x192xf32>
    %cst_15 = arith.constant 4.471500e-02 : f32
    %33 = vector.broadcast %cst_15 : f32 to vector<128x192xf32>
    %34 = arith.mulf %33, %32 : vector<128x192xf32>
    %35 = arith.addf %28, %34 : vector<128x192xf32>
    %cst_16 = arith.constant 0.797884583 : f32
    %36 = vector.broadcast %cst_16 : f32 to vector<128x192xf32>
    %37 = arith.mulf %36, %35 : vector<128x192xf32>
    %38 = math.tanh %37 : vector<128x192xf32>
    %cst_17 = arith.constant 1.000000e+00 : f32
    %39 = vector.broadcast %cst_17 : f32 to vector<128x192xf32>
    %40 = arith.addf %39, %38 : vector<128x192xf32>
    %41 = arith.mulf %30, %40 : vector<128x192xf32>
    %42 = arith.truncf %41 : vector<128x192xf32> to vector<128x192xbf16>
    %c0_18 = arith.constant 0 : index
    %c0_19 = arith.constant 0 : index
    %43 = vector.load %arg6[%c0_18, %c0_19] : memref<128x192xbf16, #tpu.memory_space<vmem>>, vector<128x192xbf16>
    tpu.vector_store %arg6[%c0_18, %c0_19], %42 {strides = array<i32>} : memref<128x192xbf16, #tpu.memory_space<vmem>>, vector<128x192xbf16>,
    return
  }
  func.func @transform_0(%arg0: i32) -> (i32, i32) {
    %c0_i32 = arith.constant 0 : i32
    %c0_i32_0 = arith.constant 0 : i32
    return %arg0, %c0_i32 : i32, i32
  }
  func.func @transform_1(%arg0: i32) -> (i32, i32) {
    %c0_i32 = arith.constant 0 : i32
    %c0_i32_0 = arith.constant 0 : i32
    %c0_i32_1 = arith.constant 0 : i32
    return %c0_i32, %c0_i32_0 : i32, i32
  }
  func.func @transform_2(%arg0: i32) -> (i32, i32) {
    %c0_i32 = arith.constant 0 : i32
    %c0_i32_0 = arith.constant 0 : i32
    %c0_i32_1 = arith.constant 0 : i32
    return %c0_i32, %c0_i32_0 : i32, i32
  }
  func.func @transform_3(%arg0: i32) -> (i32, i32) {
    %c0_i32 = arith.constant 0 : i32
    %c0_i32_0 = arith.constant 0 : i32
    %c0_i32_1 = arith.constant 0 : i32
    return %c0_i32, %c0_i32_0 : i32, i32
  }
  func.func @transform_4(%arg0: i32) -> (i32, i32) {
    %c0_i32 = arith.constant 0 : i32
    %c0_i32_0 = arith.constant 0 : i32
    %c0_i32_1 = arith.constant 0 : i32
    return %c0_i32, %c0_i32_0 : i32, i32
  }
  func.func @transform_5(%arg0: i32) -> (i32, i32) {
    %c0_i32 = arith.constant 0 : i32
    %c0_i32_0 = arith.constant 0 : i32
    return %arg0, %c0_i32 : i32, i32
  }
}

module attributes {stable_mosaic.version = 11 : i64} {
  func.func @_attn_proj_kernel(%arg0: i32, %arg1: i32, %arg2: memref<1x128x144xbf16, #tpu.memory_space<vmem>>, %arg3: memref<1x128x48xf32, #tpu.memory_space<vmem>>, %arg4: memref<48x48xbf16, #tpu.memory_space<vmem>>, %arg5: memref<1x48xf32, #tpu.memory_space<vmem>>, %arg6: memref<1x128x48xf32, #tpu.memory_space<vmem>>) attributes {dimension_semantics = [#tpu.dimension_semantics<parallel>, #tpu.dimension_semantics<parallel>], iteration_bounds = array<i64: 2, 1>, scalar_prefetch = 0 : i64, scratch_operands = 0 : i64, tpu.core_type = #tpu.core_type<tc>, window_params = [{transform_indices = @transform_0, window_bounds = array<i64: 1, 128, 144>}, {transform_indices = @transform_1, window_bounds = array<i64: 1, 128, 48>}, {pipeline_mode = #tpu.pipeline_mode<synchronous>, transform_indices = @transform_2, window_bounds = array<i64: 48, 48>}, {pipeline_mode = #tpu.pipeline_mode<synchronous>, transform_indices = @transform_3, window_bounds = array<i64: 1, 48>}, {transform_indices = @transform_4, window_bounds = array<i64: 1, 128, 48>}]} {
    %c128_i32 = arith.constant 128 : i32
    %0 = arith.muli %arg1, %c128_i32 : i32
    %1 = tpu.assume_multiple %0, 128 : i32
    %2 = tpu.iota {dimensions = array<i32: 1>} : vector<1x128xi32>
    %c12_i32 = arith.constant 12 : i32
    %3 = vector.broadcast %c12_i32 : i32 to vector<1x128xi32>
    %4 = arith.cmpi slt, %2, %3 : vector<1x128xi32>
    %cst = arith.constant 0.000000e+00 : f32
    %cst_0 = arith.constant -1.000000e+30 : f32
    %5 = vector.broadcast %cst : f32 to vector<1x128xf32>
    %6 = vector.broadcast %cst_0 : f32 to vector<1x128xf32>
    %7 = arith.select %4, %5, %6 : vector<1x128xi1>, vector<1x128xf32>
    %cst_1 = arith.constant 0.000000e+00 : f32
    %8 = vector.broadcast %cst_1 : f32 to vector<128x48xf32>
    %c0 = arith.constant 0 : index
    %9 = arith.index_cast %1 : i32 to index
    %c0_2 = arith.constant 0 : index
    %10 = vector.load %arg2[%c0, %9, %c0_2] : memref<1x128x144xbf16, #tpu.memory_space<vmem>>, vector<1x128x16xbf16>
    %11 = vector.shape_cast %10 : vector<1x128x16xbf16> to vector<128x16xbf16>
    %c0_3 = arith.constant 0 : index
    %c0_4 = arith.constant 0 : index
    %c48 = arith.constant 48 : index
    %12 = vector.load %arg2[%c0_3, %c0_4, %c48] : memref<1x128x144xbf16, #tpu.memory_space<vmem>>, vector<1x128x16xbf16>
    %13 = vector.shape_cast %12 : vector<1x128x16xbf16> to vector<128x16xbf16>
    %c0_5 = arith.constant 0 : index
    %c0_6 = arith.constant 0 : index
    %c96 = arith.constant 96 : index
    %14 = vector.load %arg2[%c0_5, %c0_6, %c96] : memref<1x128x144xbf16, #tpu.memory_space<vmem>>, vector<1x128x16xbf16>
    %15 = vector.shape_cast %14 : vector<1x128x16xbf16> to vector<128x16xbf16>
    %cst_7 = arith.constant dense<0.000000e+00> : vector<128x128xf32>
    %16 = tpu.matmul %11, %13, %cst_7 {dimension_numbers = #tpu.dot_dimension_numbers<[1], [1], [0], [0], [0, 0, 1, 0], [], []>} : vector<128x16xbf16>, vector<128x16xbf16>, vector<128x128xf32> -> vector<128x128xf32>
    %17 = vector.broadcast %7 : vector<1x128xf32> to vector<128x128xf32>
    %18 = arith.addf %16, %17 : vector<128x128xf32>
    %cst_8 = arith.constant dense<0xFF800000> : vector<128xf32>
    %19 = vector.multi_reduction <maximumf>, %18, %cst_8 [1] : vector<128x128xf32> to vector<128xf32>
    %20 = vector.shape_cast %19 : vector<128xf32> to vector<128x1xf32>
    %21 = vector.broadcast %20 : vector<128x1xf32> to vector<128x128xf32>
    %22 = arith.subf %18, %21 : vector<128x128xf32>
    %23 = math.exp %22 : vector<128x128xf32>
    %cst_9 = arith.constant dense<0.000000e+00> : vector<128xf32>
    %24 = vector.multi_reduction <add>, %23, %cst_9 [1] : vector<128x128xf32> to vector<128xf32>
    %25 = vector.shape_cast %24 : vector<128xf32> to vector<128x1xf32>
    %26 = arith.truncf %23 : vector<128x128xf32> to vector<128x128xbf16>
    %cst_10 = arith.constant dense<0.000000e+00> : vector<128x16xf32>
    %27 = tpu.matmul %26, %15, %cst_10 {dimension_numbers = #tpu.dot_dimension_numbers<[1], [0], [0], [1], [0, 0, 1, 1], [], []>} : vector<128x128xbf16>, vector<128x16xbf16>, vector<128x16xf32> -> vector<128x16xf32>
    %28 = tpu.reciprocal %25 {approx = true} : vector<128x1xf32> -> vector<128x1xf32>
    %29 = vector.broadcast %28 : vector<128x1xf32> to vector<128x16xf32>
    %30 = arith.mulf %27, %29 : vector<128x16xf32>
    %31 = arith.truncf %30 : vector<128x16xf32> to vector<128x16xbf16>
    %c0_11 = arith.constant 0 : index
    %c0_12 = arith.constant 0 : index
    %32 = vector.load %arg4[%c0_11, %c0_12] : memref<48x48xbf16, #tpu.memory_space<vmem>>, vector<16x48xbf16>
    %cst_13 = arith.constant dense<0.000000e+00> : vector<128x48xf32>
    %33 = tpu.matmul %31, %32, %cst_13 {dimension_numbers = #tpu.dot_dimension_numbers<[1], [0], [0], [1], [0, 0, 1, 1], [], []>} : vector<128x16xbf16>, vector<16x48xbf16>, vector<128x48xf32> -> vector<128x48xf32>
    %34 = arith.addf %8, %33 : vector<128x48xf32>
    %c0_14 = arith.constant 0 : index
    %35 = arith.index_cast %1 : i32 to index
    %c16 = arith.constant 16 : index
    %36 = vector.load %arg2[%c0_14, %35, %c16] : memref<1x128x144xbf16, #tpu.memory_space<vmem>>, vector<1x128x16xbf16>
    %37 = vector.shape_cast %36 : vector<1x128x16xbf16> to vector<128x16xbf16>
    %c0_15 = arith.constant 0 : index
    %c0_16 = arith.constant 0 : index
    %c64 = arith.constant 64 : index
    %38 = vector.load %arg2[%c0_15, %c0_16, %c64] : memref<1x128x144xbf16, #tpu.memory_space<vmem>>, vector<1x128x16xbf16>
    %39 = vector.shape_cast %38 : vector<1x128x16xbf16> to vector<128x16xbf16>
    %c0_17 = arith.constant 0 : index
    %c0_18 = arith.constant 0 : index
    %c112 = arith.constant 112 : index
    %40 = vector.load %arg2[%c0_17, %c0_18, %c112] : memref<1x128x144xbf16, #tpu.memory_space<vmem>>, vector<1x128x16xbf16>
    %41 = vector.shape_cast %40 : vector<1x128x16xbf16> to vector<128x16xbf16>
    %cst_19 = arith.constant dense<0.000000e+00> : vector<128x128xf32>
    %42 = tpu.matmul %37, %39, %cst_19 {dimension_numbers = #tpu.dot_dimension_numbers<[1], [1], [0], [0], [0, 0, 1, 0], [], []>} : vector<128x16xbf16>, vector<128x16xbf16>, vector<128x128xf32> -> vector<128x128xf32>
    %43 = vector.broadcast %7 : vector<1x128xf32> to vector<128x128xf32>
    %44 = arith.addf %42, %43 : vector<128x128xf32>
    %cst_20 = arith.constant dense<0xFF800000> : vector<128xf32>
    %45 = vector.multi_reduction <maximumf>, %44, %cst_20 [1] : vector<128x128xf32> to vector<128xf32>
    %46 = vector.shape_cast %45 : vector<128xf32> to vector<128x1xf32>
    %47 = vector.broadcast %46 : vector<128x1xf32> to vector<128x128xf32>
    %48 = arith.subf %44, %47 : vector<128x128xf32>
    %49 = math.exp %48 : vector<128x128xf32>
    %cst_21 = arith.constant dense<0.000000e+00> : vector<128xf32>
    %50 = vector.multi_reduction <add>, %49, %cst_21 [1] : vector<128x128xf32> to vector<128xf32>
    %51 = vector.shape_cast %50 : vector<128xf32> to vector<128x1xf32>
    %52 = arith.truncf %49 : vector<128x128xf32> to vector<128x128xbf16>
    %cst_22 = arith.constant dense<0.000000e+00> : vector<128x16xf32>
    %53 = tpu.matmul %52, %41, %cst_22 {dimension_numbers = #tpu.dot_dimension_numbers<[1], [0], [0], [1], [0, 0, 1, 1], [], []>} : vector<128x128xbf16>, vector<128x16xbf16>, vector<128x16xf32> -> vector<128x16xf32>
    %54 = tpu.reciprocal %51 {approx = true} : vector<128x1xf32> -> vector<128x1xf32>
    %55 = vector.broadcast %54 : vector<128x1xf32> to vector<128x16xf32>
    %56 = arith.mulf %53, %55 : vector<128x16xf32>
    %57 = arith.truncf %56 : vector<128x16xf32> to vector<128x16xbf16>
    %c16_23 = arith.constant 16 : index
    %c0_24 = arith.constant 0 : index
    %58 = vector.load %arg4[%c16_23, %c0_24] : memref<48x48xbf16, #tpu.memory_space<vmem>>, vector<16x48xbf16>
    %cst_25 = arith.constant dense<0.000000e+00> : vector<128x48xf32>
    %59 = tpu.matmul %57, %58, %cst_25 {dimension_numbers = #tpu.dot_dimension_numbers<[1], [0], [0], [1], [0, 0, 1, 1], [], []>} : vector<128x16xbf16>, vector<16x48xbf16>, vector<128x48xf32> -> vector<128x48xf32>
    %60 = arith.addf %34, %59 : vector<128x48xf32>
    %c0_26 = arith.constant 0 : index
    %61 = arith.index_cast %1 : i32 to index
    %c32 = arith.constant 32 : index
    %62 = vector.load %arg2[%c0_26, %61, %c32] : memref<1x128x144xbf16, #tpu.memory_space<vmem>>, vector<1x128x16xbf16>
    %63 = vector.shape_cast %62 : vector<1x128x16xbf16> to vector<128x16xbf16>
    %c0_27 = arith.constant 0 : index
    %c0_28 = arith.constant 0 : index
    %c80 = arith.constant 80 : index
    %64 = vector.load %arg2[%c0_27, %c0_28, %c80] : memref<1x128x144xbf16, #tpu.memory_space<vmem>>, vector<1x128x16xbf16>
    %65 = vector.shape_cast %64 : vector<1x128x16xbf16> to vector<128x16xbf16>
    %c0_29 = arith.constant 0 : index
    %c0_30 = arith.constant 0 : index
    %c128 = arith.constant 128 : index
    %66 = vector.load %arg2[%c0_29, %c0_30, %c128] : memref<1x128x144xbf16, #tpu.memory_space<vmem>>, vector<1x128x16xbf16>
    %67 = vector.shape_cast %66 : vector<1x128x16xbf16> to vector<128x16xbf16>
    %cst_31 = arith.constant dense<0.000000e+00> : vector<128x128xf32>
    %68 = tpu.matmul %63, %65, %cst_31 {dimension_numbers = #tpu.dot_dimension_numbers<[1], [1], [0], [0], [0, 0, 1, 0], [], []>} : vector<128x16xbf16>, vector<128x16xbf16>, vector<128x128xf32> -> vector<128x128xf32>
    %69 = vector.broadcast %7 : vector<1x128xf32> to vector<128x128xf32>
    %70 = arith.addf %68, %69 : vector<128x128xf32>
    %cst_32 = arith.constant dense<0xFF800000> : vector<128xf32>
    %71 = vector.multi_reduction <maximumf>, %70, %cst_32 [1] : vector<128x128xf32> to vector<128xf32>
    %72 = vector.shape_cast %71 : vector<128xf32> to vector<128x1xf32>
    %73 = vector.broadcast %72 : vector<128x1xf32> to vector<128x128xf32>
    %74 = arith.subf %70, %73 : vector<128x128xf32>
    %75 = math.exp %74 : vector<128x128xf32>
    %cst_33 = arith.constant dense<0.000000e+00> : vector<128xf32>
    %76 = vector.multi_reduction <add>, %75, %cst_33 [1] : vector<128x128xf32> to vector<128xf32>
    %77 = vector.shape_cast %76 : vector<128xf32> to vector<128x1xf32>
    %78 = arith.truncf %75 : vector<128x128xf32> to vector<128x128xbf16>
    %cst_34 = arith.constant dense<0.000000e+00> : vector<128x16xf32>
    %79 = tpu.matmul %78, %67, %cst_34 {dimension_numbers = #tpu.dot_dimension_numbers<[1], [0], [0], [1], [0, 0, 1, 1], [], []>} : vector<128x128xbf16>, vector<128x16xbf16>, vector<128x16xf32> -> vector<128x16xf32>
    %80 = tpu.reciprocal %77 {approx = true} : vector<128x1xf32> -> vector<128x1xf32>
    %81 = vector.broadcast %80 : vector<128x1xf32> to vector<128x16xf32>
    %82 = arith.mulf %79, %81 : vector<128x16xf32>
    %83 = arith.truncf %82 : vector<128x16xf32> to vector<128x16xbf16>
    %c32_35 = arith.constant 32 : index
    %c0_36 = arith.constant 0 : index
    %84 = vector.load %arg4[%c32_35, %c0_36] : memref<48x48xbf16, #tpu.memory_space<vmem>>, vector<16x48xbf16>
    %cst_37 = arith.constant dense<0.000000e+00> : vector<128x48xf32>
    %85 = tpu.matmul %83, %84, %cst_37 {dimension_numbers = #tpu.dot_dimension_numbers<[1], [0], [0], [1], [0, 0, 1, 1], [], []>} : vector<128x16xbf16>, vector<16x48xbf16>, vector<128x48xf32> -> vector<128x48xf32>
    %86 = arith.addf %60, %85 : vector<128x48xf32>
    %c0_38 = arith.constant 0 : index
    %c0_39 = arith.constant 0 : index
    %87 = vector.load %arg5[%c0_38, %c0_39] : memref<1x48xf32, #tpu.memory_space<vmem>>, vector<1x48xf32>
    %88 = vector.broadcast %87 : vector<1x48xf32> to vector<128x48xf32>
    %89 = arith.addf %86, %88 : vector<128x48xf32>
    %c0_40 = arith.constant 0 : index
    %c0_41 = arith.constant 0 : index
    %c0_42 = arith.constant 0 : index
    %90 = vector.load %arg3[%c0_40, %c0_41, %c0_42] : memref<1x128x48xf32, #tpu.memory_space<vmem>>, vector<1x128x48xf32>
    %91 = vector.shape_cast %90 : vector<1x128x48xf32> to vector<128x48xf32>
    %92 = arith.addf %89, %91 : vector<128x48xf32>
    %c0_43 = arith.constant 0 : index
    %c0_44 = arith.constant 0 : index
    %c0_45 = arith.constant 0 : index
    %93 = vector.load %arg6[%c0_43, %c0_44, %c0_45] : memref<1x128x48xf32, #tpu.memory_space<vmem>>, vector<1x128x48xf32>
    %94 = vector.shape_cast %93 : vector<1x128x48xf32> to vector<128x48xf32>
    %95 = vector.shape_cast %92 : vector<128x48xf32> to vector<1x128x48xf32>
    tpu.vector_store %arg6[%c0_43, %c0_44, %c0_45], %95 {strides = array<i32>} : memref<1x128x48xf32, #tpu.memory_space<vmem>>, vector<1x128x48xf32>,
    return
  }
  func.func @transform_0(%arg0: i32, %arg1: i32) -> (i32, i32, i32) {
    %c0_i32 = arith.constant 0 : i32
    %c0_i32_0 = arith.constant 0 : i32
    %c0_i32_1 = arith.constant 0 : i32
    return %arg0, %c0_i32, %c0_i32_0 : i32, i32, i32
  }
  func.func @transform_1(%arg0: i32, %arg1: i32) -> (i32, i32, i32) {
    %c0_i32 = arith.constant 0 : i32
    %c0_i32_0 = arith.constant 0 : i32
    return %arg0, %arg1, %c0_i32 : i32, i32, i32
  }
  func.func @transform_2(%arg0: i32, %arg1: i32) -> (i32, i32) {
    %c0_i32 = arith.constant 0 : i32
    %c0_i32_0 = arith.constant 0 : i32
    %c0_i32_1 = arith.constant 0 : i32
    return %c0_i32, %c0_i32_0 : i32, i32
  }
  func.func @transform_3(%arg0: i32, %arg1: i32) -> (i32, i32) {
    %c0_i32 = arith.constant 0 : i32
    %c0_i32_0 = arith.constant 0 : i32
    %c0_i32_1 = arith.constant 0 : i32
    return %c0_i32, %c0_i32_0 : i32, i32
  }
  func.func @transform_4(%arg0: i32, %arg1: i32) -> (i32, i32, i32) {
    %c0_i32 = arith.constant 0 : i32
    %c0_i32_0 = arith.constant 0 : i32
    return %arg0, %arg1, %c0_i32 : i32, i32, i32
  }
}

module attributes {stable_mosaic.version = 11 : i64} {
  func.func @_ln_matmul_kernel(%arg0: i32, %arg1: memref<128x48xf32, #tpu.memory_space<vmem>>, %arg2: memref<1x48xf32, #tpu.memory_space<vmem>>, %arg3: memref<1x48xf32, #tpu.memory_space<vmem>>, %arg4: memref<48x144xbf16, #tpu.memory_space<vmem>>, %arg5: memref<1x144xf32, #tpu.memory_space<vmem>>, %arg6: memref<128x144xbf16, #tpu.memory_space<vmem>>) attributes {dimension_semantics = [#tpu.dimension_semantics<parallel>], iteration_bounds = array<i64: 2>, scalar_prefetch = 0 : i64, scratch_operands = 0 : i64, tpu.core_type = #tpu.core_type<tc>, window_params = [{transform_indices = @transform_0, window_bounds = array<i64: 128, 48>}, {pipeline_mode = #tpu.pipeline_mode<synchronous>, transform_indices = @transform_1, window_bounds = array<i64: 1, 48>}, {pipeline_mode = #tpu.pipeline_mode<synchronous>, transform_indices = @transform_2, window_bounds = array<i64: 1, 48>}, {pipeline_mode = #tpu.pipeline_mode<synchronous>, transform_indices = @transform_3, window_bounds = array<i64: 48, 144>}, {pipeline_mode = #tpu.pipeline_mode<synchronous>, transform_indices = @transform_4, window_bounds = array<i64: 1, 144>}, {transform_indices = @transform_5, window_bounds = array<i64: 128, 144>}]} {
    %c0 = arith.constant 0 : index
    %c0_0 = arith.constant 0 : index
    %0 = vector.load %arg1[%c0, %c0_0] : memref<128x48xf32, #tpu.memory_space<vmem>>, vector<128x48xf32>
    %cst = arith.constant dense<0.000000e+00> : vector<128xf32>
    %1 = vector.multi_reduction <add>, %0, %cst [1] : vector<128x48xf32> to vector<128xf32>
    %2 = vector.shape_cast %1 : vector<128xf32> to vector<128x1xf32>
    %cst_1 = arith.constant 4.800000e+01 : f32
    %3 = vector.broadcast %cst_1 : f32 to vector<128x1xf32>
    %4 = arith.divf %2, %3 : vector<128x1xf32>
    %5 = vector.broadcast %4 : vector<128x1xf32> to vector<128x48xf32>
    %6 = arith.subf %0, %5 : vector<128x48xf32>
    %7 = arith.mulf %6, %6 : vector<128x48xf32>
    %cst_2 = arith.constant dense<0.000000e+00> : vector<128xf32>
    %8 = vector.multi_reduction <add>, %7, %cst_2 [1] : vector<128x48xf32> to vector<128xf32>
    %9 = vector.shape_cast %8 : vector<128xf32> to vector<128x1xf32>
    %cst_3 = arith.constant 4.800000e+01 : f32
    %10 = vector.broadcast %cst_3 : f32 to vector<128x1xf32>
    %11 = arith.divf %9, %10 : vector<128x1xf32>
    %cst_4 = arith.constant 9.99999997E-7 : f32
    %12 = vector.broadcast %cst_4 : f32 to vector<128x1xf32>
    %13 = arith.addf %11, %12 : vector<128x1xf32>
    %14 = math.rsqrt %13 : vector<128x1xf32>
    %15 = vector.broadcast %14 : vector<128x1xf32> to vector<128x48xf32>
    %16 = arith.mulf %6, %15 : vector<128x48xf32>
    %c0_5 = arith.constant 0 : index
    %c0_6 = arith.constant 0 : index
    %17 = vector.load %arg2[%c0_5, %c0_6] : memref<1x48xf32, #tpu.memory_space<vmem>>, vector<1x48xf32>
    %18 = vector.broadcast %17 : vector<1x48xf32> to vector<128x48xf32>
    %19 = arith.mulf %16, %18 : vector<128x48xf32>
    %c0_7 = arith.constant 0 : index
    %c0_8 = arith.constant 0 : index
    %20 = vector.load %arg3[%c0_7, %c0_8] : memref<1x48xf32, #tpu.memory_space<vmem>>, vector<1x48xf32>
    %21 = vector.broadcast %20 : vector<1x48xf32> to vector<128x48xf32>
    %22 = arith.addf %19, %21 : vector<128x48xf32>
    %23 = arith.truncf %22 : vector<128x48xf32> to vector<128x48xbf16>
    %c0_9 = arith.constant 0 : index
    %c0_10 = arith.constant 0 : index
    %24 = vector.load %arg4[%c0_9, %c0_10] : memref<48x144xbf16, #tpu.memory_space<vmem>>, vector<48x144xbf16>
    %cst_11 = arith.constant dense<0.000000e+00> : vector<128x144xf32>
    %25 = tpu.matmul %23, %24, %cst_11 {dimension_numbers = #tpu.dot_dimension_numbers<[1], [0], [0], [1], [0, 0, 1, 1], [], []>} : vector<128x48xbf16>, vector<48x144xbf16>, vector<128x144xf32> -> vector<128x144xf32>
    %c0_12 = arith.constant 0 : index
    %c0_13 = arith.constant 0 : index
    %26 = vector.load %arg5[%c0_12, %c0_13] : memref<1x144xf32, #tpu.memory_space<vmem>>, vector<1x144xf32>
    %27 = vector.broadcast %26 : vector<1x144xf32> to vector<128x144xf32>
    %28 = arith.addf %25, %27 : vector<128x144xf32>
    %29 = arith.truncf %28 : vector<128x144xf32> to vector<128x144xbf16>
    %c0_14 = arith.constant 0 : index
    %c0_15 = arith.constant 0 : index
    %30 = vector.load %arg6[%c0_14, %c0_15] : memref<128x144xbf16, #tpu.memory_space<vmem>>, vector<128x144xbf16>
    tpu.vector_store %arg6[%c0_14, %c0_15], %29 {strides = array<i32>} : memref<128x144xbf16, #tpu.memory_space<vmem>>, vector<128x144xbf16>,
    return
  }
  func.func @transform_0(%arg0: i32) -> (i32, i32) {
    %c0_i32 = arith.constant 0 : i32
    %c0_i32_0 = arith.constant 0 : i32
    return %arg0, %c0_i32 : i32, i32
  }
  func.func @transform_1(%arg0: i32) -> (i32, i32) {
    %c0_i32 = arith.constant 0 : i32
    %c0_i32_0 = arith.constant 0 : i32
    %c0_i32_1 = arith.constant 0 : i32
    return %c0_i32, %c0_i32_0 : i32, i32
  }
  func.func @transform_2(%arg0: i32) -> (i32, i32) {
    %c0_i32 = arith.constant 0 : i32
    %c0_i32_0 = arith.constant 0 : i32
    %c0_i32_1 = arith.constant 0 : i32
    return %c0_i32, %c0_i32_0 : i32, i32
  }
  func.func @transform_3(%arg0: i32) -> (i32, i32) {
    %c0_i32 = arith.constant 0 : i32
    %c0_i32_0 = arith.constant 0 : i32
    %c0_i32_1 = arith.constant 0 : i32
    return %c0_i32, %c0_i32_0 : i32, i32
  }
  func.func @transform_4(%arg0: i32) -> (i32, i32) {
    %c0_i32 = arith.constant 0 : i32
    %c0_i32_0 = arith.constant 0 : i32
    %c0_i32_1 = arith.constant 0 : i32
    return %c0_i32, %c0_i32_0 : i32, i32
  }
  func.func @transform_5(%arg0: i32) -> (i32, i32) {
    %c0_i32 = arith.constant 0 : i32
    %c0_i32_0 = arith.constant 0 : i32
    return %arg0, %c0_i32 : i32, i32
  }
}

module attributes {stable_mosaic.version = 11 : i64} {
  func.func @_matmul_residual_kernel(%arg0: i32, %arg1: memref<128x192xbf16, #tpu.memory_space<vmem>>, %arg2: memref<192x48xbf16, #tpu.memory_space<vmem>>, %arg3: memref<1x48xf32, #tpu.memory_space<vmem>>, %arg4: memref<128x48xf32, #tpu.memory_space<vmem>>, %arg5: memref<128x48xf32, #tpu.memory_space<vmem>>) attributes {dimension_semantics = [#tpu.dimension_semantics<parallel>], iteration_bounds = array<i64: 2>, scalar_prefetch = 0 : i64, scratch_operands = 0 : i64, tpu.core_type = #tpu.core_type<tc>, window_params = [{transform_indices = @transform_0, window_bounds = array<i64: 128, 192>}, {pipeline_mode = #tpu.pipeline_mode<synchronous>, transform_indices = @transform_1, window_bounds = array<i64: 192, 48>}, {pipeline_mode = #tpu.pipeline_mode<synchronous>, transform_indices = @transform_2, window_bounds = array<i64: 1, 48>}, {transform_indices = @transform_3, window_bounds = array<i64: 128, 48>}, {transform_indices = @transform_4, window_bounds = array<i64: 128, 48>}]} {
    %c0 = arith.constant 0 : index
    %c0_0 = arith.constant 0 : index
    %0 = vector.load %arg1[%c0, %c0_0] : memref<128x192xbf16, #tpu.memory_space<vmem>>, vector<128x192xbf16>
    %c0_1 = arith.constant 0 : index
    %c0_2 = arith.constant 0 : index
    %1 = vector.load %arg2[%c0_1, %c0_2] : memref<192x48xbf16, #tpu.memory_space<vmem>>, vector<192x48xbf16>
    %cst = arith.constant dense<0.000000e+00> : vector<128x48xf32>
    %2 = tpu.matmul %0, %1, %cst {dimension_numbers = #tpu.dot_dimension_numbers<[1], [0], [0], [1], [0, 0, 1, 1], [], []>} : vector<128x192xbf16>, vector<192x48xbf16>, vector<128x48xf32> -> vector<128x48xf32>
    %c0_3 = arith.constant 0 : index
    %c0_4 = arith.constant 0 : index
    %3 = vector.load %arg3[%c0_3, %c0_4] : memref<1x48xf32, #tpu.memory_space<vmem>>, vector<1x48xf32>
    %4 = vector.broadcast %3 : vector<1x48xf32> to vector<128x48xf32>
    %5 = arith.addf %2, %4 : vector<128x48xf32>
    %c0_5 = arith.constant 0 : index
    %c0_6 = arith.constant 0 : index
    %6 = vector.load %arg4[%c0_5, %c0_6] : memref<128x48xf32, #tpu.memory_space<vmem>>, vector<128x48xf32>
    %7 = arith.addf %5, %6 : vector<128x48xf32>
    %c0_7 = arith.constant 0 : index
    %c0_8 = arith.constant 0 : index
    %8 = vector.load %arg5[%c0_7, %c0_8] : memref<128x48xf32, #tpu.memory_space<vmem>>, vector<128x48xf32>
    tpu.vector_store %arg5[%c0_7, %c0_8], %7 {strides = array<i32>} : memref<128x48xf32, #tpu.memory_space<vmem>>, vector<128x48xf32>,
    return
  }
  func.func @transform_0(%arg0: i32) -> (i32, i32) {
    %c0_i32 = arith.constant 0 : i32
    %c0_i32_0 = arith.constant 0 : i32
    return %arg0, %c0_i32 : i32, i32
  }
  func.func @transform_1(%arg0: i32) -> (i32, i32) {
    %c0_i32 = arith.constant 0 : i32
    %c0_i32_0 = arith.constant 0 : i32
    %c0_i32_1 = arith.constant 0 : i32
    return %c0_i32, %c0_i32_0 : i32, i32
  }
  func.func @transform_2(%arg0: i32) -> (i32, i32) {
    %c0_i32 = arith.constant 0 : i32
    %c0_i32_0 = arith.constant 0 : i32
    %c0_i32_1 = arith.constant 0 : i32
    return %c0_i32, %c0_i32_0 : i32, i32
  }
  func.func @transform_3(%arg0: i32) -> (i32, i32) {
    %c0_i32 = arith.constant 0 : i32
    %c0_i32_0 = arith.constant 0 : i32
    return %arg0, %c0_i32 : i32, i32
  }
  func.func @transform_4(%arg0: i32) -> (i32, i32) {
    %c0_i32 = arith.constant 0 : i32
    %c0_i32_0 = arith.constant 0 : i32
    return %arg0, %c0_i32 : i32, i32
  }
}

module attributes {stable_mosaic.version = 11 : i64} {
  func.func @_head_kernel(%arg0: i32, %arg1: memref<2x2x48xf32, #tpu.memory_space<vmem>>, %arg2: memref<1x1x48xf32, #tpu.memory_space<vmem>>, %arg3: memref<1x1x48xf32, #tpu.memory_space<vmem>>, %arg4: memref<1x48xf32, #tpu.memory_space<vmem>>, %arg5: memref<1x48xf32, #tpu.memory_space<vmem>>, %arg6: memref<48x1xbf16, #tpu.memory_space<vmem>>, %arg7: memref<1x1xf32, #tpu.memory_space<vmem>>, %arg8: memref<2x1xf32, #tpu.memory_space<vmem>>) attributes {dimension_semantics = [#tpu.dimension_semantics<arbitrary>], iteration_bounds = array<i64: 1>, scalar_prefetch = 0 : i64, scratch_operands = 0 : i64, tpu.core_type = #tpu.core_type<tc>, window_params = [{pipeline_mode = #tpu.pipeline_mode<synchronous>, transform_indices = @transform_0, window_bounds = array<i64: 2, 2, 48>}, {pipeline_mode = #tpu.pipeline_mode<synchronous>, transform_indices = @transform_1, window_bounds = array<i64: 1, 1, 48>}, {pipeline_mode = #tpu.pipeline_mode<synchronous>, transform_indices = @transform_2, window_bounds = array<i64: 1, 1, 48>}, {pipeline_mode = #tpu.pipeline_mode<synchronous>, transform_indices = @transform_3, window_bounds = array<i64: 1, 48>}, {pipeline_mode = #tpu.pipeline_mode<synchronous>, transform_indices = @transform_4, window_bounds = array<i64: 1, 48>}, {pipeline_mode = #tpu.pipeline_mode<synchronous>, transform_indices = @transform_5, window_bounds = array<i64: 48, 1>}, {pipeline_mode = #tpu.pipeline_mode<synchronous>, transform_indices = @transform_6, window_bounds = array<i64: 1, 1>}, {pipeline_mode = #tpu.pipeline_mode<synchronous>, transform_indices = @transform_7, window_bounds = array<i64: 2, 1>}]} {
    %c0 = arith.constant 0 : index
    %c0_0 = arith.constant 0 : index
    %c0_1 = arith.constant 0 : index
    %0 = vector.load %arg1[%c0, %c0_0, %c0_1] : memref<2x2x48xf32, #tpu.memory_space<vmem>>, vector<2x2x48xf32>
    %cst = arith.constant dense<0.000000e+00> : vector<2x2xf32>
    %1 = vector.multi_reduction <add>, %0, %cst [2] : vector<2x2x48xf32> to vector<2x2xf32>
    %2 = vector.shape_cast %1 : vector<2x2xf32> to vector<2x2x1xf32>
    %cst_2 = arith.constant 4.800000e+01 : f32
    %3 = vector.broadcast %cst_2 : f32 to vector<2x2x1xf32>
    %4 = arith.divf %2, %3 : vector<2x2x1xf32>
    %5 = vector.broadcast %4 : vector<2x2x1xf32> to vector<2x2x48xf32>
    %6 = arith.subf %0, %5 : vector<2x2x48xf32>
    %7 = arith.mulf %6, %6 : vector<2x2x48xf32>
    %cst_3 = arith.constant dense<0.000000e+00> : vector<2x2xf32>
    %8 = vector.multi_reduction <add>, %7, %cst_3 [2] : vector<2x2x48xf32> to vector<2x2xf32>
    %9 = vector.shape_cast %8 : vector<2x2xf32> to vector<2x2x1xf32>
    %cst_4 = arith.constant 4.800000e+01 : f32
    %10 = vector.broadcast %cst_4 : f32 to vector<2x2x1xf32>
    %11 = arith.divf %9, %10 : vector<2x2x1xf32>
    %cst_5 = arith.constant 9.99999997E-7 : f32
    %12 = vector.broadcast %cst_5 : f32 to vector<2x2x1xf32>
    %13 = arith.addf %11, %12 : vector<2x2x1xf32>
    %14 = math.rsqrt %13 : vector<2x2x1xf32>
    %15 = vector.broadcast %14 : vector<2x2x1xf32> to vector<2x2x48xf32>
    %16 = arith.mulf %6, %15 : vector<2x2x48xf32>
    %c0_6 = arith.constant 0 : index
    %c0_7 = arith.constant 0 : index
    %c0_8 = arith.constant 0 : index
    %17 = vector.load %arg2[%c0_6, %c0_7, %c0_8] : memref<1x1x48xf32, #tpu.memory_space<vmem>>, vector<1x1x48xf32>
    %18 = vector.broadcast %17 : vector<1x1x48xf32> to vector<2x2x48xf32>
    %19 = arith.mulf %16, %18 : vector<2x2x48xf32>
    %c0_9 = arith.constant 0 : index
    %c0_10 = arith.constant 0 : index
    %c0_11 = arith.constant 0 : index
    %20 = vector.load %arg3[%c0_9, %c0_10, %c0_11] : memref<1x1x48xf32, #tpu.memory_space<vmem>>, vector<1x1x48xf32>
    %21 = vector.broadcast %20 : vector<1x1x48xf32> to vector<2x2x48xf32>
    %22 = arith.addf %19, %21 : vector<2x2x48xf32>
    %23 = vector.extract_strided_slice %22 {offsets = [0, 0, 0], sizes = [2, 1, 48], strides = [1, 1, 1]} : vector<2x2x48xf32> to vector<2x1x48xf32>
    %24 = vector.shape_cast %23 : vector<2x1x48xf32> to vector<2x48xf32>
    %25 = vector.extract_strided_slice %22 {offsets = [0, 1, 0], sizes = [2, 1, 48], strides = [1, 1, 1]} : vector<2x2x48xf32> to vector<2x1x48xf32>
    %26 = vector.shape_cast %25 : vector<2x1x48xf32> to vector<2x48xf32>
    %27 = arith.addf %24, %26 : vector<2x48xf32>
    %cst_12 = arith.constant 5.000000e-01 : f32
    %28 = vector.broadcast %cst_12 : f32 to vector<2x48xf32>
    %29 = arith.mulf %27, %28 : vector<2x48xf32>
    %cst_13 = arith.constant dense<0.000000e+00> : vector<2xf32>
    %30 = vector.multi_reduction <add>, %29, %cst_13 [1] : vector<2x48xf32> to vector<2xf32>
    %31 = vector.shape_cast %30 : vector<2xf32> to vector<2x1xf32>
    %cst_14 = arith.constant 4.800000e+01 : f32
    %32 = vector.broadcast %cst_14 : f32 to vector<2x1xf32>
    %33 = arith.divf %31, %32 : vector<2x1xf32>
    %34 = vector.broadcast %33 : vector<2x1xf32> to vector<2x48xf32>
    %35 = arith.subf %29, %34 : vector<2x48xf32>
    %36 = arith.mulf %35, %35 : vector<2x48xf32>
    %cst_15 = arith.constant dense<0.000000e+00> : vector<2xf32>
    %37 = vector.multi_reduction <add>, %36, %cst_15 [1] : vector<2x48xf32> to vector<2xf32>
    %38 = vector.shape_cast %37 : vector<2xf32> to vector<2x1xf32>
    %cst_16 = arith.constant 4.800000e+01 : f32
    %39 = vector.broadcast %cst_16 : f32 to vector<2x1xf32>
    %40 = arith.divf %38, %39 : vector<2x1xf32>
    %cst_17 = arith.constant 9.99999974E-6 : f32
    %41 = vector.broadcast %cst_17 : f32 to vector<2x1xf32>
    %42 = arith.addf %40, %41 : vector<2x1xf32>
    %43 = math.rsqrt %42 : vector<2x1xf32>
    %44 = vector.broadcast %43 : vector<2x1xf32> to vector<2x48xf32>
    %45 = arith.mulf %35, %44 : vector<2x48xf32>
    %c0_18 = arith.constant 0 : index
    %c0_19 = arith.constant 0 : index
    %46 = vector.load %arg4[%c0_18, %c0_19] : memref<1x48xf32, #tpu.memory_space<vmem>>, vector<1x48xf32>
    %47 = vector.broadcast %46 : vector<1x48xf32> to vector<2x48xf32>
    %48 = arith.mulf %45, %47 : vector<2x48xf32>
    %c0_20 = arith.constant 0 : index
    %c0_21 = arith.constant 0 : index
    %49 = vector.load %arg5[%c0_20, %c0_21] : memref<1x48xf32, #tpu.memory_space<vmem>>, vector<1x48xf32>
    %50 = vector.broadcast %49 : vector<1x48xf32> to vector<2x48xf32>
    %51 = arith.addf %48, %50 : vector<2x48xf32>
    %52 = arith.truncf %51 : vector<2x48xf32> to vector<2x48xbf16>
    %c0_22 = arith.constant 0 : index
    %c0_23 = arith.constant 0 : index
    %53 = vector.load %arg6[%c0_22, %c0_23] : memref<48x1xbf16, #tpu.memory_space<vmem>>, vector<48x1xbf16>
    %cst_24 = arith.constant dense<0.000000e+00> : vector<2x1xf32>
    %54 = tpu.matmul %52, %53, %cst_24 {dimension_numbers = #tpu.dot_dimension_numbers<[1], [0], [0], [1], [0, 0, 1, 1], [], []>} : vector<2x48xbf16>, vector<48x1xbf16>, vector<2x1xf32> -> vector<2x1xf32>
    %c0_25 = arith.constant 0 : index
    %c0_26 = arith.constant 0 : index
    %55 = vector.load %arg7[%c0_25, %c0_26] : memref<1x1xf32, #tpu.memory_space<vmem>>, vector<1x1xf32>
    %56 = vector.broadcast %55 : vector<1x1xf32> to vector<2x1xf32>
    %57 = arith.addf %54, %56 : vector<2x1xf32>
    %c0_27 = arith.constant 0 : index
    %c0_28 = arith.constant 0 : index
    %58 = vector.load %arg8[%c0_27, %c0_28] : memref<2x1xf32, #tpu.memory_space<vmem>>, vector<2x1xf32>
    tpu.vector_store %arg8[%c0_27, %c0_28], %57 {strides = array<i32>} : memref<2x1xf32, #tpu.memory_space<vmem>>, vector<2x1xf32>,
    return
  }
  func.func @transform_0(%arg0: i32) -> (i32, i32, i32) {
    %c0_i32 = arith.constant 0 : i32
    %c0_i32_0 = arith.constant 0 : i32
    %c0_i32_1 = arith.constant 0 : i32
    %c0_i32_2 = arith.constant 0 : i32
    return %c0_i32, %c0_i32_0, %c0_i32_1 : i32, i32, i32
  }
  func.func @transform_1(%arg0: i32) -> (i32, i32, i32) {
    %c0_i32 = arith.constant 0 : i32
    %c0_i32_0 = arith.constant 0 : i32
    %c0_i32_1 = arith.constant 0 : i32
    %c0_i32_2 = arith.constant 0 : i32
    return %c0_i32, %c0_i32_0, %c0_i32_1 : i32, i32, i32
  }
  func.func @transform_2(%arg0: i32) -> (i32, i32, i32) {
    %c0_i32 = arith.constant 0 : i32
    %c0_i32_0 = arith.constant 0 : i32
    %c0_i32_1 = arith.constant 0 : i32
    %c0_i32_2 = arith.constant 0 : i32
    return %c0_i32, %c0_i32_0, %c0_i32_1 : i32, i32, i32
  }
  func.func @transform_3(%arg0: i32) -> (i32, i32) {
    %c0_i32 = arith.constant 0 : i32
    %c0_i32_0 = arith.constant 0 : i32
    %c0_i32_1 = arith.constant 0 : i32
    return %c0_i32, %c0_i32_0 : i32, i32
  }
  func.func @transform_4(%arg0: i32) -> (i32, i32) {
    %c0_i32 = arith.constant 0 : i32
    %c0_i32_0 = arith.constant 0 : i32
    %c0_i32_1 = arith.constant 0 : i32
    return %c0_i32, %c0_i32_0 : i32, i32
  }
  func.func @transform_5(%arg0: i32) -> (i32, i32) {
    %c0_i32 = arith.constant 0 : i32
    %c0_i32_0 = arith.constant 0 : i32
    %c0_i32_1 = arith.constant 0 : i32
    return %c0_i32, %c0_i32_0 : i32, i32
  }
  func.func @transform_6(%arg0: i32) -> (i32, i32) {
    %c0_i32 = arith.constant 0 : i32
    %c0_i32_0 = arith.constant 0 : i32
    %c0_i32_1 = arith.constant 0 : i32
    return %c0_i32, %c0_i32_0 : i32, i32
  }
  func.func @transform_7(%arg0: i32) -> (i32, i32) {
    %c0_i32 = arith.constant 0 : i32
    %c0_i32_0 = arith.constant 0 : i32
    %c0_i32_1 = arith.constant 0 : i32
    return %c0_i32, %c0_i32_0 : i32, i32
  }
}

</mosaic_0001>

<bundles_post_ra>
// kernel: ast_forward.10
= control target key start
LH: loop header
LB: loop body
LE: loop exit
PB: predicated region body
PF: predicated region fallthrough
CT: control target
= control target key end

     0   :  { %vm295_vm0 = vcmask 392192   ;;  %s678_s1 = inlined_call_operand.vmem [shape: bf16[256,48], index: 1, kind: input, shape index: {}]   ;;  %s679_s0 = inlined_call_operand.vmem [shape: f32[128,256], index: 0, kind: input, shape index: {}]   ;;  %s680_s2 = inlined_call_operand.vmem [shape: f32[1,48], index: 2, kind: input, shape index: {}]   ;;  %s681_s3 = inlined_call_operand.vmem [shape: f32[128,48], index: 3, kind: output, shape index: {}]  }
   0x1   :  { %v413_v0 = vld [vmem:[%s678_s1 + $0x78] sm:$0xff]   ;;  %v415_v2 = vld [vmem:[%s678_s1 + $0x70] sm:$0xff]   ;;  %v417_v4 = vld [vmem:[%s678_s1 + $0x68] sm:$0xff]  }
   0x2   :  { %v414_v1 = vld [vmem:[%s678_s1 + $0x38] sm:$0xff]   ;;  %333 = vmatprep.subr.bf16.mxu0 %v413_v0  ;;  %397 = vmatprep.subr.bf16.mxu1 %v413_v0  ;;  %v416_v3 = vld [vmem:[%s678_s1 + $0x30] sm:$0xff]   ;;  %v418_v5 = vld [vmem:[%s678_s1 + $0x28] sm:$0xff]  }
   0x3   :  { %334 = vmatpush3.bf16.msra.mxu0 %v414_v1  ;;  %405 = vmatpush3.bf16.msra.mxu1 %v414_v1  ;;  %v419_v6 = vld [vmem:[%s678_s1 + $0x60] sm:$0xff]   ;;  %v421_v8 = vld [vmem:[%s678_s1 + $0x58] sm:$0xff]   ;;  %v423_v10 = vld [vmem:[%s678_s1 + $0x50] sm:$0xff]  }
   0x4   :  { %335 = vmatprep.subr.bf16.mxu0 %v415_v2  ;;  %398 = vmatprep.subr.bf16.mxu1 %v415_v2  ;;  %v420_v7 = vld [vmem:[%s678_s1 + $0x20] sm:$0xff]   ;;  %v422_v9 = vld [vmem:[%s678_s1 + $0x18] sm:$0xff]   ;;  %v16_v11 = vld [vmem:[%s679_s0 + $0x8] sm:$0xff] }
   0x5   :  { %v18_v12 = vld [vmem:[%s679_s0 + $0x18] sm:$0xff]  ;;  %v32_v13 = vld [vmem:[%s679_s0 + $0x88] sm:$0xff]  ;;  %v424_v17 = vld [vmem:[%s678_s1 + $0x10] sm:$0xff]  }
   0x6   :  { %v48_v14 = vpack.c.bf16 %v18_v12, %v16_v11  ;;  %v34_v15 = vld [vmem:[%s679_s0 + $0x98] sm:$0xff]  ;;  %v425_v18 = vld [vmem:[%s678_s1 + $0x48] sm:$0xff]   ;;  %v427_v20 = vld [vmem:[%s678_s1 + $0x40] sm:$0xff]  }
   0x7   :  { %336 = vmatpush3.bf16.msra.mxu0 %v416_v3  ;;  %406 = vmatpush3.bf16.msra.mxu1 %v416_v3  ;;  %v56_v16 = vpack.c.bf16 %v34_v15, %v32_v13  ;;  %v426_v19 = vld [vmem:[%s678_s1 + $0x8] sm:$0xff]   ;;  %v428_v21 = vld [vmem:[%s678_s1] sm:$0xff]   ;;  %v17_v23 = vld [vmem:[%s679_s0 + $0x10] sm:$0xff] }
   0x8   :  { %337 = vmatprep.subr.bf16.mxu0 %v417_v4  ;;  %399 = vmatprep.subr.bf16.mxu1 %v417_v4  ;;  %v15_v22 = vld [vmem:[%s679_s0] sm:$0xff]  ;;  %v33_v25 = vld [vmem:[%s679_s0 + $0x90] sm:$0xff]  ;;  %v20_v26 = vld [vmem:[%s679_s0 + $0x28] sm:$0xff] }
   0x9   :  { %230 = vmatprep.mubr.bf16.mxu0 %v48_v14  ;;  %262 = vmatprep.mubr.bf16.mxu1 %v56_v16  ;;  %v31_v24 = vld [vmem:[%s679_s0 + $0x80] sm:$0xff]  ;;  %v22_v27 = vld [vmem:[%s679_s0 + $0x38] sm:$0xff]  ;;  %v36_v28 = vld [vmem:[%s679_s0 + $0xa8] sm:$0xff]  ;;  %v47_v30 = vpack.c.bf16 %v17_v23, %v15_v22 }
   0xa   :  { %v38_v29 = vld [vmem:[%s679_s0 + $0xb8] sm:$0xff]  ;;  %v55_v31 = vpack.c.bf16 %v33_v25, %v31_v24  ;;  %v50_v32 = vpack.c.bf16 %v22_v27, %v20_v26  ;;  %v19_v34 = vld [vmem:[%s679_s0 + $0x20] sm:$0xff]  ;;  %v21_v35 = vld [vmem:[%s679_s0 + $0x30] sm:$0xff] }
   0xb   :  { %338 = vmatpush3.bf16.msra.mxu0 %v418_v5  ;;  %407 = vmatpush3.bf16.msra.mxu1 %v418_v5  ;;  %v58_v33 = vpack.c.bf16 %v38_v29, %v36_v28  ;;  %v35_v36 = vld [vmem:[%s679_s0 + $0xa0] sm:$0xff]  ;;  %v37_v37 = vld [vmem:[%s679_s0 + $0xb0] sm:$0xff]  ;;  %v24_v38 = vld [vmem:[%s679_s0 + $0x48] sm:$0xff]  ;;  %v49_v42 = vpack.c.bf16 %v21_v35, %v19_v34 }
   0xc   :  { %339 = vmatprep.subr.bf16.mxu0 %v419_v6  ;;  %400 = vmatprep.subr.bf16.mxu1 %v419_v6  ;;  %v26_v39 = vld [vmem:[%s679_s0 + $0x58] sm:$0xff]  ;;  %v40_v40 = vld [vmem:[%s679_s0 + $0xc8] sm:$0xff]  ;;  %v57_v43 = vpack.c.bf16 %v37_v37, %v35_v36  ;;  %v23_v46 = vld [vmem:[%s679_s0 + $0x40] sm:$0xff] }
   0xd   :  { %v42_v41 = vld [vmem:[%s679_s0 + $0xd8] sm:$0xff]  ;;  %v52_v44 = vpack.c.bf16 %v26_v39, %v24_v38  ;;  %v25_v47 = vld [vmem:[%s679_s0 + $0x50] sm:$0xff]  ;;  %v39_v48 = vld [vmem:[%s679_s0 + $0xc0] sm:$0xff] }
   0xe   :  { %v60_v45 = vpack.c.bf16 %v42_v41, %v40_v40  ;;  %v41_v49 = vld [vmem:[%s679_s0 + $0xd0] sm:$0xff]  ;;  %v28_v50 = vld [vmem:[%s679_s0 + $0x68] sm:$0xff]  ;;  %v30_v51 = vld [vmem:[%s679_s0 + $0x78] sm:$0xff]  ;;  %v51_v54 = vpack.c.bf16 %v25_v47, %v23_v46 }
   0xf   :  { %340 = vmatpush3.bf16.msra.mxu0 %v420_v7  ;;  %408 = vmatpush3.bf16.msra.mxu1 %v420_v7  ;;  %v44_v52 = vld [vmem:[%s679_s0 + $0xe8] sm:$0xff]  ;;  %v46_v53 = vld [vmem:[%s679_s0 + $0xf8] sm:$0xff]  ;;  %v59_v55 = vpack.c.bf16 %v41_v49, %v39_v48  ;;  %v54_v56 = vpack.c.bf16 %v30_v51, %v28_v50  ;;  %v27_v58 = vld [vmem:[%s679_s0 + $0x60] sm:$0xff] }
  0x10   :  { %341 = vmatprep.subr.bf16.mxu0 %v421_v8  ;;  %401 = vmatprep.subr.bf16.mxu1 %v421_v8  ;;  %v62_v57 = vpack.c.bf16 %v46_v53, %v44_v52  ;;  %v29_v59 = vld [vmem:[%s679_s0 + $0x70] sm:$0xff]  ;;  %v43_v60 = vld [vmem:[%s679_s0 + $0xe0] sm:$0xff] }
  0x11   :  { %v45_v61 = vld [vmem:[%s679_s0 + $0xf0] sm:$0xff]  ;;  %v53_v62 = vpack.c.bf16 %v29_v59, %v27_v58  ;;  %v596_v2 = vld [vmem:[%s680_s2] ss:$0 sm:$0xff] }
  0x12   :  { %v61_v63 = vpack.c.bf16 %v45_v61, %v43_v60 }
  0x13   :  { %342 = vmatpush3.bf16.msra.mxu0 %v422_v9  ;;  %409 = vmatpush3.bf16.msra.mxu1 %v422_v9 }
  0x14   :  { %343 = vmatprep.subr.bf16.mxu0 %v423_v10  ;;  %402 = vmatprep.subr.bf16.mxu1 %v423_v10 }
  0x17   :  { %344 = vmatpush3.bf16.msra.mxu0 %v424_v17  ;;  %410 = vmatpush3.bf16.msra.mxu1 %v424_v17 }
  0x18   :  { %345 = vmatprep.subr.bf16.mxu0 %v425_v18  ;;  %403 = vmatprep.subr.bf16.mxu1 %v425_v18 }
  0x1b   :  { %346 = vmatpush3.bf16.msra.mxu0 %v426_v19  ;;  %411 = vmatpush3.bf16.msra.mxu1 %v426_v19 }
  0x1c   :  { %347 = vmatprep.subr.bf16.mxu0 %v427_v20  ;;  %404 = vmatprep.subr.bf16.mxu1 %v427_v20 }
  0x1f   :  { %348 = vmatpush3.bf16.msra.mxu0 %v428_v21  ;;  %412 = vmatpush3.bf16.msra.mxu1 %v428_v21 }
  0x22   :  { %231 = vmatmul.mubr.bf16.vlgmr.msra.gmra.mxu0 %v47_v30  ;;  %263 = vmatmul.mubr.bf16.vlgmr.msra.gmra.mxu1 %v55_v31 }
  0x23   :  { %238 = vmatprep.mubr.bf16.mxu0 %v50_v32  ;;  %270 = vmatprep.mubr.bf16.mxu1 %v58_v33 }
  0x2a   :  { %239 = vmatmul.mubr.bf16.gmra.mxu0 %v49_v42  ;;  %271 = vmatmul.mubr.bf16.gmra.mxu1 %v57_v43 }
  0x2b   :  { %246 = vmatprep.mubr.bf16.mxu0 %v52_v44  ;;  %278 = vmatprep.mubr.bf16.mxu1 %v60_v45 }
  0x32   :  { %247 = vmatmul.mubr.bf16.gmra.mxu0 %v51_v54  ;;  %279 = vmatmul.mubr.bf16.gmra.mxu1 %v59_v55 }
  0x33   :  { %254 = vmatprep.mubr.bf16.mxu0 %v54_v56  ;;  %286 = vmatprep.mubr.bf16.mxu1 %v62_v57 }
  0x3a   :  { %255 = vmatmul.mubr.bf16.gmra.mxu0 %v53_v62  ;;  %287 = vmatmul.mubr.bf16.gmra.mxu1 %v61_v63 }
  0xe2   :  { %v349_v0 = vpop.f32.mrf.mxu0  ;;  %v373_v1 = vpop.f32.mrf.mxu1 }
  0xe4   :  { %v350_v3 = vpop.f32.mrf.mxu0  ;;  %v374_v4 = vpop.f32.mrf.mxu1 }
  0xe5   :  { %v351_v5 = vadd.f32 %v350_v3, %v349_v0  ;;  %v375_v6 = vadd.f32 %v374_v4, %v373_v1 }
  0xe6   :  { %v352_v7 = vpop.f32.mrf.mxu0  ;;  %v376_v8 = vpop.f32.mrf.mxu1 }
  0xe7   :  { %v233_v9 = vadd.f32 %v351_v5, %v596_v2  ;;  %v265_v10 = vadd.f32 %v375_v6, %v596_v2 }
  0xe8   :  { %v353_v11 = vpop.f32.mrf.mxu0  ;;  %v377_v12 = vpop.f32.mrf.mxu1 }
  0xe9   :  { %296 = vst.msk [vmem:[%s681_s3] sm:$0xff] %vm295_vm0, %v233_v9  ;;  %304 = vst.msk [vmem:[%s681_s3 + $0x40] sm:$0xff] %vm295_vm0, %v265_v10  ;;  %v354_v13 = vadd.f32 %v353_v11, %v352_v7  ;;  %v378_v14 = vadd.f32 %v377_v12, %v376_v8 }
  0xea   :  { %v355_v15 = vpop.f32.mrf.mxu0  ;;  %v379_v16 = vpop.f32.mrf.mxu1 }
  0xeb   :  { %v236_v17 = vadd.f32 %v354_v13, %v596_v2  ;;  %v268_v18 = vadd.f32 %v378_v14, %v596_v2 }
  0xec   :  { %v356_v19 = vpop.f32.mrf.mxu0  ;;  %v380_v20 = vpop.f32.mrf.mxu1 }
  0xed   :  { %297 = vst.msk [vmem:[%s681_s3 + $0x8] sm:$0xff] %vm295_vm0, %v236_v17  ;;  %305 = vst.msk [vmem:[%s681_s3 + $0x48] sm:$0xff] %vm295_vm0, %v268_v18  ;;  %v357_v21 = vadd.f32 %v356_v19, %v355_v15  ;;  %v381_v22 = vadd.f32 %v380_v20, %v379_v16 }
  0xee   :  { %v358_v23 = vpop.f32.mrf.mxu0  ;;  %v382_v24 = vpop.f32.mrf.mxu1 }
  0xef   :  { %v241_v25 = vadd.f32 %v357_v21, %v596_v2  ;;  %v273_v26 = vadd.f32 %v381_v22, %v596_v2 }
  0xf0   :  { %v359_v27 = vpop.f32.mrf.mxu0  ;;  %v383_v28 = vpop.f32.mrf.mxu1 }
  0xf1   :  { %298 = vst.msk [vmem:[%s681_s3 + $0x10] sm:$0xff] %vm295_vm0, %v241_v25  ;;  %306 = vst.msk [vmem:[%s681_s3 + $0x50] sm:$0xff] %vm295_vm0, %v273_v26  ;;  %v360_v29 = vadd.f32 %v359_v27, %v358_v23  ;;  %v384_v30 = vadd.f32 %v383_v28, %v382_v24 }
  0xf2   :  { %v361_v31 = vpop.f32.mrf.mxu0  ;;  %v385_v32 = vpop.f32.mrf.mxu1 }
  0xf3   :  { %v244_v33 = vadd.f32 %v360_v29, %v596_v2  ;;  %v276_v34 = vadd.f32 %v384_v30, %v596_v2 }
  0xf4   :  { %v362_v35 = vpop.f32.mrf.mxu0  ;;  %v386_v36 = vpop.f32.mrf.mxu1 }
  0xf5   :  { %299 = vst.msk [vmem:[%s681_s3 + $0x18] sm:$0xff] %vm295_vm0, %v244_v33  ;;  %307 = vst.msk [vmem:[%s681_s3 + $0x58] sm:$0xff] %vm295_vm0, %v276_v34  ;;  %v363_v37 = vadd.f32 %v362_v35, %v361_v31  ;;  %v387_v38 = vadd.f32 %v386_v36, %v385_v32 }
  0xf6   :  { %v364_v39 = vpop.f32.mrf.mxu0  ;;  %v388_v40 = vpop.f32.mrf.mxu1 }
  0xf7   :  { %v249_v41 = vadd.f32 %v363_v37, %v596_v2  ;;  %v281_v42 = vadd.f32 %v387_v38, %v596_v2 }
  0xf8   :  { %v365_v43 = vpop.f32.mrf.mxu0  ;;  %v389_v44 = vpop.f32.mrf.mxu1 }
  0xf9   :  { %300 = vst.msk [vmem:[%s681_s3 + $0x20] sm:$0xff] %vm295_vm0, %v249_v41  ;;  %308 = vst.msk [vmem:[%s681_s3 + $0x60] sm:$0xff] %vm295_vm0, %v281_v42  ;;  %v366_v45 = vadd.f32 %v365_v43, %v364_v39  ;;  %v390_v46 = vadd.f32 %v389_v44, %v388_v40 }
  0xfa   :  { %v367_v47 = vpop.f32.mrf.mxu0  ;;  %v391_v48 = vpop.f32.mrf.mxu1 }
  0xfb   :  { %v252_v49 = vadd.f32 %v366_v45, %v596_v2  ;;  %v284_v50 = vadd.f32 %v390_v46, %v596_v2 }
  0xfc   :  { %v368_v51 = vpop.f32.mrf.mxu0  ;;  %v392_v52 = vpop.f32.mrf.mxu1 }
  0xfd   :  { %301 = vst.msk [vmem:[%s681_s3 + $0x28] sm:$0xff] %vm295_vm0, %v252_v49  ;;  %309 = vst.msk [vmem:[%s681_s3 + $0x68] sm:$0xff] %vm295_vm0, %v284_v50  ;;  %v369_v53 = vadd.f32 %v368_v51, %v367_v47  ;;  %v393_v54 = vadd.f32 %v392_v52, %v391_v48 }
  0xfe   :  { %v370_v55 = vpop.f32.mrf.mxu0  ;;  %v394_v56 = vpop.f32.mrf.mxu1 }
  0xff   :  { %v257_v57 = vadd.f32 %v369_v53, %v596_v2  ;;  %v289_v58 = vadd.f32 %v393_v54, %v596_v2 }
 0x100   :  { %v371_v59 = vpop.f32.mrf.mxu0  ;;  %v395_v60 = vpop.f32.mrf.mxu1 }
 0x101   :  { %302 = vst.msk [vmem:[%s681_s3 + $0x30] sm:$0xff] %vm295_vm0, %v257_v57  ;;  %310 = vst.msk [vmem:[%s681_s3 + $0x70] sm:$0xff] %vm295_vm0, %v289_v58  ;;  %v372_v61 = vadd.f32 %v371_v59, %v370_v55  ;;  %v396_v62 = vadd.f32 %v395_v60, %v394_v56 }
 0x103   :  { %v260_v63 = vadd.f32 %v372_v61, %v596_v2  ;;  %v292_v0 = vadd.f32 %v396_v62, %v596_v2 }
 0x105   :  { %303 = vst.msk [vmem:[%s681_s3 + $0x38] sm:$0xff] %vm295_vm0, %v260_v63  ;;  %311 = vst.msk [vmem:[%s681_s3 + $0x78] sm:$0xff] %vm295_vm0, %v292_v0 }

// kernel: ast_forward.13
= control target key start
LH: loop header
LB: loop body
LE: loop exit
PB: predicated region body
PF: predicated region fallthrough
CT: control target
= control target key end

     0   :  { %s1377_s18 = smov 0   ;;  %s1969_s0 = inlined_call_operand.vmem [shape: f32[256,48], index: 0, kind: input, shape index: {}]   ;;  %s1970_s1 = inlined_call_operand.vmem [shape: f32[1,48], index: 1, kind: input, shape index: {}]   ;;  %s1971_s2 = inlined_call_operand.vmem [shape: f32[1,48], index: 2, kind: input, shape index: {}]   ;;  %s1972_s3 = inlined_call_operand.vmem [shape: bf16[48,192], index: 3, kind: input, shape index: {}]   ;;  %s1973_s4 = inlined_call_operand.vmem [shape: f32[1,192], index: 4, kind: input, shape index: {}]   ;;  %s1974_s5 = inlined_call_operand.vmem [shape: bf16[256,192], index: 5, kind: output, shape index: {}]  }
   0x1 LB: > { %s1157_s19 = sadd.s32 4294967295, %s1344_s18   ;;  %p1161_p0 = scmp.ge.s32.totalorder %s1344_s18, 1  ;;  %s1344_s18 = sphi %s1377_s18, %s15_s18  }
   0x2   : > { %p188_p1 = scmp.lt.s32.totalorder %s1344_s18, 3 }
   0x4   : > { %p189_p2 = pnand %p1161_p0, %p188_p1 }
   0x5   : > { %s1162_s20 = sshll.u32 (!%p189_p2), %s1157_s19, 4 }
   0x6   : > { %192 = sbr.rel (%p189_p2) target bundleno = 625 (0x271), region = 40  ;;  %p218_p3 = scmp.lt.s32.totalorder (!%p189_p2), %s1162_s20, 31 }
   0xb   : > { %s1978_s20 = smov (!%p218_p3, %s1162_s20), 31  ;;  %vm247_vm0 = vcmask 392192   ;;  %vm1080_vm1 = vcmask 1043456   ;;  %vm1081_vm2 = vcmask 523268  }
   0xc   : > { %s1163_s21 = sshll.u32 %s1978_s20, 3  ;;  %vm1761_vm3 = vmor %vm1081_vm2, %vm1080_vm1 }
   0xd   : > { %s1393_s24 = scalar_lea.vmem %s1969_s0, %s1163_s21  ;;  %s1757_s23 = scalar_lea.vmem %s1974_s5, %s1163_s21 }
   0xe   : > { %v231_v0 = vld [vmem:[%s1393_s24] sm:$0xff]  ;;  %v232_v2 = vld [vmem:[%s1393_s24 + $0x8] sm:$0xff]  ;;  %v233_v8 = vld [vmem:[%s1393_s24 + $0x10] sm:$0xff] }
   0xf   : > { %v239_v1 = vld [vmem:[%s1393_s24 + $0x40] sm:$0xff]  ;;  %v248_v3 = vsel %vm247_vm0, %v231_v0, 0.0  ;;  %v240_v5 = vld [vmem:[%s1393_s24 + $0x48] sm:$0xff]  ;;  %v251_v6 = vsel %vm247_vm0, %v232_v2, 0.0  ;;  %v234_v9 = vld [vmem:[%s1393_s24 + $0x18] sm:$0xff]  ;;  %v254_v10 = vsel %vm247_vm0, %v233_v8, 0.0 }
  0x10   : > { %v272_v4 = vsel %vm247_vm0, %v239_v1, 0.0  ;;  %249 = vadd.xlane.f32.xlu0 %v248_v3  ;;  %v275_v7 = vsel %vm247_vm0, %v240_v5, 0.0  ;;  %v257_v11 = vsel %vm247_vm0, %v234_v9, 0.0  ;;  %v1408_v12 = vld [vmem:[%s1393_s24 + $0x50] sm:$0xff]  ;;  %v1411_v13 = vld [vmem:[%s1393_s24 + $0x58] sm:$0xff]  ;;  %v1418_v16 = vld [vmem:[%s1393_s24 + $0x20] sm:$0xff] }
  0x11   : > { %273 = vadd.xlane.f32.xlu1 %v272_v4  ;;  %v278_v14 = vsel %vm247_vm0, %v1408_v12, 0.0  ;;  %v281_v15 = vsel %vm247_vm0, %v1411_v13, 0.0  ;;  %v1421_v17 = vld [vmem:[%s1393_s24 + $0x28] sm:$0xff]  ;;  %v260_v18 = vsel %vm247_vm0, %v1418_v16, 0.0  ;;  %v1428_v20 = vld [vmem:[%s1393_s24 + $0x60] sm:$0xff]  ;;  %v1438_v24 = vld [vmem:[%s1393_s24 + $0x30] sm:$0xff] }
  0x12   : > { %v263_v19 = vsel %vm247_vm0, %v1421_v17, 0.0  ;;  %v1431_v21 = vld [vmem:[%s1393_s24 + $0x68] sm:$0xff]  ;;  %v284_v22 = vsel %vm247_vm0, %v1428_v20, 0.0  ;;  %v1441_v25 = vld [vmem:[%s1393_s24 + $0x38] sm:$0xff]  ;;  %v266_v26 = vsel %vm247_vm0, %v1438_v24, 0.0  ;;  %v1448_v28 = vld [vmem:[%s1393_s24 + $0x70] sm:$0xff] }
  0x13   : > { %v287_v23 = vsel %vm247_vm0, %v1431_v21, 0.0  ;;  %v269_v27 = vsel %vm247_vm0, %v1441_v25, 0.0  ;;  %v1451_v29 = vld [vmem:[%s1393_s24 + $0x78] sm:$0xff]  ;;  %v290_v30 = vsel %vm247_vm0, %v1448_v28, 0.0 }
  0x14   : > { %252 = vadd.xlane.f32.xlu0 %v251_v6  ;;  %v293_v31 = vsel %vm247_vm0, %v1451_v29, 0.0 }
  0x15   : > { %276 = vadd.xlane.f32.xlu1 %v275_v7 }
  0x18   : > { %255 = vadd.xlane.f32.xlu0 %v254_v10 }
  0x19   : > { %258 = vadd.xlane.f32.xlu1 %v257_v11 }
  0x1c   : > { %279 = vadd.xlane.f32.xlu0 %v278_v14 }
  0x1d   : > { %282 = vadd.xlane.f32.xlu1 %v281_v15 }
  0x20   : > { %261 = vadd.xlane.f32.xlu0 %v260_v18 }
  0x21   : > { %264 = vadd.xlane.f32.xlu1 %v263_v19 }
  0x24   : > { %285 = vadd.xlane.f32.xlu0 %v284_v22 }
  0x25   : > { %288 = vadd.xlane.f32.xlu1 %v287_v23 }
  0x28   : > { %267 = vadd.xlane.f32.xlu0 %v266_v26 }
  0x29   : > { %270 = vadd.xlane.f32.xlu1 %v269_v27 }
  0x2c   : > { %291 = vadd.xlane.f32.xlu0 %v290_v30 }
  0x2d   : > { %294 = vadd.xlane.f32.xlu1 %v293_v31 }
  0x99   : > { %v250_v32 = vpop.xlane.xlu0 %249 }
  0x9a   : > { %v274_v33 = vpop.xlane.xlu1 %273  ;;  %v297_v34 = vmul.f32 0.020833334, %v250_v32 }
  0x9b   : > { %v305_v35 = vmul.f32 0.020833334, %v274_v33 }
  0x9c   : > { %v1457_v36 = vsub.f32 %v231_v0, %v297_v34 }
  0x9d   : > { %v1459_v37 = vsub.f32 %v239_v1, %v305_v35  ;;  %v253_v38 = vpop.xlane.xlu0 %252 }
  0x9e   : > { %v277_v39 = vpop.xlane.xlu1 %276  ;;  %v298_v40 = vmul.f32 0.020833334, %v253_v38  ;;  %v329_v42 = vmul.f32 %v1457_v36, %v1457_v36 }
  0x9f   : > { %v306_v41 = vmul.f32 0.020833334, %v277_v39  ;;  %v337_v43 = vmul.f32 %v1459_v37, %v1459_v37 }
  0xa0   : > { %v1465_v44 = vsub.f32 %v232_v2, %v298_v40  ;;  %v345_v46 = vsel %vm247_vm0, %v329_v42, 0.0 }
  0xa1   : > { %v1467_v45 = vsub.f32 %v240_v5, %v306_v41  ;;  %346 = vadd.xlane.f32.xlu0 %v345_v46  ;;  %v256_v47 = vpop.xlane.xlu0 %255  ;;  %v369_v49 = vsel %vm247_vm0, %v337_v43, 0.0 }
  0xa2   : > { %v259_v48 = vpop.xlane.xlu1 %258  ;;  %v299_v50 = vmul.f32 0.020833334, %v256_v47  ;;  %v330_v52 = vmul.f32 %v1465_v44, %v1465_v44 }
  0xa3   : > { %v300_v51 = vmul.f32 0.020833334, %v259_v48  ;;  %v338_v53 = vmul.f32 %v1467_v45, %v1467_v45 }
  0xa4   : > { %v1475_v54 = vsub.f32 %v233_v8, %v299_v50  ;;  %v348_v56 = vsel %vm247_vm0, %v330_v52, 0.0 }
  0xa5   : > { %v1477_v55 = vsub.f32 %v234_v9, %v300_v51  ;;  %370 = vadd.xlane.f32.xlu0 %v369_v49  ;;  %349 = vadd.xlane.f32.xlu1 %v348_v56  ;;  %v280_v57 = vpop.xlane.xlu0 %279  ;;  %v372_v59 = vsel %vm247_vm0, %v338_v53, 0.0  ;;  %v1236_v56 = vld [vmem:[%s1972_s3 + $0x14] ss:$8 sps:$4 sm:$0xff]  }
  0xa6   : > { %v283_v58 = vpop.xlane.xlu1 %282  ;;  %v307_v60 = vmul.f32 0.020833334, %v280_v57  ;;  %v331_v62 = vmul.f32 %v1475_v54, %v1475_v54  ;;  %v1238_v57 = vld [vmem:[%s1972_s3 + $0x10] ss:$8 sps:$4 sm:$0xff]  }
  0xa7   : > { %v308_v61 = vmul.f32 0.020833334, %v283_v58  ;;  %v332_v63 = vmul.f32 %v1477_v55, %v1477_v55  ;;  %v1239_v58 = vld [vmem:[%s1972_s3 + $0x4] ss:$8 sps:$4 sm:$0xff]  }
  0xa8   : > { %v1486_v0 = vsub.f32 %v1408_v12, %v307_v60  ;;  %v351_v2 = vsel %vm247_vm0, %v331_v62, 0.0  ;;  %v1346_v60 = vmov 0  }
  0xa9   : > { %v1489_v1 = vsub.f32 %v1411_v13, %v308_v61  ;;  %373 = vadd.xlane.f32.xlu1 %v372_v59  ;;  %352 = vadd.xlane.f32.xlu0 %v351_v2  ;;  %v262_v3 = vpop.xlane.xlu0 %261  ;;  %v354_v5 = vsel %vm247_vm0, %v332_v63, 0.0  ;;  %v1241_v59 = vld [vmem:[%s1972_s3] ss:$8 sps:$4 sm:$0xff]  }
  0xaa   : > { %v265_v4 = vpop.xlane.xlu1 %264  ;;  %v301_v6 = vmul.f32 0.020833334, %v262_v3  ;;  %v339_v8 = vmul.f32 %v1486_v0, %v1486_v0  ;;  %615 = vmatprep.mubr.bf16.mxu0 %v1346_v60  ;;  %655 = vmatprep.mubr.bf16.mxu1 %v1346_v60 }
  0xab   : > { %v302_v7 = vmul.f32 0.020833334, %v265_v4  ;;  %v340_v9 = vmul.f32 %v1489_v1, %v1489_v1 }
  0xac   : > { %v1498_v10 = vsub.f32 %v1418_v16, %v301_v6  ;;  %v375_v12 = vsel %vm247_vm0, %v339_v8, 0.0 }
  0xad   : > { %v1501_v11 = vsub.f32 %v1421_v17, %v302_v7  ;;  %355 = vadd.xlane.f32.xlu1 %v354_v5  ;;  %376 = vadd.xlane.f32.xlu0 %v375_v12  ;;  %v286_v13 = vpop.xlane.xlu0 %285  ;;  %v378_v15 = vsel %vm247_vm0, %v340_v9, 0.0 }
  0xae   : > { %v289_v14 = vpop.xlane.xlu1 %288  ;;  %v309_v18 = vmul.f32 0.020833334, %v286_v13  ;;  %v333_v22 = vmul.f32 %v1498_v10, %v1498_v10 }
  0xaf   : > { %v310_v19 = vmul.f32 0.020833334, %v289_v14  ;;  %v334_v16 = vmul.f32 %v1501_v11, %v1501_v11 }
  0xb0   : > { %v1510_v23 = vsub.f32 %v1428_v20, %v309_v18  ;;  %v357_v26 = vsel %vm247_vm0, %v333_v22, 0.0 }
  0xb1   : > { %v1513_v17 = vsub.f32 %v1431_v21, %v310_v19  ;;  %379 = vadd.xlane.f32.xlu1 %v378_v15  ;;  %358 = vadd.xlane.f32.xlu0 %v357_v26  ;;  %v268_v27 = vpop.xlane.xlu0 %267  ;;  %v360_v31 = vsel %vm247_vm0, %v334_v16, 0.0 }
  0xb2   : > { %v271_v30 = vpop.xlane.xlu1 %270  ;;  %v303_v32 = vmul.f32 0.020833334, %v268_v27  ;;  %v341_v34 = vmul.f32 %v1510_v23, %v1510_v23 }
  0xb3   : > { %v304_v33 = vmul.f32 0.020833334, %v271_v30  ;;  %v342_v20 = vmul.f32 %v1513_v17, %v1513_v17 }
  0xb4   : > { %v1522_v35 = vsub.f32 %v1438_v24, %v303_v32  ;;  %v381_v38 = vsel %vm247_vm0, %v341_v34, 0.0 }
  0xb5   : > { %v1525_v21 = vsub.f32 %v1441_v25, %v304_v33  ;;  %361 = vadd.xlane.f32.xlu1 %v360_v31  ;;  %382 = vadd.xlane.f32.xlu0 %v381_v38  ;;  %v292_v39 = vpop.xlane.xlu0 %291  ;;  %v384_v41 = vsel %vm247_vm0, %v342_v20, 0.0 }
  0xb6   : > { %v295_v40 = vpop.xlane.xlu1 %294  ;;  %v311_v42 = vmul.f32 0.020833334, %v292_v39  ;;  %v335_v46 = vmul.f32 %v1522_v35, %v1522_v35 }
  0xb7   : > { %v312_v43 = vmul.f32 0.020833334, %v295_v40  ;;  %v336_v24 = vmul.f32 %v1525_v21, %v1525_v21  ;;  %v1571_v40 = vld [vmem:[%s1970_s1] ss:$0 sm:$0xff] }
  0xb8   : > { %v1534_v47 = vsub.f32 %v1448_v28, %v311_v42  ;;  %v363_v48 = vsel %vm247_vm0, %v335_v46, 0.0  ;;  %v1233_v28 = vld [vmem:[%s1972_s3 + $0x24] ss:$8 sps:$4 sm:$0xff]  }
  0xb9   : > { %v1537_v25 = vsub.f32 %v1451_v29, %v312_v43  ;;  %385 = vadd.xlane.f32.xlu1 %v384_v41  ;;  %364 = vadd.xlane.f32.xlu0 %v363_v48  ;;  %v366_v49 = vsel %vm247_vm0, %v336_v24, 0.0  ;;  %v1235_v29 = vld [vmem:[%s1972_s3 + $0x20] ss:$8 sps:$4 sm:$0xff]  }
  0xba   : > { %v343_v50 = vmul.f32 %v1534_v47, %v1534_v47  ;;  %593 = vmatprep.subr.bf16.mxu0 %v1233_v28  ;;  %1218 = vmatprep.subr.bf16.mxu1 %v1233_v28 }
  0xbb   : > { %v344_v51 = vmul.f32 %v1537_v25, %v1537_v25  ;;  %594 = vmatpush1.bf16.msra.mxu0 %v1235_v29  ;;  %1221 = vmatpush1.bf16.msra.mxu1 %v1235_v29 }
  0xbc   : > { %v387_v52 = vsel %vm247_vm0, %v343_v50, 0.0  ;;  %595 = vmatprep.subr.bf16.mxu0 %v1236_v56  ;;  %1219 = vmatprep.subr.bf16.mxu1 %v1236_v56 }
  0xbd   : > { %367 = vadd.xlane.f32.xlu1 %v366_v49  ;;  %388 = vadd.xlane.f32.xlu0 %v387_v52  ;;  %v390_v53 = vsel %vm247_vm0, %v344_v51, 0.0 }
  0xbf   : > { %596 = vmatpush1.bf16.msra.mxu0 %v1238_v57  ;;  %1222 = vmatpush1.bf16.msra.mxu1 %v1238_v57 }
  0xc0   : > { %597 = vmatprep.subr.bf16.mxu0 %v1239_v58  ;;  %1220 = vmatprep.subr.bf16.mxu1 %v1239_v58 }
  0xc1   : > { %391 = vadd.xlane.f32.xlu1 %v390_v53 }
  0xc3   : > { %598 = vmatpush1.bf16.msra.mxu0 %v1241_v59  ;;  %1223 = vmatpush1.bf16.msra.mxu1 %v1241_v59 }
 0x12a   : > { %v347_v61 = vpop.xlane.xlu0 %346 }
 0x12b   : > { %v393_v62 = vmul.f32 0.020833334, %v347_v61 }
 0x12d   : > { %v409_v63 = vadd.f32 1e-06, %v393_v62 }
 0x12e   : > { %v350_v2 = vpop.xlane.xlu1 %349  ;;  %v371_v3 = vpop.xlane.xlu0 %370 }
 0x12f   : > { %1242 = vrsqrt.f32 %v409_v63  ;;  %v394_v4 = vmul.f32 0.020833334, %v350_v2  ;;  %v401_v5 = vmul.f32 0.020833334, %v371_v3 }
 0x131   : > { %v410_v6 = vadd.f32 1e-06, %v394_v4  ;;  %v417_v7 = vadd.f32 1e-06, %v401_v5 }
 0x132   : > { %v374_v8 = vpop.xlane.xlu1 %373  ;;  %v353_v9 = vpop.xlane.xlu0 %352 }
 0x133   : > { %1244 = vrsqrt.f32 %v410_v6  ;;  %v402_v12 = vmul.f32 0.020833334, %v374_v8  ;;  %v395_v13 = vmul.f32 0.020833334, %v353_v9 }
 0x134   : > { %1246 = vrsqrt.f32 %v417_v7 }
 0x135   : > { %v418_v14 = vadd.f32 1e-06, %v402_v12  ;;  %v411_v15 = vadd.f32 1e-06, %v395_v13 }
 0x136   : > { %v356_v18 = vpop.xlane.xlu1 %355  ;;  %v377_v19 = vpop.xlane.xlu0 %376 }
 0x137   : > { %1248 = vrsqrt.f32 %v418_v14  ;;  %v396_v22 = vmul.f32 0.020833334, %v356_v18  ;;  %v403_v16 = vmul.f32 0.020833334, %v377_v19 }
 0x138   : > { %1250 = vrsqrt.f32 %v411_v15 }
 0x139   : > { %v412_v26 = vadd.f32 1e-06, %v396_v22  ;;  %v419_v27 = vadd.f32 1e-06, %v403_v16 }
 0x13a   : > { %v380_v30 = vpop.xlane.xlu1 %379  ;;  %v359_v31 = vpop.xlane.xlu0 %358 }
 0x13b   : > { %1252 = vrsqrt.f32 %v412_v26  ;;  %v404_v32 = vmul.f32 0.020833334, %v380_v30  ;;  %v397_v33 = vmul.f32 0.020833334, %v359_v31 }
 0x13c   : > { %v1243_v34 = vpop.eup %1242  ;;  %1254 = vrsqrt.f32 %v419_v27 }
 0x13d   : > { %v420_v20 = vadd.f32 1e-06, %v404_v32  ;;  %v413_v38 = vadd.f32 1e-06, %v397_v33  ;;  %v441_v39 = vmul.f32 %v1243_v34, %v1457_v36  ;;  %v1578_v36 = vld [vmem:[%s1971_s2] ss:$0 sm:$0xff] }
 0x13e   : > { %v362_v41 = vpop.xlane.xlu1 %361  ;;  %v383_v42 = vpop.xlane.xlu0 %382 }
 0x13f   : > { %1256 = vrsqrt.f32 %v420_v20  ;;  %v398_v43 = vmul.f32 0.020833334, %v362_v41  ;;  %v405_v46 = vmul.f32 0.020833334, %v383_v42  ;;  %v464_v48 = vmul.f32 %v1571_v40, %v441_v39 }
 0x140   : > { %v1245_v24 = vpop.eup %1244  ;;  %1258 = vrsqrt.f32 %v413_v38 }
 0x141   : > { %v1247_v49 = vpop.eup %1246  ;;  %v414_v50 = vadd.f32 1e-06, %v398_v43  ;;  %v421_v51 = vadd.f32 1e-06, %v405_v46  ;;  %v442_v52 = vmul.f32 %v1245_v24, %v1465_v44  ;;  %v487_v61 = vadd.f32 %v1578_v36, %v464_v48 }
 0x142   : > { %v386_v28 = vpop.xlane.xlu1 %385  ;;  %v365_v29 = vpop.xlane.xlu0 %364  ;;  %v449_v53 = vmul.f32 %v1247_v49, %v1459_v37 }
 0x143   : > { %1260 = vrsqrt.f32 %v414_v50  ;;  %v406_v56 = vmul.f32 0.020833334, %v386_v28  ;;  %v399_v57 = vmul.f32 0.020833334, %v365_v29  ;;  %v465_v58 = vmul.f32 %v1571_v40, %v442_v52 }
 0x144   : > { %v1249_v59 = vpop.eup %1248  ;;  %1262 = vrsqrt.f32 %v421_v51  ;;  %v472_v37 = vmul.f32 %v1571_v40, %v449_v53 }
 0x145   : > { %v1251_v62 = vpop.eup %1250  ;;  %v422_v44 = vadd.f32 1e-06, %v406_v56  ;;  %v415_v63 = vadd.f32 1e-06, %v399_v57  ;;  %v488_v2 = vadd.f32 %v1578_v36, %v465_v58  ;;  %v450_v3 = vmul.f32 %v1249_v59, %v1467_v45 }
 0x146   : > { %v368_v4 = vpop.xlane.xlu1 %367  ;;  %v389_v5 = vpop.xlane.xlu0 %388  ;;  %v443_v6 = vmul.f32 %v1251_v62, %v1475_v54  ;;  %v495_v54 = vadd.f32 %v1578_v36, %v472_v37 }
 0x147   : > { %1264 = vrsqrt.f32 %v422_v44  ;;  %v400_v7 = vmul.f32 0.020833334, %v368_v4  ;;  %v407_v8 = vmul.f32 0.020833334, %v389_v5  ;;  %v503_v9 = vpack.c.bf16 %v488_v2, %v487_v61 }
 0x148   : > { %v1253_v12 = vpop.eup %1252  ;;  %1266 = vrsqrt.f32 %v415_v63  ;;  %v473_v13 = vmul.f32 %v1571_v40, %v450_v3  ;;  %v466_v14 = vmul.f32 %v1571_v40, %v443_v6 }
 0x149   : > { %v1255_v15 = vpop.eup %1254  ;;  %v416_v18 = vadd.f32 1e-06, %v400_v7  ;;  %v423_v19 = vadd.f32 1e-06, %v407_v8  ;;  %1175 = vmatmul.mubr.msk.bf16.vlgmr.msra.gmra.mxu0 %vm247_vm0, %v503_v9  ;;  %v444_v45 = vmul.f32 %v1253_v12, %v1477_v55 }
 0x14a   : > { %v392_v22 = vpop.xlane.xlu1 %391  ;;  %v496_v16 = vadd.f32 %v1578_v36, %v473_v13  ;;  %625 = vmatprep.mubr.bf16.mxu0 %v1346_v60  ;;  %v451_v26 = vmul.f32 %v1255_v15, %v1486_v0  ;;  %v489_v33 = vadd.f32 %v1578_v36, %v466_v14  ;;  %v519_v13 = vlaneseq  ;;  %v517_v15 = vld [vmem:[%s1973_s4] sm:$0x3] }
 0x14b   : > { %1268 = vrsqrt.f32 %v416_v18  ;;  %v408_v27 = vmul.f32 0.020833334, %v392_v22  ;;  %v467_v30 = vmul.f32 %v1571_v40, %v444_v45 }
 0x14c   : > { %v1257_v31 = vpop.eup %1256  ;;  %1270 = vrsqrt.f32 %v423_v19  ;;  %v507_v32 = vpack.c.bf16 %v496_v16, %v495_v54  ;;  %v474_v39 = vmul.f32 %v1571_v40, %v451_v26 }
 0x14d   : > { %v1259_v34 = vpop.eup %1258  ;;  %v424_v55 = vadd.f32 1e-06, %v408_v27  ;;  %v490_v20 = vadd.f32 %v1578_v36, %v467_v30  ;;  %v452_v38 = vmul.f32 %v1257_v31, %v1489_v1 }
 0x14e   : > { %1179 = vmatmul.mubr.msk.bf16.vlgmr.msra.gmra.mxu1 %vm247_vm0, %v507_v32  ;;  %v445_v0 = vmul.f32 %v1259_v34, %v1498_v10  ;;  %v497_v24 = vadd.f32 %v1578_v36, %v474_v39 }
 0x14f   : > { %1272 = vrsqrt.f32 %v424_v55  ;;  %v504_v41 = vpack.c.bf16 %v490_v20, %v489_v33  ;;  %665 = vmatprep.mubr.bf16.mxu1 %v1346_v60  ;;  %v475_v42 = vmul.f32 %v1571_v40, %v452_v38 }
 0x150   : > { %v1261_v43 = vpop.eup %1260  ;;  %v468_v49 = vmul.f32 %v1571_v40, %v445_v0 }
 0x151   : > { %v1263_v46 = vpop.eup %1262  ;;  %1176 = vmatmul.mubr.msk.bf16.gmra.mxu0 %vm247_vm0, %v504_v41  ;;  %v498_v1 = vadd.f32 %v1578_v36, %v475_v42  ;;  %v446_v48 = vmul.f32 %v1261_v43, %v1501_v11 }
 0x152   : > { %635 = vmatprep.mubr.bf16.mxu0 %v1346_v60  ;;  %v453_v10 = vmul.f32 %v1263_v46, %v1510_v23  ;;  %v491_v29 = vadd.f32 %v1578_v36, %v468_v49 }
 0x153   : > { %v508_v50 = vpack.c.bf16 %v498_v1, %v497_v24  ;;  %v469_v51 = vmul.f32 %v1571_v40, %v446_v48 }
 0x154   : > { %v1265_v52 = vpop.eup %1264  ;;  %v476_v57 = vmul.f32 %v1571_v40, %v453_v10 }
 0x155   : > { %v1267_v28 = vpop.eup %1266  ;;  %v492_v53 = vadd.f32 %v1578_v36, %v469_v51  ;;  %v454_v56 = vmul.f32 %v1265_v52, %v1513_v17 }
 0x156   : > { %1180 = vmatmul.mubr.msk.bf16.gmra.mxu1 %vm247_vm0, %v508_v50  ;;  %v447_v11 = vmul.f32 %v1267_v28, %v1522_v35  ;;  %v499_v62 = vadd.f32 %v1578_v36, %v476_v57 }
 0x157   : > { %v505_v58 = vpack.c.bf16 %v492_v53, %v491_v29  ;;  %675 = vmatprep.mubr.bf16.mxu1 %v1346_v60  ;;  %v477_v23 = vmul.f32 %v1571_v40, %v454_v56 }
 0x158   : > { %v1269_v59 = vpop.eup %1268  ;;  %v470_v63 = vmul.f32 %v1571_v40, %v447_v11 }
 0x159   : > { %v1271_v61 = vpop.eup %1270  ;;  %1177 = vmatmul.mubr.msk.bf16.gmra.mxu0 %vm247_vm0, %v505_v58  ;;  %v500_v44 = vadd.f32 %v1578_v36, %v477_v23  ;;  %v448_v17 = vmul.f32 %v1269_v59, %v1525_v21 }
 0x15a   : > { %645 = vmatprep.mubr.bf16.mxu0 %v1346_v60  ;;  %v455_v35 = vmul.f32 %v1271_v61, %v1534_v47  ;;  %v493_v5 = vadd.f32 %v1578_v36, %v470_v63 }
 0x15b   : > { %v509_v2 = vpack.c.bf16 %v500_v44, %v499_v62  ;;  %v471_v3 = vmul.f32 %v1571_v40, %v448_v17 }
 0x15c   : > { %v1273_v4 = vpop.eup %1272  ;;  %v478_v7 = vmul.f32 %v1571_v40, %v455_v35 }
 0x15d   : > { %v494_v37 = vadd.f32 %v1578_v36, %v471_v3  ;;  %v456_v6 = vmul.f32 %v1273_v4, %v1537_v25  ;;  %v520_v25 = vshrl.u32 %v519_v13, 7 }
 0x15e   : > { %1181 = vmatmul.mubr.msk.bf16.gmra.mxu1 %vm247_vm0, %v509_v2  ;;  %v501_v47 = vadd.f32 %v1578_v36, %v478_v7 }
 0x15f   : > { %v506_v21 = vpack.c.bf16 %v494_v37, %v493_v5  ;;  %685 = vmatprep.mubr.bf16.mxu1 %v1346_v60  ;;  %v479_v8 = vmul.f32 %v1571_v40, %v456_v6  ;;  %v521_v14 = vsub.s32 0, %v520_v25  ;;  %v525_v18 = vsub.s32 1, %v520_v25 }
 0x161   : > { %1178 = vmatmul.mubr.msk.bf16.gmra.mxu0 %vm247_vm0, %v506_v21  ;;  %v502_v9 = vadd.f32 %v1578_v36, %v479_v8  ;;  %v1642_v60 = vrot.slane %v517_v15, %v521_v14  ;;  %v1644_v40 = vrot.slane %v517_v15, %v525_v18 }
 0x163   : > { %v510_v12 = vpack.c.bf16 %v502_v9, %v501_v47 }
 0x166   : > { %1182 = vmatmul.mubr.msk.bf16.gmra.mxu1 %vm247_vm0, %v510_v12 }
 0x209   : > { %v617_v19 = vpop.f32.mrf.mxu0 }
 0x20a   : > { %v1647_v45 = vadd.f32 %v617_v19, %v1642_v60 }
 0x20b   : > { %v619_v36 = vpop.f32.mrf.mxu0 }
 0x20c   : > { %v728_v22 = vmul.f32 %v1647_v45, %v1647_v45  ;;  %v1652_v54 = vadd.f32 %v619_v36, %v1644_v40 }
 0x20d   : > { %v621_v16 = vpop.f32.mrf.mxu0 }
 0x20e   : > { %v760_v26 = vmul.f32 %v728_v22, %v1647_v45  ;;  %v729_v27 = vmul.f32 %v1652_v54, %v1652_v54  ;;  %v1658_v30 = vadd.f32 %v621_v16, %v1642_v60  ;;  %v657_v31 = vpop.f32.mrf.mxu1 }
 0x20f   : > { %v1661_v32 = vadd.f32 %v657_v31, %v1642_v60  ;;  %v623_v33 = vpop.f32.mrf.mxu0 }
 0x210   : > { %v792_v34 = vmul.f32 0.044715, %v760_v26  ;;  %v761_v55 = vmul.f32 %v729_v27, %v1652_v54  ;;  %v730_v20 = vmul.f32 %v1658_v30, %v1658_v30  ;;  %v659_v38 = vpop.f32.mrf.mxu1  ;;  %v1669_v0 = vadd.f32 %v623_v33, %v1644_v40 }
 0x211   : > { %v744_v39 = vmul.f32 %v1661_v32, %v1661_v32  ;;  %v1672_v41 = vadd.f32 %v659_v38, %v1644_v40  ;;  %v627_v42 = vpop.f32.mrf.mxu0  ;;  %v696_v26 = vmul.f32 0.5, %v1647_v45  ;;  %v697_v27 = vmul.f32 0.5, %v1652_v54 }
 0x212   : > { %v824_v43 = vadd.f32 %v792_v34, %v1647_v45  ;;  %v793_v46 = vmul.f32 0.044715, %v761_v55  ;;  %v762_v24 = vmul.f32 %v730_v20, %v1658_v30  ;;  %v1677_v1 = vadd.f32 %v627_v42, %v1642_v60  ;;  %v661_v48 = vpop.f32.mrf.mxu1 }
 0x213   : > { %v776_v49 = vmul.f32 %v744_v39, %v1661_v32  ;;  %v731_v10 = vmul.f32 %v1669_v0, %v1669_v0  ;;  %v745_v28 = vmul.f32 %v1672_v41, %v1672_v41  ;;  %v629_v57 = vpop.f32.mrf.mxu0  ;;  %v1693_v17 = vadd.f32 %v661_v48, %v1642_v60 }
 0x214   : > { %v856_v50 = vmul.f32 0.7978846, %v824_v43  ;;  %v825_v51 = vadd.f32 %v793_v46, %v1652_v54  ;;  %v794_v52 = vmul.f32 0.044715, %v762_v24  ;;  %v732_v56 = vmul.f32 %v1677_v1, %v1677_v1  ;;  %v663_v59 = vpop.f32.mrf.mxu1 }
 0x215   : > { %v808_v29 = vmul.f32 0.044715, %v776_v49  ;;  %v763_v53 = vmul.f32 %v731_v10, %v1669_v0  ;;  %v777_v23 = vmul.f32 %v745_v28, %v1672_v41  ;;  %v1696_v2 = vadd.f32 %v629_v57, %v1644_v40  ;;  %v631_v37 = vpop.f32.mrf.mxu0 }
 0x216   : > { %1274 = vtanh.f32 %v856_v50  ;;  %v857_v11 = vmul.f32 0.7978846, %v825_v51  ;;  %v826_v58 = vadd.f32 %v794_v52, %v1658_v30  ;;  %v764_v44 = vmul.f32 %v732_v56, %v1677_v1  ;;  %v667_v21 = vpop.f32.mrf.mxu1 }
 0x217   : > { %v840_v61 = vadd.f32 %v808_v29, %v1661_v32  ;;  %v795_v62 = vmul.f32 0.044715, %v763_v53  ;;  %v809_v35 = vmul.f32 0.044715, %v777_v23  ;;  %v746_v7 = vmul.f32 %v1693_v17, %v1693_v17  ;;  %v633_v16 = vpop.f32.mrf.mxu0 }
 0x218   : > { %1276 = vtanh.f32 %v857_v11  ;;  %v858_v63 = vmul.f32 0.7978846, %v826_v58  ;;  %v796_v5 = vmul.f32 0.044715, %v764_v44  ;;  %v733_v9 = vmul.f32 %v1696_v2, %v1696_v2  ;;  %v669_v39 = vpop.f32.mrf.mxu1 }
 0x219   : > { %v872_v3 = vmul.f32 0.7978846, %v840_v61  ;;  %v827_v4 = vadd.f32 %v795_v62, %v1669_v0  ;;  %v841_v6 = vadd.f32 %v809_v35, %v1672_v41  ;;  %v778_v13 = vmul.f32 %v746_v7, %v1693_v17  ;;  %v637_v52 = vpop.f32.mrf.mxu0 }
 0x21a   : > { %1278 = vtanh.f32 %v858_v63  ;;  %v828_v47 = vadd.f32 %v796_v5, %v1677_v1  ;;  %v1707_v25 = vadd.f32 %v663_v59, %v1644_v40  ;;  %v1710_v14 = vadd.f32 %v631_v37, %v1642_v60 }
 0x21b   : > { %1280 = vtanh.f32 %v872_v3  ;;  %v859_v8 = vmul.f32 0.7978846, %v827_v4  ;;  %v873_v12 = vmul.f32 0.7978846, %v841_v6  ;;  %v765_v18 = vmul.f32 %v733_v9, %v1696_v2  ;;  %v671_v3 = vpop.f32.mrf.mxu1 }
 0x21c   : > { %v860_v15 = vmul.f32 0.7978846, %v828_v47  ;;  %v1714_v19 = vadd.f32 %v667_v21, %v1642_v60  ;;  %v810_v36 = vmul.f32 0.044715, %v778_v13  ;;  %v747_v22 = vmul.f32 %v1707_v25, %v1707_v25  ;;  %v639_v47 = vpop.f32.mrf.mxu0 }
 0x21d   : > { %1282 = vtanh.f32 %v859_v8  ;;  %v797_v31 = vmul.f32 0.044715, %v765_v18  ;;  %v734_v33 = vmul.f32 %v1710_v14, %v1710_v14  ;;  %v1723_v34 = vmul.f32 0.5, %v1658_v30 }
 0x21e   : > { %1284 = vtanh.f32 %v873_v12  ;;  %v842_v55 = vadd.f32 %v810_v36, %v1693_v17  ;;  %v779_v20 = vmul.f32 %v747_v22, %v1707_v25  ;;  %v748_v38 = vmul.f32 %v1714_v19, %v1714_v19 }
 0x21f   : > { %1286 = vtanh.f32 %v860_v15  ;;  %v829_v45 = vadd.f32 %v797_v31, %v1696_v2  ;;  %v766_v54 = vmul.f32 %v734_v33, %v1710_v14  ;;  %v1732_v42 = vadd.f32 %v633_v16, %v1644_v40 }
 0x220   : > { %v712_v43 = vmul.f32 0.5, %v1661_v32  ;;  %v874_v30 = vmul.f32 0.7978846, %v842_v55  ;;  %v811_v46 = vmul.f32 0.044715, %v779_v20  ;;  %v780_v24 = vmul.f32 %v748_v38, %v1714_v19 }
 0x221   : > { %v861_v49 = vmul.f32 0.7978846, %v829_v45  ;;  %v798_v10 = vmul.f32 0.044715, %v766_v54  ;;  %v735_v50 = vmul.f32 %v1732_v42, %v1732_v42  ;;  %v1739_v51 = vadd.f32 %v669_v39, %v1644_v40 }
 0x222   : > { %1288 = vtanh.f32 %v874_v30  ;;  %v843_v29 = vadd.f32 %v811_v46, %v1707_v25  ;;  %v812_v53 = vmul.f32 0.044715, %v780_v24  ;;  %v699_v56 = vmul.f32 0.5, %v1669_v0 }
 0x223   : > { %v1275_v48 = vpop.eup %1274  ;;  %1290 = vtanh.f32 %v861_v49  ;;  %v830_v57 = vadd.f32 %v798_v10, %v1710_v14  ;;  %v767_v11 = vmul.f32 %v735_v50, %v1732_v42  ;;  %v1747_v61 = vadd.f32 %v637_v52, %v1642_v60 }
 0x224   : > { %v920_v28 = vadd.f32 1.0, %v1275_v48  ;;  %v875_v23 = vmul.f32 0.7978846, %v843_v29  ;;  %v844_v59 = vadd.f32 %v812_v53, %v1714_v19  ;;  %v713_v44 = vmul.f32 0.5, %v1672_v41  ;;  %v641_v48 = vpop.f32.mrf.mxu0 }
 0x225   : > { %v1277_v32 = vpop.eup %1276  ;;  %v862_v63 = vmul.f32 0.7978846, %v830_v57  ;;  %v799_v35 = vmul.f32 0.044715, %v767_v11  ;;  %v749_v0 = vmul.f32 %v1739_v51, %v1739_v51  ;;  %v700_v15 = vmul.f32 0.5, %v1677_v1 }
 0x226   : > { %v921_v58 = vadd.f32 1.0, %v1277_v32  ;;  %v952_v5 = vmul.f32 %v920_v28, %v696_v26  ;;  %1292 = vtanh.f32 %v875_v23  ;;  %v876_v6 = vmul.f32 0.7978846, %v844_v59 }
 0x227   : > { %v1279_v62 = vpop.eup %1278  ;;  %1294 = vtanh.f32 %v862_v63  ;;  %v831_v21 = vadd.f32 %v799_v35, %v1732_v42  ;;  %v781_v8 = vmul.f32 %v749_v0, %v1739_v51  ;;  %v736_v18 = vmul.f32 %v1747_v61, %v1747_v61 }
 0x228   : > { %v1281_v4 = vpop.eup %1280  ;;  %v953_v37 = vmul.f32 %v921_v58, %v697_v27  ;;  %v922_v7 = vadd.f32 1.0, %v1279_v62  ;;  %1296 = vtanh.f32 %v876_v6  ;;  %v673_v27 = vpop.f32.mrf.mxu1  ;;  %v1775_v55 = vadd.f32 %v671_v3, %v1642_v60 }
 0x229   : > { %v936_v13 = vadd.f32 1.0, %v1281_v4  ;;  %v863_v16 = vmul.f32 0.7978846, %v831_v21  ;;  %v813_v26 = vmul.f32 0.044715, %v781_v8  ;;  %v768_v33 = vmul.f32 %v736_v18, %v1747_v61  ;;  %v643_v8 = vpop.f32.mrf.mxu0 }
 0x22a   : > { %v1283_v9 = vpop.eup %1282  ;;  %v1202_v12 = vpack.c.bf16 %v953_v37, %v952_v5  ;;  %v1778_v1 = vadd.f32 %v639_v47, %v1644_v40  ;;  %v954_v20 = vmul.f32 %v922_v7, %v1723_v34  ;;  %v750_v24 = vmul.f32 %v1775_v55, %v1775_v55  ;;  %v677_v52 = vpop.f32.mrf.mxu1 }
 0x22b   : > { %v1285_v36 = vpop.eup %1284  ;;  %v923_v22 = vadd.f32 1.0, %v1283_v9  ;;  %1298 = vtanh.f32 %v863_v16  ;;  %v845_v39 = vadd.f32 %v813_v26, %v1739_v51  ;;  %v968_v54 = vmul.f32 %v936_v13, %v712_v43 }
 0x22c   : > { %1083 = vst.msk [vmem:[%s1757_s23] sm:$0xff] %vm1761_vm3, %v1202_v12  ;;  %v937_v31 = vadd.f32 1.0, %v1285_v36  ;;  %v1287_v45 = vpop.eup %1286  ;;  %v800_v46 = vmul.f32 0.044715, %v768_v33  ;;  %v714_v10 = vmul.f32 0.5, %v1693_v17  ;;  %v701_v50 = vmul.f32 0.5, %v1696_v2  ;;  %v679_v13 = vpop.f32.mrf.mxu1 }
 0x22d   : > { %v955_v38 = vmul.f32 %v923_v22, %v699_v56  ;;  %v877_v34 = vmul.f32 0.7978846, %v845_v39  ;;  %v782_v53 = vmul.f32 %v750_v24, %v1775_v55  ;;  %v737_v43 = vmul.f32 %v1778_v1, %v1778_v1 }
 0x22e   : > { %v969_v30 = vmul.f32 %v937_v31, %v713_v44  ;;  %v832_v29 = vadd.f32 %v800_v46, %v1747_v61  ;;  %v924_v56 = vadd.f32 1.0, %v1287_v45  ;;  %v1794_v17 = vadd.f32 %v673_v27, %v1644_v40  ;;  %v647_v45 = vpop.f32.mrf.mxu0  ;;  %v681_v24 = vpop.f32.mrf.mxu1 }
 0x22f   : > { %v1203_v49 = vpack.c.bf16 %v955_v38, %v954_v20  ;;  %v1289_v32 = vpop.eup %1288  ;;  %1300 = vtanh.f32 %v877_v34  ;;  %v1797_v2 = vadd.f32 %v641_v48, %v1642_v60  ;;  %v814_v58 = vmul.f32 0.044715, %v782_v53 }
 0x230   : > { %v1210_v28 = vpack.c.bf16 %v969_v30, %v968_v54  ;;  %v1291_v57 = vpop.eup %1290  ;;  %v864_v11 = vmul.f32 0.7978846, %v832_v29  ;;  %v769_v23 = vmul.f32 %v737_v43, %v1778_v1  ;;  %v1804_v59 = vadd.f32 %v677_v52, %v1642_v60 }
 0x231   : > { %1084 = vst.msk [vmem:[%s1757_s23 + $0x8] sm:$0xff] %vm1761_vm3, %v1203_v49  ;;  %v925_v62 = vadd.f32 1.0, %v1291_v57  ;;  %v715_v44 = vmul.f32 0.5, %v1707_v25  ;;  %v702_v63 = vmul.f32 0.5, %v1710_v14  ;;  %v751_v35 = vmul.f32 %v1794_v17, %v1794_v17 }
 0x232   : > { %1091 = vst.msk [vmem:[%s1757_s23 + $0x40] sm:$0xff] %vm1761_vm3, %v1210_v28  ;;  %v938_v0 = vadd.f32 1.0, %v1289_v32  ;;  %1302 = vtanh.f32 %v864_v11  ;;  %v846_v3 = vadd.f32 %v814_v58, %v1775_v55  ;;  %v801_v4 = vmul.f32 0.044715, %v769_v23  ;;  %v649_v23 = vpop.f32.mrf.mxu0 }
 0x233   : > { %v1293_v5 = vpop.eup %1292  ;;  %v956_v37 = vmul.f32 %v924_v56, %v700_v15  ;;  %v957_v6 = vmul.f32 %v925_v62, %v701_v50  ;;  %v783_v7 = vmul.f32 %v751_v35, %v1794_v17  ;;  %v738_v21 = vmul.f32 %v1797_v2, %v1797_v2  ;;  %v683_v62 = vpop.f32.mrf.mxu1 }
 0x234   : > { %v1295_v25 = vpop.eup %1294  ;;  %v939_v14 = vadd.f32 1.0, %v1293_v5  ;;  %v878_v47 = vmul.f32 0.7978846, %v846_v3  ;;  %v833_v9 = vadd.f32 %v801_v4, %v1778_v1  ;;  %v752_v12 = vmul.f32 %v1804_v59, %v1804_v59 }
 0x235   : > { %v1204_v18 = vpack.c.bf16 %v957_v6, %v956_v37  ;;  %v716_v15 = vmul.f32 0.5, %v1714_v19  ;;  %v815_v36 = vmul.f32 0.044715, %v783_v7  ;;  %v770_v22 = vmul.f32 %v738_v21, %v1797_v2  ;;  %v1297_v16 = vpop.eup %1296 }
 0x236   : > { %v970_v26 = vmul.f32 %v938_v0, %v714_v10  ;;  %v971_v27 = vmul.f32 %v939_v14, %v715_v44  ;;  %v926_v31 = vadd.f32 1.0, %v1295_v25  ;;  %v865_v33 = vmul.f32 0.7978846, %v833_v9 }
 0x237   : > { %1085 = vst.msk [vmem:[%s1757_s23 + $0x10] sm:$0xff] %vm1761_vm3, %v1204_v18  ;;  %1304 = vtanh.f32 %v878_v47  ;;  %v847_v20 = vadd.f32 %v815_v36, %v1794_v17  ;;  %v802_v38 = vmul.f32 0.044715, %v770_v22  ;;  %v784_v39 = vmul.f32 %v752_v12, %v1804_v59 }
 0x238   : > { %v1299_v19 = vpop.eup %1298  ;;  %v1211_v54 = vpack.c.bf16 %v971_v27, %v970_v26  ;;  %v703_v30 = vmul.f32 0.5, %v1732_v42  ;;  %1306 = vtanh.f32 %v865_v33  ;;  %v1826_v46 = vadd.f32 %v643_v8, %v1644_v40 }
 0x239   : > { %v927_v48 = vadd.f32 1.0, %v1299_v19  ;;  %v879_v49 = vmul.f32 0.7978846, %v847_v20  ;;  %v834_v10 = vadd.f32 %v802_v38, %v1797_v2  ;;  %v816_v50 = vmul.f32 0.044715, %v784_v39 }
 0x23a   : > { %1092 = vst.msk [vmem:[%s1757_s23 + $0x48] sm:$0xff] %vm1761_vm3, %v1211_v54  ;;  %v940_v34 = vadd.f32 1.0, %v1297_v16  ;;  %v739_v52 = vmul.f32 %v1826_v46, %v1826_v46  ;;  %v1835_v28 = vadd.f32 %v679_v13, %v1644_v40  ;;  %v1838_v42 = vadd.f32 %v647_v45, %v1642_v60  ;;  %v687_v13 = vpop.f32.mrf.mxu1  ;;  %v651_v16 = vpop.f32.mrf.mxu0 }
 0x23b   : > { %v958_v29 = vmul.f32 %v926_v31, %v702_v63  ;;  %v959_v53 = vmul.f32 %v927_v48, %v703_v30  ;;  %1308 = vtanh.f32 %v879_v49  ;;  %v848_v43 = vadd.f32 %v816_v50, %v1804_v59 }
 0x23c   : > { %v1301_v32 = vpop.eup %1300  ;;  %v717_v56 = vmul.f32 0.5, %v1739_v51  ;;  %v866_v57 = vmul.f32 0.7978846, %v834_v10  ;;  %v771_v11 = vmul.f32 %v739_v52, %v1826_v46  ;;  %v753_v58 = vmul.f32 %v1835_v28, %v1835_v28 }
 0x23d   : > { %v1205_v44 = vpack.c.bf16 %v959_v53, %v958_v29  ;;  %v941_v35 = vadd.f32 1.0, %v1301_v32  ;;  %v704_v63 = vmul.f32 0.5, %v1747_v61  ;;  %v880_v0 = vmul.f32 0.7978846, %v848_v43 }
 0x23e   : > { %v803_v3 = vmul.f32 0.044715, %v771_v11  ;;  %v785_v4 = vmul.f32 %v753_v58, %v1835_v28  ;;  %v740_v51 = vmul.f32 %v1838_v42, %v1838_v42  ;;  %v1850_v5 = vadd.f32 %v681_v24, %v1642_v60  ;;  %v689_v24 = vpop.f32.mrf.mxu1 }
 0x23f   : > { %v1303_v37 = vpop.eup %1302  ;;  %v972_v6 = vmul.f32 %v940_v34, %v716_v15  ;;  %1086 = vst.msk [vmem:[%s1757_s23 + $0x18] sm:$0xff] %vm1761_vm3, %v1205_v44  ;;  %v973_v7 = vmul.f32 %v941_v35, %v717_v56  ;;  %v1856_v21 = vadd.f32 %v649_v23, %v1644_v40  ;;  %v1859_v61 = vadd.f32 %v683_v62, %v1644_v40  ;;  %v653_v23 = vpop.f32.mrf.mxu0 }
 0x240   : > { %1310 = vtanh.f32 %v866_v57  ;;  %v835_v8 = vadd.f32 %v803_v3, %v1826_v46  ;;  %v817_v25 = vmul.f32 0.044715, %v785_v4  ;;  %v772_v14 = vmul.f32 %v740_v51, %v1838_v42  ;;  %v691_v62 = vpop.f32.mrf.mxu1 }
 0x241   : > { %v1212_v47 = vpack.c.bf16 %v973_v7, %v972_v6  ;;  %v718_v9 = vmul.f32 0.5, %v1775_v55  ;;  %1312 = vtanh.f32 %v880_v0  ;;  %v754_v12 = vmul.f32 %v1850_v5, %v1850_v5 }
 0x242   : > { %v928_v18 = vadd.f32 1.0, %v1303_v37  ;;  %v867_v15 = vmul.f32 0.7978846, %v835_v8  ;;  %v849_v36 = vadd.f32 %v817_v25, %v1835_v28  ;;  %v804_v22 = vmul.f32 0.044715, %v772_v14  ;;  %v693_v14 = vpop.f32.mrf.mxu1 }
 0x243   : > { %1093 = vst.msk [vmem:[%s1757_s23 + $0x50] sm:$0xff] %vm1761_vm3, %v1212_v47  ;;  %v705_v26 = vmul.f32 0.5, %v1778_v1  ;;  %v786_v27 = vmul.f32 %v754_v12, %v1850_v5  ;;  %v741_v55 = vmul.f32 %v1856_v21, %v1856_v21  ;;  %v755_v31 = vmul.f32 %v1859_v61, %v1859_v61 }
 0x244   : > { %v1305_v33 = vpop.eup %1304  ;;  %v719_v20 = vmul.f32 0.5, %v1794_v17  ;;  %1314 = vtanh.f32 %v867_v15  ;;  %v881_v38 = vmul.f32 0.7978846, %v849_v36  ;;  %v836_v39 = vadd.f32 %v804_v22, %v1838_v42 }
 0x245   : > { %v1307_v45 = vpop.eup %1306  ;;  %v818_v19 = vmul.f32 0.044715, %v786_v27  ;;  %v773_v54 = vmul.f32 %v741_v55, %v1856_v21  ;;  %v787_v1 = vmul.f32 %v755_v31, %v1859_v61  ;;  %v1881_v30 = vadd.f32 %v651_v16, %v1642_v60 }
 0x246   : > { %v960_v48 = vmul.f32 %v928_v18, %v704_v63  ;;  %v929_v49 = vadd.f32 1.0, %v1307_v45  ;;  %1316 = vtanh.f32 %v881_v38  ;;  %v868_v10 = vmul.f32 0.7978846, %v836_v39 }
 0x247   : > { %v942_v50 = vadd.f32 1.0, %v1305_v33  ;;  %v850_v17 = vadd.f32 %v818_v19, %v1850_v5  ;;  %v805_v34 = vmul.f32 0.044715, %v773_v54  ;;  %v819_v52 = vmul.f32 0.044715, %v787_v1 }
 0x248   : > { %v1309_v29 = vpop.eup %1308  ;;  %v961_v53 = vmul.f32 %v929_v49, %v705_v26  ;;  %1318 = vtanh.f32 %v868_v10  ;;  %v742_v43 = vmul.f32 %v1881_v30, %v1881_v30  ;;  %v1887_v32 = vadd.f32 %v687_v13, %v1642_v60 }
 0x249   : > { %v943_v56 = vadd.f32 1.0, %v1309_v29  ;;  %v882_v57 = vmul.f32 0.7978846, %v850_v17  ;;  %v837_v11 = vadd.f32 %v805_v34, %v1856_v21  ;;  %v851_v58 = vadd.f32 %v819_v52, %v1859_v61 }
 0x24a   : > { %v1206_v44 = vpack.c.bf16 %v961_v53, %v960_v48  ;;  %v774_v35 = vmul.f32 %v742_v43, %v1881_v30  ;;  %v756_v63 = vmul.f32 %v1887_v32, %v1887_v32  ;;  %v974_v0 = vmul.f32 %v942_v50, %v718_v9 }
 0x24b   : > { %v975_v3 = vmul.f32 %v943_v56, %v719_v20  ;;  %1320 = vtanh.f32 %v882_v57  ;;  %v869_v4 = vmul.f32 0.7978846, %v837_v11  ;;  %v883_v51 = vmul.f32 0.7978846, %v851_v58 }
 0x24c   : > { %1087 = vst.msk [vmem:[%s1757_s23 + $0x20] sm:$0xff] %vm1761_vm3, %v1206_v44  ;;  %v806_v37 = vmul.f32 0.044715, %v774_v35  ;;  %v788_v6 = vmul.f32 %v756_v63, %v1887_v32  ;;  %v1899_v7 = vadd.f32 %v653_v23, %v1644_v40  ;;  %v706_v13 = vmul.f32 0.5, %v1797_v2 }
 0x24d   : > { %v1311_v8 = vpop.eup %1310  ;;  %v1213_v25 = vpack.c.bf16 %v975_v3, %v974_v0  ;;  %1322 = vtanh.f32 %v869_v4  ;;  %v1909_v15 = vadd.f32 %v689_v24, %v1644_v40  ;;  %v1912_v36 = vadd.f32 %v691_v62, %v1642_v60 }
 0x24e   : > { %v1313_v47 = vpop.eup %1312  ;;  %1324 = vtanh.f32 %v883_v51  ;;  %v838_v9 = vadd.f32 %v806_v37, %v1881_v30  ;;  %v820_v12 = vmul.f32 0.044715, %v788_v6  ;;  %v743_v18 = vmul.f32 %v1899_v7, %v1899_v7 }
 0x24f   : > { %1094 = vst.msk [vmem:[%s1757_s23 + $0x58] sm:$0xff] %vm1761_vm3, %v1213_v25  ;;  %v930_v22 = vadd.f32 1.0, %v1311_v8  ;;  %v720_v16 = vmul.f32 0.5, %v1804_v59  ;;  %v1917_v27 = vadd.f32 %v693_v14, %v1644_v40  ;;  %v707_v2 = vmul.f32 0.5, %v1826_v46 }
 0x250   : > { %v852_v26 = vadd.f32 %v820_v12, %v1887_v32  ;;  %v870_v31 = vmul.f32 0.7978846, %v838_v9  ;;  %v775_v33 = vmul.f32 %v743_v18, %v1899_v7  ;;  %v757_v20 = vmul.f32 %v1909_v15, %v1909_v15 }
 0x251   : > { %v1315_v55 = vpop.eup %1314  ;;  %v944_v38 = vadd.f32 1.0, %v1313_v47  ;;  %v721_v39 = vmul.f32 0.5, %v1835_v28  ;;  %v758_v59 = vmul.f32 %v1912_v36, %v1912_v36  ;;  %v759_v46 = vmul.f32 %v1917_v27, %v1917_v27 }
 0x252   : > { %v931_v60 = vadd.f32 1.0, %v1315_v55  ;;  %v884_v19 = vmul.f32 0.7978846, %v852_v26  ;;  %v807_v40 = vmul.f32 0.044715, %v775_v33  ;;  %v789_v54 = vmul.f32 %v757_v20, %v1909_v15 }
 0x253   : > { %v1317_v45 = vpop.eup %1316  ;;  %v962_v1 = vmul.f32 %v930_v22, %v706_v13  ;;  %v790_v49 = vmul.f32 %v758_v59, %v1912_v36  ;;  %1326 = vtanh.f32 %v870_v31  ;;  %v791_v17 = vmul.f32 %v759_v46, %v1917_v27 }
 0x254   : > { %v963_v24 = vmul.f32 %v931_v60, %v707_v2  ;;  %v945_v48 = vadd.f32 1.0, %v1317_v45  ;;  %v839_v28 = vadd.f32 %v807_v40, %v1899_v7  ;;  %v821_v50 = vmul.f32 0.044715, %v789_v54 }
 0x255   : > { %v1319_v10 = vpop.eup %1318  ;;  %v976_v34 = vmul.f32 %v944_v38, %v720_v16  ;;  %v822_v53 = vmul.f32 0.044715, %v790_v49  ;;  %1328 = vtanh.f32 %v884_v19  ;;  %v823_v57 = vmul.f32 0.044715, %v791_v17 }
 0x256   : > { %v1207_v52 = vpack.c.bf16 %v963_v24, %v962_v1  ;;  %v977_v29 = vmul.f32 %v945_v48, %v721_v39  ;;  %v871_v43 = vmul.f32 0.7978846, %v839_v28  ;;  %v853_v56 = vadd.f32 %v821_v50, %v1909_v15 }
 0x257   : > { %v854_v23 = vadd.f32 %v822_v53, %v1912_v36  ;;  %v932_v62 = vadd.f32 1.0, %v1319_v10  ;;  %v855_v35 = vadd.f32 %v823_v57, %v1917_v27  ;;  %v708_v0 = vmul.f32 0.5, %v1838_v42 }
 0x258   : > { %v1321_v11 = vpop.eup %1320  ;;  %1088 = vst.msk [vmem:[%s1757_s23 + $0x28] sm:$0xff] %vm1761_vm3, %v1207_v52  ;;  %v1214_v58 = vpack.c.bf16 %v977_v29, %v976_v34  ;;  %1330 = vtanh.f32 %v871_v43  ;;  %v885_v44 = vmul.f32 0.7978846, %v853_v56  ;;  %v709_v37 = vmul.f32 0.5, %v1856_v21 }
 0x259   : > { %v946_v3 = vadd.f32 1.0, %v1321_v11  ;;  %v886_v4 = vmul.f32 0.7978846, %v854_v23  ;;  %v887_v8 = vmul.f32 0.7978846, %v855_v35  ;;  %v722_v25 = vmul.f32 0.5, %v1850_v5 }
 0x25a   : > { %v1323_v63 = vpop.eup %1322  ;;  %1095 = vst.msk [vmem:[%s1757_s23 + $0x60] sm:$0xff] %vm1761_vm3, %v1214_v58  ;;  %1332 = vtanh.f32 %v885_v44  ;;  %v723_v14 = vmul.f32 0.5, %v1859_v61  ;;  %v964_v9 = vmul.f32 %v932_v62, %v708_v0  ;;  %v710_v61 = vmul.f32 0.5, %v1881_v30 }
 0x25b   : > { %v1325_v51 = vpop.eup %1324  ;;  %v933_v6 = vadd.f32 1.0, %v1323_v63  ;;  %1334 = vtanh.f32 %v886_v4  ;;  %v978_v42 = vmul.f32 %v946_v3, %v722_v25  ;;  %v711_v2 = vmul.f32 0.5, %v1899_v7 }
 0x25c   : > { %v947_v47 = vadd.f32 1.0, %v1325_v51  ;;  %1336 = vtanh.f32 %v887_v8  ;;  %v724_v20 = vmul.f32 0.5, %v1887_v32  ;;  %v725_v59 = vmul.f32 0.5, %v1909_v15 }
 0x25d   : > { %v965_v12 = vmul.f32 %v933_v6, %v709_v37  ;;  %v726_v40 = vmul.f32 0.5, %v1912_v36  ;;  %v727_v54 = vmul.f32 0.5, %v1917_v27 }
 0x25e   : > { %v979_v13 = vmul.f32 %v947_v47, %v723_v14 }
 0x25f   : > { %v1208_v18 = vpack.c.bf16 %v965_v12, %v964_v9 }
 0x260   : > { %v1215_v22 = vpack.c.bf16 %v979_v13, %v978_v42  ;;  %v1327_v21 = vpop.eup %1326 }
 0x261   : > { %1089 = vst.msk [vmem:[%s1757_s23 + $0x30] sm:$0xff] %vm1761_vm3, %v1208_v18  ;;  %v934_v5 = vadd.f32 1.0, %v1327_v21 }
 0x262   : > { %1096 = vst.msk [vmem:[%s1757_s23 + $0x68] sm:$0xff] %vm1761_vm3, %v1215_v22  ;;  %v1329_v16 = vpop.eup %1328 }
 0x263   : > { %v948_v55 = vadd.f32 1.0, %v1329_v16  ;;  %v966_v60 = vmul.f32 %v934_v5, %v710_v61 }
 0x265   : > { %v1331_v26 = vpop.eup %1330  ;;  %v980_v7 = vmul.f32 %v948_v55, %v724_v20 }
 0x266   : > { %v935_v31 = vadd.f32 1.0, %v1331_v26 }
 0x267   : > { %v1333_v33 = vpop.eup %1332 }
 0x268   : > { %v1335_v38 = vpop.eup %1334  ;;  %v967_v39 = vmul.f32 %v935_v31, %v711_v2  ;;  %v949_v45 = vadd.f32 1.0, %v1333_v33 }
 0x269   : > { %v1337_v19 = vpop.eup %1336  ;;  %v950_v30 = vadd.f32 1.0, %v1335_v38 }
 0x26a   : > { %v1209_v46 = vpack.c.bf16 %v967_v39, %v966_v60  ;;  %v981_v1 = vmul.f32 %v949_v45, %v725_v59  ;;  %v951_v24 = vadd.f32 1.0, %v1337_v19 }
 0x26b   : > { %v982_v48 = vmul.f32 %v950_v30, %v726_v40 }
 0x26c   : > { %1090 = vst.msk [vmem:[%s1757_s23 + $0x38] sm:$0xff] %vm1761_vm3, %v1209_v46  ;;  %v1216_v32 = vpack.c.bf16 %v981_v1, %v980_v7  ;;  %v983_v49 = vmul.f32 %v951_v24, %v727_v54 }
 0x26e   : > { %1097 = vst.msk [vmem:[%s1757_s23 + $0x70] sm:$0xff] %vm1761_vm3, %v1216_v32  ;;  %v1217_v15 = vpack.c.bf16 %v983_v49, %v982_v48 }
 0x270   : > { %1098 = vst.msk [vmem:[%s1757_s23 + $0x78] sm:$0xff] %vm1761_vm3, %v1217_v15 }
 0x271 PF: > { %s15_s18 = sadd.s32 1, %s1344_s18  }
 0x272   : > { %p12_p4 = scmp.ge.s32.totalorder %s15_s18, 4  }
 0x274   :  { %14 = sbr.rel (!%p12_p4) target bundleno = 1 (0x1), region = 70 }

// kernel: ast_forward.11
= control target key start
LH: loop header
LB: loop body
LE: loop exit
PB: predicated region body
PF: predicated region fallthrough
CT: control target
= control target key end

     0   :  { %s1025_s18 = smov 0   ;;  %s1388_s0 = inlined_call_operand.vmem [shape: f32[256,48], index: 0, kind: input, shape index: {}]   ;;  %s1389_s1 = inlined_call_operand.vmem [shape: f32[1,48], index: 1, kind: input, shape index: {}]   ;;  %s1390_s2 = inlined_call_operand.vmem [shape: f32[1,48], index: 2, kind: input, shape index: {}]   ;;  %s1391_s3 = inlined_call_operand.vmem [shape: bf16[48,144], index: 3, kind: input, shape index: {}]   ;;  %s1392_s4 = inlined_call_operand.vmem [shape: f32[1,144], index: 4, kind: input, shape index: {}]   ;;  %s1393_s5 = inlined_call_operand.vmem [shape: bf16[256,144], index: 5, kind: output, shape index: {}]  }
   0x1 LB: > { %s869_s19 = sadd.s32 4294967295, %s992_s18   ;;  %p873_p0 = scmp.ge.s32.totalorder %s992_s18, 1  ;;  %s992_s18 = sphi %s1025_s18, %s15_s18  }
   0x2   : > { %p188_p1 = scmp.lt.s32.totalorder %s992_s18, 3 }
   0x4   : > { %p189_p2 = pnand %p873_p0, %p188_p1 }
   0x5   : > { %s874_s20 = sshll.u32 (!%p189_p2), %s869_s19, 4 }
   0x6   : > { %192 = sbr.rel (%p189_p2) target bundleno = 562 (0x232), region = 40  ;;  %p218_p3 = scmp.lt.s32.totalorder (!%p189_p2), %s874_s20, 31 }
   0xb   : > { %s1397_s20 = smov (!%p218_p3, %s874_s20), 31  ;;  %vm247_vm0 = vcmask 392192   ;;  %vm792_vm1 = vcmask 1043456   ;;  %vm793_vm2 = vcmask 130052  }
   0xc   : > { %s875_s21 = sshll.u32 %s1397_s20, 3  ;;  %vm1303_vm3 = vmor %vm793_vm2, %vm792_vm1 }
   0xd   : > { %s1041_s24 = scalar_lea.vmem %s1388_s0, %s875_s21  ;;  %s1301_s23 = scalar_lea.vmem %s1393_s5, %s875_s21 }
   0xe   : > { %v231_v0 = vld [vmem:[%s1041_s24] sm:$0xff]  ;;  %v232_v2 = vld [vmem:[%s1041_s24 + $0x8] sm:$0xff]  ;;  %v233_v8 = vld [vmem:[%s1041_s24 + $0x10] sm:$0xff] }
   0xf   : > { %v239_v1 = vld [vmem:[%s1041_s24 + $0x40] sm:$0xff]  ;;  %v248_v3 = vsel %vm247_vm0, %v231_v0, 0.0  ;;  %v240_v5 = vld [vmem:[%s1041_s24 + $0x48] sm:$0xff]  ;;  %v251_v6 = vsel %vm247_vm0, %v232_v2, 0.0  ;;  %v234_v9 = vld [vmem:[%s1041_s24 + $0x18] sm:$0xff]  ;;  %v254_v10 = vsel %vm247_vm0, %v233_v8, 0.0 }
  0x10   : > { %v272_v4 = vsel %vm247_vm0, %v239_v1, 0.0  ;;  %249 = vadd.xlane.f32.xlu0 %v248_v3  ;;  %v275_v7 = vsel %vm247_vm0, %v240_v5, 0.0  ;;  %v257_v11 = vsel %vm247_vm0, %v234_v9, 0.0  ;;  %v1056_v12 = vld [vmem:[%s1041_s24 + $0x50] sm:$0xff]  ;;  %v1059_v13 = vld [vmem:[%s1041_s24 + $0x58] sm:$0xff]  ;;  %v1066_v16 = vld [vmem:[%s1041_s24 + $0x20] sm:$0xff] }
  0x11   : > { %273 = vadd.xlane.f32.xlu1 %v272_v4  ;;  %v278_v14 = vsel %vm247_vm0, %v1056_v12, 0.0  ;;  %v281_v15 = vsel %vm247_vm0, %v1059_v13, 0.0  ;;  %v1069_v17 = vld [vmem:[%s1041_s24 + $0x28] sm:$0xff]  ;;  %v260_v18 = vsel %vm247_vm0, %v1066_v16, 0.0  ;;  %v1076_v20 = vld [vmem:[%s1041_s24 + $0x60] sm:$0xff]  ;;  %v1086_v24 = vld [vmem:[%s1041_s24 + $0x30] sm:$0xff] }
  0x12   : > { %v263_v19 = vsel %vm247_vm0, %v1069_v17, 0.0  ;;  %v1079_v21 = vld [vmem:[%s1041_s24 + $0x68] sm:$0xff]  ;;  %v284_v22 = vsel %vm247_vm0, %v1076_v20, 0.0  ;;  %v1089_v25 = vld [vmem:[%s1041_s24 + $0x38] sm:$0xff]  ;;  %v266_v26 = vsel %vm247_vm0, %v1086_v24, 0.0  ;;  %v1096_v28 = vld [vmem:[%s1041_s24 + $0x70] sm:$0xff] }
  0x13   : > { %v287_v23 = vsel %vm247_vm0, %v1079_v21, 0.0  ;;  %v269_v27 = vsel %vm247_vm0, %v1089_v25, 0.0  ;;  %v1099_v29 = vld [vmem:[%s1041_s24 + $0x78] sm:$0xff]  ;;  %v290_v30 = vsel %vm247_vm0, %v1096_v28, 0.0 }
  0x14   : > { %252 = vadd.xlane.f32.xlu0 %v251_v6  ;;  %v293_v31 = vsel %vm247_vm0, %v1099_v29, 0.0 }
  0x15   : > { %276 = vadd.xlane.f32.xlu1 %v275_v7 }
  0x18   : > { %255 = vadd.xlane.f32.xlu0 %v254_v10 }
  0x19   : > { %258 = vadd.xlane.f32.xlu1 %v257_v11 }
  0x1c   : > { %279 = vadd.xlane.f32.xlu0 %v278_v14 }
  0x1d   : > { %282 = vadd.xlane.f32.xlu1 %v281_v15 }
  0x20   : > { %261 = vadd.xlane.f32.xlu0 %v260_v18 }
  0x21   : > { %264 = vadd.xlane.f32.xlu1 %v263_v19 }
  0x24   : > { %285 = vadd.xlane.f32.xlu0 %v284_v22 }
  0x25   : > { %288 = vadd.xlane.f32.xlu1 %v287_v23 }
  0x28   : > { %267 = vadd.xlane.f32.xlu0 %v266_v26 }
  0x29   : > { %270 = vadd.xlane.f32.xlu1 %v269_v27 }
  0x2c   : > { %291 = vadd.xlane.f32.xlu0 %v290_v30 }
  0x2d   : > { %294 = vadd.xlane.f32.xlu1 %v293_v31 }
  0x99   : > { %v250_v32 = vpop.xlane.xlu0 %249 }
  0x9a   : > { %v274_v33 = vpop.xlane.xlu1 %273  ;;  %v297_v34 = vmul.f32 0.020833334, %v250_v32 }
  0x9b   : > { %v305_v35 = vmul.f32 0.020833334, %v274_v33 }
  0x9c   : > { %v1105_v36 = vsub.f32 %v231_v0, %v297_v34 }
  0x9d   : > { %v1107_v37 = vsub.f32 %v239_v1, %v305_v35  ;;  %v253_v38 = vpop.xlane.xlu0 %252 }
  0x9e   : > { %v277_v39 = vpop.xlane.xlu1 %276  ;;  %v298_v40 = vmul.f32 0.020833334, %v253_v38  ;;  %v329_v42 = vmul.f32 %v1105_v36, %v1105_v36 }
  0x9f   : > { %v306_v41 = vmul.f32 0.020833334, %v277_v39  ;;  %v337_v43 = vmul.f32 %v1107_v37, %v1107_v37 }
  0xa0   : > { %v1113_v44 = vsub.f32 %v232_v2, %v298_v40  ;;  %v345_v46 = vsel %vm247_vm0, %v329_v42, 0.0 }
  0xa1   : > { %v1115_v45 = vsub.f32 %v240_v5, %v306_v41  ;;  %346 = vadd.xlane.f32.xlu0 %v345_v46  ;;  %v256_v47 = vpop.xlane.xlu0 %255  ;;  %v369_v49 = vsel %vm247_vm0, %v337_v43, 0.0 }
  0xa2   : > { %v259_v48 = vpop.xlane.xlu1 %258  ;;  %v299_v50 = vmul.f32 0.020833334, %v256_v47  ;;  %v330_v52 = vmul.f32 %v1113_v44, %v1113_v44 }
  0xa3   : > { %v300_v51 = vmul.f32 0.020833334, %v259_v48  ;;  %v338_v53 = vmul.f32 %v1115_v45, %v1115_v45 }
  0xa4   : > { %v1123_v54 = vsub.f32 %v233_v8, %v299_v50  ;;  %v348_v56 = vsel %vm247_vm0, %v330_v52, 0.0 }
  0xa5   : > { %v1125_v55 = vsub.f32 %v234_v9, %v300_v51  ;;  %370 = vadd.xlane.f32.xlu0 %v369_v49  ;;  %349 = vadd.xlane.f32.xlu1 %v348_v56  ;;  %v280_v57 = vpop.xlane.xlu0 %279  ;;  %v372_v59 = vsel %vm247_vm0, %v338_v53, 0.0  ;;  %v948_v56 = vld [vmem:[%s1391_s3 + $0x14] ss:$8 sps:$4 sm:$0xff]  }
  0xa6   : > { %v283_v58 = vpop.xlane.xlu1 %282  ;;  %v307_v60 = vmul.f32 0.020833334, %v280_v57  ;;  %v331_v62 = vmul.f32 %v1123_v54, %v1123_v54  ;;  %v950_v57 = vld [vmem:[%s1391_s3 + $0x10] ss:$8 sps:$4 sm:$0xff]  }
  0xa7   : > { %v308_v61 = vmul.f32 0.020833334, %v283_v58  ;;  %v332_v63 = vmul.f32 %v1125_v55, %v1125_v55  ;;  %v951_v58 = vld [vmem:[%s1391_s3 + $0x4] ss:$8 sps:$4 sm:$0xff]  }
  0xa8   : > { %v1134_v0 = vsub.f32 %v1056_v12, %v307_v60  ;;  %v351_v2 = vsel %vm247_vm0, %v331_v62, 0.0  ;;  %v994_v60 = vmov 0  }
  0xa9   : > { %v1137_v1 = vsub.f32 %v1059_v13, %v308_v61  ;;  %373 = vadd.xlane.f32.xlu1 %v372_v59  ;;  %352 = vadd.xlane.f32.xlu0 %v351_v2  ;;  %v262_v3 = vpop.xlane.xlu0 %261  ;;  %v354_v5 = vsel %vm247_vm0, %v332_v63, 0.0  ;;  %v953_v59 = vld [vmem:[%s1391_s3] ss:$8 sps:$4 sm:$0xff]  }
  0xaa   : > { %v265_v4 = vpop.xlane.xlu1 %264  ;;  %v301_v6 = vmul.f32 0.020833334, %v262_v3  ;;  %v339_v8 = vmul.f32 %v1134_v0, %v1134_v0  ;;  %615 = vmatprep.mubr.bf16.mxu0 %v994_v60  ;;  %655 = vmatprep.mubr.bf16.mxu1 %v994_v60 }
  0xab   : > { %v302_v7 = vmul.f32 0.020833334, %v265_v4  ;;  %v340_v9 = vmul.f32 %v1137_v1, %v1137_v1 }
  0xac   : > { %v1146_v10 = vsub.f32 %v1066_v16, %v301_v6  ;;  %v375_v12 = vsel %vm247_vm0, %v339_v8, 0.0 }
  0xad   : > { %v1149_v11 = vsub.f32 %v1069_v17, %v302_v7  ;;  %355 = vadd.xlane.f32.xlu1 %v354_v5  ;;  %376 = vadd.xlane.f32.xlu0 %v375_v12  ;;  %v286_v13 = vpop.xlane.xlu0 %285  ;;  %v378_v15 = vsel %vm247_vm0, %v340_v9, 0.0 }
  0xae   : > { %v289_v14 = vpop.xlane.xlu1 %288  ;;  %v309_v18 = vmul.f32 0.020833334, %v286_v13  ;;  %v333_v22 = vmul.f32 %v1146_v10, %v1146_v10 }
  0xaf   : > { %v310_v19 = vmul.f32 0.020833334, %v289_v14  ;;  %v334_v16 = vmul.f32 %v1149_v11, %v1149_v11 }
  0xb0   : > { %v1158_v23 = vsub.f32 %v1076_v20, %v309_v18  ;;  %v357_v26 = vsel %vm247_vm0, %v333_v22, 0.0 }
  0xb1   : > { %v1161_v17 = vsub.f32 %v1079_v21, %v310_v19  ;;  %379 = vadd.xlane.f32.xlu1 %v378_v15  ;;  %358 = vadd.xlane.f32.xlu0 %v357_v26  ;;  %v268_v27 = vpop.xlane.xlu0 %267  ;;  %v360_v31 = vsel %vm247_vm0, %v334_v16, 0.0 }
  0xb2   : > { %v271_v30 = vpop.xlane.xlu1 %270  ;;  %v303_v32 = vmul.f32 0.020833334, %v268_v27  ;;  %v341_v34 = vmul.f32 %v1158_v23, %v1158_v23 }
  0xb3   : > { %v304_v33 = vmul.f32 0.020833334, %v271_v30  ;;  %v342_v20 = vmul.f32 %v1161_v17, %v1161_v17 }
  0xb4   : > { %v1170_v35 = vsub.f32 %v1086_v24, %v303_v32  ;;  %v381_v38 = vsel %vm247_vm0, %v341_v34, 0.0 }
  0xb5   : > { %v1173_v21 = vsub.f32 %v1089_v25, %v304_v33  ;;  %361 = vadd.xlane.f32.xlu1 %v360_v31  ;;  %382 = vadd.xlane.f32.xlu0 %v381_v38  ;;  %v292_v39 = vpop.xlane.xlu0 %291  ;;  %v384_v41 = vsel %vm247_vm0, %v342_v20, 0.0 }
  0xb6   : > { %v295_v40 = vpop.xlane.xlu1 %294  ;;  %v311_v42 = vmul.f32 0.020833334, %v292_v39  ;;  %v335_v46 = vmul.f32 %v1170_v35, %v1170_v35 }
  0xb7   : > { %v312_v43 = vmul.f32 0.020833334, %v295_v40  ;;  %v336_v24 = vmul.f32 %v1173_v21, %v1173_v21  ;;  %v1219_v40 = vld [vmem:[%s1389_s1] ss:$0 sm:$0xff] }
  0xb8   : > { %v1182_v47 = vsub.f32 %v1096_v28, %v311_v42  ;;  %v363_v48 = vsel %vm247_vm0, %v335_v46, 0.0  ;;  %v945_v28 = vld [vmem:[%s1391_s3 + $0x24] ss:$8 sps:$4 sm:$0xff]  }
  0xb9   : > { %v1185_v25 = vsub.f32 %v1099_v29, %v312_v43  ;;  %385 = vadd.xlane.f32.xlu1 %v384_v41  ;;  %364 = vadd.xlane.f32.xlu0 %v363_v48  ;;  %v366_v49 = vsel %vm247_vm0, %v336_v24, 0.0  ;;  %v947_v29 = vld [vmem:[%s1391_s3 + $0x20] ss:$8 sps:$4 sm:$0xff]  }
  0xba   : > { %v343_v50 = vmul.f32 %v1182_v47, %v1182_v47  ;;  %593 = vmatprep.subr.bf16.mxu0 %v945_v28  ;;  %930 = vmatprep.subr.bf16.mxu1 %v945_v28 }
  0xbb   : > { %v344_v51 = vmul.f32 %v1185_v25, %v1185_v25  ;;  %594 = vmatpush1.bf16.msra.mxu0 %v947_v29  ;;  %933 = vmatpush1.bf16.msra.mxu1 %v947_v29 }
  0xbc   : > { %v387_v52 = vsel %vm247_vm0, %v343_v50, 0.0  ;;  %595 = vmatprep.subr.bf16.mxu0 %v948_v56  ;;  %931 = vmatprep.subr.bf16.mxu1 %v948_v56 }
  0xbd   : > { %367 = vadd.xlane.f32.xlu1 %v366_v49  ;;  %388 = vadd.xlane.f32.xlu0 %v387_v52  ;;  %v390_v53 = vsel %vm247_vm0, %v344_v51, 0.0 }
  0xbf   : > { %596 = vmatpush1.bf16.msra.mxu0 %v950_v57  ;;  %934 = vmatpush1.bf16.msra.mxu1 %v950_v57 }
  0xc0   : > { %597 = vmatprep.subr.bf16.mxu0 %v951_v58  ;;  %932 = vmatprep.subr.bf16.mxu1 %v951_v58 }
  0xc1   : > { %391 = vadd.xlane.f32.xlu1 %v390_v53 }
  0xc3   : > { %598 = vmatpush1.bf16.msra.mxu0 %v953_v59  ;;  %935 = vmatpush1.bf16.msra.mxu1 %v953_v59 }
 0x12a   : > { %v347_v61 = vpop.xlane.xlu0 %346 }
 0x12b   : > { %v393_v62 = vmul.f32 0.020833334, %v347_v61 }
 0x12d   : > { %v409_v63 = vadd.f32 1e-06, %v393_v62 }
 0x12e   : > { %v350_v2 = vpop.xlane.xlu1 %349  ;;  %v371_v3 = vpop.xlane.xlu0 %370 }
 0x12f   : > { %954 = vrsqrt.f32 %v409_v63  ;;  %v394_v4 = vmul.f32 0.020833334, %v350_v2  ;;  %v401_v5 = vmul.f32 0.020833334, %v371_v3 }
 0x131   : > { %v410_v6 = vadd.f32 1e-06, %v394_v4  ;;  %v417_v7 = vadd.f32 1e-06, %v401_v5 }
 0x132   : > { %v374_v8 = vpop.xlane.xlu1 %373  ;;  %v353_v9 = vpop.xlane.xlu0 %352 }
 0x133   : > { %956 = vrsqrt.f32 %v410_v6  ;;  %v402_v12 = vmul.f32 0.020833334, %v374_v8  ;;  %v395_v13 = vmul.f32 0.020833334, %v353_v9 }
 0x134   : > { %958 = vrsqrt.f32 %v417_v7 }
 0x135   : > { %v418_v14 = vadd.f32 1e-06, %v402_v12  ;;  %v411_v15 = vadd.f32 1e-06, %v395_v13 }
 0x136   : > { %v356_v18 = vpop.xlane.xlu1 %355  ;;  %v377_v19 = vpop.xlane.xlu0 %376 }
 0x137   : > { %960 = vrsqrt.f32 %v418_v14  ;;  %v396_v22 = vmul.f32 0.020833334, %v356_v18  ;;  %v403_v16 = vmul.f32 0.020833334, %v377_v19 }
 0x138   : > { %962 = vrsqrt.f32 %v411_v15 }
 0x139   : > { %v412_v26 = vadd.f32 1e-06, %v396_v22  ;;  %v419_v27 = vadd.f32 1e-06, %v403_v16 }
 0x13a   : > { %v380_v30 = vpop.xlane.xlu1 %379  ;;  %v359_v31 = vpop.xlane.xlu0 %358 }
 0x13b   : > { %964 = vrsqrt.f32 %v412_v26  ;;  %v404_v32 = vmul.f32 0.020833334, %v380_v30  ;;  %v397_v33 = vmul.f32 0.020833334, %v359_v31 }
 0x13c   : > { %v955_v34 = vpop.eup %954  ;;  %966 = vrsqrt.f32 %v419_v27 }
 0x13d   : > { %v420_v20 = vadd.f32 1e-06, %v404_v32  ;;  %v413_v38 = vadd.f32 1e-06, %v397_v33  ;;  %v441_v39 = vmul.f32 %v955_v34, %v1105_v36  ;;  %v1226_v36 = vld [vmem:[%s1390_s2] ss:$0 sm:$0xff] }
 0x13e   : > { %v362_v41 = vpop.xlane.xlu1 %361  ;;  %v383_v42 = vpop.xlane.xlu0 %382 }
 0x13f   : > { %968 = vrsqrt.f32 %v420_v20  ;;  %v398_v43 = vmul.f32 0.020833334, %v362_v41  ;;  %v405_v46 = vmul.f32 0.020833334, %v383_v42  ;;  %v464_v48 = vmul.f32 %v1219_v40, %v441_v39 }
 0x140   : > { %v957_v24 = vpop.eup %956  ;;  %970 = vrsqrt.f32 %v413_v38 }
 0x141   : > { %v959_v49 = vpop.eup %958  ;;  %v414_v50 = vadd.f32 1e-06, %v398_v43  ;;  %v421_v51 = vadd.f32 1e-06, %v405_v46  ;;  %v442_v52 = vmul.f32 %v957_v24, %v1113_v44  ;;  %v487_v61 = vadd.f32 %v1226_v36, %v464_v48 }
 0x142   : > { %v386_v28 = vpop.xlane.xlu1 %385  ;;  %v365_v29 = vpop.xlane.xlu0 %364  ;;  %v449_v53 = vmul.f32 %v959_v49, %v1107_v37 }
 0x143   : > { %972 = vrsqrt.f32 %v414_v50  ;;  %v406_v56 = vmul.f32 0.020833334, %v386_v28  ;;  %v399_v57 = vmul.f32 0.020833334, %v365_v29  ;;  %v465_v58 = vmul.f32 %v1219_v40, %v442_v52 }
 0x144   : > { %v961_v59 = vpop.eup %960  ;;  %974 = vrsqrt.f32 %v421_v51  ;;  %v472_v37 = vmul.f32 %v1219_v40, %v449_v53 }
 0x145   : > { %v963_v62 = vpop.eup %962  ;;  %v422_v44 = vadd.f32 1e-06, %v406_v56  ;;  %v415_v63 = vadd.f32 1e-06, %v399_v57  ;;  %v488_v2 = vadd.f32 %v1226_v36, %v465_v58  ;;  %v450_v3 = vmul.f32 %v961_v59, %v1115_v45 }
 0x146   : > { %v368_v4 = vpop.xlane.xlu1 %367  ;;  %v389_v5 = vpop.xlane.xlu0 %388  ;;  %v443_v6 = vmul.f32 %v963_v62, %v1123_v54  ;;  %v495_v54 = vadd.f32 %v1226_v36, %v472_v37 }
 0x147   : > { %976 = vrsqrt.f32 %v422_v44  ;;  %v400_v7 = vmul.f32 0.020833334, %v368_v4  ;;  %v407_v8 = vmul.f32 0.020833334, %v389_v5  ;;  %v503_v9 = vpack.c.bf16 %v488_v2, %v487_v61 }
 0x148   : > { %v965_v12 = vpop.eup %964  ;;  %978 = vrsqrt.f32 %v415_v63  ;;  %v473_v13 = vmul.f32 %v1219_v40, %v450_v3  ;;  %v466_v14 = vmul.f32 %v1219_v40, %v443_v6 }
 0x149   : > { %v967_v15 = vpop.eup %966  ;;  %v416_v18 = vadd.f32 1e-06, %v400_v7  ;;  %v423_v19 = vadd.f32 1e-06, %v407_v8  ;;  %887 = vmatmul.mubr.msk.bf16.vlgmr.msra.gmra.mxu0 %vm247_vm0, %v503_v9  ;;  %v444_v45 = vmul.f32 %v965_v12, %v1125_v55 }
 0x14a   : > { %v392_v22 = vpop.xlane.xlu1 %391  ;;  %v496_v16 = vadd.f32 %v1226_v36, %v473_v13  ;;  %625 = vmatprep.mubr.bf16.mxu0 %v994_v60  ;;  %v451_v26 = vmul.f32 %v967_v15, %v1134_v0  ;;  %v489_v33 = vadd.f32 %v1226_v36, %v466_v14 }
 0x14b   : > { %980 = vrsqrt.f32 %v416_v18  ;;  %v408_v27 = vmul.f32 0.020833334, %v392_v22  ;;  %v467_v30 = vmul.f32 %v1219_v40, %v444_v45 }
 0x14c   : > { %v969_v31 = vpop.eup %968  ;;  %982 = vrsqrt.f32 %v423_v19  ;;  %v507_v32 = vpack.c.bf16 %v496_v16, %v495_v54  ;;  %v474_v39 = vmul.f32 %v1219_v40, %v451_v26 }
 0x14d   : > { %v971_v34 = vpop.eup %970  ;;  %v424_v55 = vadd.f32 1e-06, %v408_v27  ;;  %v490_v20 = vadd.f32 %v1226_v36, %v467_v30  ;;  %v452_v38 = vmul.f32 %v969_v31, %v1137_v1 }
 0x14e   : > { %891 = vmatmul.mubr.msk.bf16.vlgmr.msra.gmra.mxu1 %vm247_vm0, %v507_v32  ;;  %v445_v0 = vmul.f32 %v971_v34, %v1146_v10  ;;  %v497_v24 = vadd.f32 %v1226_v36, %v474_v39 }
 0x14f   : > { %984 = vrsqrt.f32 %v424_v55  ;;  %v504_v41 = vpack.c.bf16 %v490_v20, %v489_v33  ;;  %665 = vmatprep.mubr.bf16.mxu1 %v994_v60  ;;  %v475_v42 = vmul.f32 %v1219_v40, %v452_v38 }
 0x150   : > { %v973_v43 = vpop.eup %972  ;;  %v468_v49 = vmul.f32 %v1219_v40, %v445_v0 }
 0x151   : > { %v975_v46 = vpop.eup %974  ;;  %888 = vmatmul.mubr.msk.bf16.gmra.mxu0 %vm247_vm0, %v504_v41  ;;  %v498_v1 = vadd.f32 %v1226_v36, %v475_v42  ;;  %v446_v48 = vmul.f32 %v973_v43, %v1149_v11 }
 0x152   : > { %635 = vmatprep.mubr.bf16.mxu0 %v994_v60  ;;  %v453_v10 = vmul.f32 %v975_v46, %v1158_v23  ;;  %v491_v29 = vadd.f32 %v1226_v36, %v468_v49 }
 0x153   : > { %v508_v50 = vpack.c.bf16 %v498_v1, %v497_v24  ;;  %v469_v51 = vmul.f32 %v1219_v40, %v446_v48 }
 0x154   : > { %v977_v52 = vpop.eup %976  ;;  %v476_v57 = vmul.f32 %v1219_v40, %v453_v10 }
 0x155   : > { %v979_v28 = vpop.eup %978  ;;  %v492_v53 = vadd.f32 %v1226_v36, %v469_v51  ;;  %v454_v56 = vmul.f32 %v977_v52, %v1161_v17 }
 0x156   : > { %892 = vmatmul.mubr.msk.bf16.gmra.mxu1 %vm247_vm0, %v508_v50  ;;  %v447_v11 = vmul.f32 %v979_v28, %v1170_v35  ;;  %v499_v62 = vadd.f32 %v1226_v36, %v476_v57 }
 0x157   : > { %v505_v58 = vpack.c.bf16 %v492_v53, %v491_v29  ;;  %675 = vmatprep.mubr.bf16.mxu1 %v994_v60  ;;  %v477_v23 = vmul.f32 %v1219_v40, %v454_v56 }
 0x158   : > { %v981_v59 = vpop.eup %980  ;;  %v470_v63 = vmul.f32 %v1219_v40, %v447_v11 }
 0x159   : > { %v983_v61 = vpop.eup %982  ;;  %889 = vmatmul.mubr.msk.bf16.gmra.mxu0 %vm247_vm0, %v505_v58  ;;  %v500_v44 = vadd.f32 %v1226_v36, %v477_v23  ;;  %v448_v17 = vmul.f32 %v981_v59, %v1173_v21 }
 0x15a   : > { %645 = vmatprep.mubr.bf16.mxu0 %v994_v60  ;;  %v455_v35 = vmul.f32 %v983_v61, %v1182_v47  ;;  %v493_v5 = vadd.f32 %v1226_v36, %v470_v63 }
 0x15b   : > { %v509_v2 = vpack.c.bf16 %v500_v44, %v499_v62  ;;  %v471_v3 = vmul.f32 %v1219_v40, %v448_v17 }
 0x15c   : > { %v985_v4 = vpop.eup %984  ;;  %v478_v7 = vmul.f32 %v1219_v40, %v455_v35 }
 0x15d   : > { %v494_v37 = vadd.f32 %v1226_v36, %v471_v3  ;;  %v456_v6 = vmul.f32 %v985_v4, %v1185_v25  ;;  %v519_v25 = vlaneseq }
 0x15e   : > { %893 = vmatmul.mubr.msk.bf16.gmra.mxu1 %vm247_vm0, %v509_v2  ;;  %v501_v47 = vadd.f32 %v1226_v36, %v478_v7 }
 0x15f   : > { %v506_v21 = vpack.c.bf16 %v494_v37, %v493_v5  ;;  %685 = vmatprep.mubr.bf16.mxu1 %v994_v60  ;;  %v479_v8 = vmul.f32 %v1219_v40, %v456_v6  ;;  %v520_v13 = vshrl.u32 %v519_v25, 7  ;;  %v517_v60 = vld [vmem:[%s1392_s4] sm:$0x3] }
 0x161   : > { %890 = vmatmul.mubr.msk.bf16.gmra.mxu0 %vm247_vm0, %v506_v21  ;;  %v502_v9 = vadd.f32 %v1226_v36, %v479_v8  ;;  %v521_v14 = vsub.s32 0, %v520_v13  ;;  %v525_v15 = vsub.s32 1, %v520_v13 }
 0x163   : > { %v510_v12 = vpack.c.bf16 %v502_v9, %v501_v47  ;;  %v1290_v18 = vrot.slane %v517_v60, %v521_v14  ;;  %v1292_v40 = vrot.slane %v517_v60, %v525_v15 }
 0x166   : > { %894 = vmatmul.mubr.msk.bf16.gmra.mxu1 %vm247_vm0, %v510_v12 }
 0x209   : > { %v617_v19 = vpop.f32.mrf.mxu0 }
 0x20a   : > { %v618_v45 = vadd.f32 %v617_v19, %v1290_v18 }
 0x20b   : > { %v619_v36 = vpop.f32.mrf.mxu0 }
 0x20c   : > { %v620_v22 = vadd.f32 %v619_v36, %v1292_v40 }
 0x20d   : > { %v621_v16 = vpop.f32.mrf.mxu0 }
 0x20e   : > { %v914_v26 = vpack.c.bf16 %v620_v22, %v618_v45  ;;  %v657_v27 = vpop.f32.mrf.mxu1  ;;  %v622_v31 = vadd.f32 %v621_v16, %v1290_v18 }
 0x20f   : > { %v623_v30 = vpop.f32.mrf.mxu0  ;;  %v658_v34 = vadd.f32 %v657_v27, %v1290_v18 }
 0x210   : > { %795 = vst.msk [vmem:[%s1301_s23] sm:$0xff] %vm1303_vm3, %v914_v26  ;;  %v624_v32 = vadd.f32 %v623_v30, %v1292_v40  ;;  %v659_v33 = vpop.f32.mrf.mxu1 }
 0x211   : > { %v660_v55 = vadd.f32 %v659_v33, %v1292_v40  ;;  %v627_v20 = vpop.f32.mrf.mxu0 }
 0x212   : > { %v915_v38 = vpack.c.bf16 %v624_v32, %v622_v31  ;;  %v661_v39 = vpop.f32.mrf.mxu1  ;;  %v628_v42 = vadd.f32 %v627_v20, %v1290_v18 }
 0x213   : > { %v922_v0 = vpack.c.bf16 %v660_v55, %v658_v34  ;;  %v629_v41 = vpop.f32.mrf.mxu0  ;;  %v662_v24 = vadd.f32 %v661_v39, %v1290_v18 }
 0x214   : > { %796 = vst.msk [vmem:[%s1301_s23 + $0x8] sm:$0xff] %vm1303_vm3, %v915_v38  ;;  %v630_v43 = vadd.f32 %v629_v41, %v1292_v40  ;;  %v663_v46 = vpop.f32.mrf.mxu1 }
 0x215   : > { %803 = vst.msk [vmem:[%s1301_s23 + $0x40] sm:$0xff] %vm1303_vm3, %v922_v0  ;;  %v664_v1 = vadd.f32 %v663_v46, %v1292_v40  ;;  %v631_v48 = vpop.f32.mrf.mxu0 }
 0x216   : > { %v916_v49 = vpack.c.bf16 %v630_v43, %v628_v42  ;;  %v667_v10 = vpop.f32.mrf.mxu1  ;;  %v632_v52 = vadd.f32 %v631_v48, %v1290_v18 }
 0x217   : > { %v923_v50 = vpack.c.bf16 %v664_v1, %v662_v24  ;;  %v633_v51 = vpop.f32.mrf.mxu0  ;;  %v668_v53 = vadd.f32 %v667_v10, %v1290_v18 }
 0x218   : > { %797 = vst.msk [vmem:[%s1301_s23 + $0x10] sm:$0xff] %vm1303_vm3, %v916_v49  ;;  %v634_v28 = vadd.f32 %v633_v51, %v1292_v40  ;;  %v669_v29 = vpop.f32.mrf.mxu1 }
 0x219   : > { %804 = vst.msk [vmem:[%s1301_s23 + $0x48] sm:$0xff] %vm1303_vm3, %v923_v50  ;;  %v670_v56 = vadd.f32 %v669_v29, %v1292_v40  ;;  %v637_v57 = vpop.f32.mrf.mxu0 }
 0x21a   : > { %v917_v11 = vpack.c.bf16 %v634_v28, %v632_v52  ;;  %v671_v58 = vpop.f32.mrf.mxu1  ;;  %v638_v61 = vadd.f32 %v637_v57, %v1290_v18 }
 0x21b   : > { %v924_v23 = vpack.c.bf16 %v670_v56, %v668_v53  ;;  %v639_v59 = vpop.f32.mrf.mxu0  ;;  %v672_v17 = vadd.f32 %v671_v58, %v1290_v18 }
 0x21c   : > { %798 = vst.msk [vmem:[%s1301_s23 + $0x18] sm:$0xff] %vm1303_vm3, %v917_v11  ;;  %v640_v62 = vadd.f32 %v639_v59, %v1292_v40  ;;  %v673_v44 = vpop.f32.mrf.mxu1 }
 0x21d   : > { %805 = vst.msk [vmem:[%s1301_s23 + $0x50] sm:$0xff] %vm1303_vm3, %v924_v23  ;;  %v674_v63 = vadd.f32 %v673_v44, %v1292_v40  ;;  %v641_v35 = vpop.f32.mrf.mxu0 }
 0x21e   : > { %v918_v2 = vpack.c.bf16 %v640_v62, %v638_v61  ;;  %v677_v3 = vpop.f32.mrf.mxu1  ;;  %v642_v37 = vadd.f32 %v641_v35, %v1290_v18 }
 0x21f   : > { %v925_v4 = vpack.c.bf16 %v674_v63, %v672_v17  ;;  %v643_v5 = vpop.f32.mrf.mxu0  ;;  %v678_v21 = vadd.f32 %v677_v3, %v1290_v18 }
 0x220   : > { %799 = vst.msk [vmem:[%s1301_s23 + $0x20] sm:$0xff] %vm1303_vm3, %v918_v2  ;;  %v644_v6 = vadd.f32 %v643_v5, %v1292_v40  ;;  %v679_v7 = vpop.f32.mrf.mxu1 }
 0x221   : > { %806 = vst.msk [vmem:[%s1301_s23 + $0x58] sm:$0xff] %vm1303_vm3, %v925_v4  ;;  %v680_v8 = vadd.f32 %v679_v7, %v1292_v40  ;;  %v647_v47 = vpop.f32.mrf.mxu0 }
 0x222   : > { %v919_v9 = vpack.c.bf16 %v644_v6, %v642_v37  ;;  %v681_v12 = vpop.f32.mrf.mxu1  ;;  %v648_v14 = vadd.f32 %v647_v47, %v1290_v18 }
 0x223   : > { %v926_v25 = vpack.c.bf16 %v680_v8, %v678_v21  ;;  %v649_v13 = vpop.f32.mrf.mxu0  ;;  %v682_v19 = vadd.f32 %v681_v12, %v1290_v18 }
 0x224   : > { %800 = vst.msk [vmem:[%s1301_s23 + $0x28] sm:$0xff] %vm1303_vm3, %v919_v9  ;;  %v650_v15 = vadd.f32 %v649_v13, %v1292_v40  ;;  %v683_v60 = vpop.f32.mrf.mxu1 }
 0x225   : > { %807 = vst.msk [vmem:[%s1301_s23 + $0x60] sm:$0xff] %vm1303_vm3, %v926_v25  ;;  %v684_v36 = vadd.f32 %v683_v60, %v1292_v40  ;;  %v651_v45 = vpop.f32.mrf.mxu0 }
 0x226   : > { %v920_v22 = vpack.c.bf16 %v650_v15, %v648_v14  ;;  %v687_v16 = vpop.f32.mrf.mxu1  ;;  %v652_v30 = vadd.f32 %v651_v45, %v1290_v18 }
 0x227   : > { %v927_v26 = vpack.c.bf16 %v684_v36, %v682_v19  ;;  %v653_v27 = vpop.f32.mrf.mxu0  ;;  %v688_v33 = vadd.f32 %v687_v16, %v1290_v18 }
 0x228   : > { %801 = vst.msk [vmem:[%s1301_s23 + $0x30] sm:$0xff] %vm1303_vm3, %v920_v22  ;;  %v654_v31 = vadd.f32 %v653_v27, %v1292_v40  ;;  %v689_v32 = vpop.f32.mrf.mxu1 }
 0x229   : > { %808 = vst.msk [vmem:[%s1301_s23 + $0x68] sm:$0xff] %vm1303_vm3, %v927_v26  ;;  %v690_v34 = vadd.f32 %v689_v32, %v1292_v40 }
 0x22a   : > { %v921_v55 = vpack.c.bf16 %v654_v31, %v652_v30  ;;  %v691_v20 = vpop.f32.mrf.mxu1 }
 0x22b   : > { %v928_v38 = vpack.c.bf16 %v690_v34, %v688_v33  ;;  %v692_v0 = vadd.f32 %v691_v20, %v1290_v18 }
 0x22c   : > { %802 = vst.msk [vmem:[%s1301_s23 + $0x38] sm:$0xff] %vm1303_vm3, %v921_v55  ;;  %v693_v39 = vpop.f32.mrf.mxu1 }
 0x22d   : > { %809 = vst.msk [vmem:[%s1301_s23 + $0x70] sm:$0xff] %vm1303_vm3, %v928_v38  ;;  %v694_v41 = vadd.f32 %v693_v39, %v1292_v40 }
 0x22f   : > { %v929_v42 = vpack.c.bf16 %v694_v41, %v692_v0 }
 0x231   : > { %810 = vst.msk [vmem:[%s1301_s23 + $0x78] sm:$0xff] %vm1303_vm3, %v929_v42 }
 0x232 PF: > { %s15_s18 = sadd.s32 1, %s992_s18  }
 0x233   : > { %p12_p4 = scmp.ge.s32.totalorder %s15_s18, 4  }
 0x235   :  { %14 = sbr.rel (!%p12_p4) target bundleno = 1 (0x1), region = 70 }

// kernel: ast_forward.12
= control target key start
LH: loop header
LB: loop body
LE: loop exit
PB: predicated region body
PF: predicated region fallthrough
CT: control target
= control target key end

     0   :  { %s3152_s15 = smov 0   ;;  %s3154_s16 = smov 0   ;;  %s3971_s0 = inlined_call_operand.vmem [shape: bf16[2,128,144], index: 0, kind: input, shape index: {}]   ;;  %s3972_s1 = inlined_call_operand.vmem [shape: f32[2,128,48], index: 1, kind: input, shape index: {}]   ;;  %s3973_s2 = inlined_call_operand.vmem [shape: bf16[48,48], index: 2, kind: input, shape index: {}]   ;;  %s3974_s3 = inlined_call_operand.vmem [shape: f32[1,48], index: 3, kind: input, shape index: {}]   ;;  %s3975_s4 = inlined_call_operand.vmem [shape: f32[2,128,48], index: 4, kind: output, shape index: {}]  }
   0x1   :  { %s3156_s17 = smov 0  }
   0x2 LB: > { %s26_s18 = sadd.s32 1, %s3113_s16  ;;  %p2359_p0 = scmp.ge.s32.totalorder %s3117_s17, 1  ;;  %s3117_s17 = sphi %s3156_s17, %s14_s17   ;;  %s3113_s16 = sphi %s3154_s16, %s3997_s16   ;;  %s3109_s15 = sphi %s3152_s15, %s3996_s15  }
   0x3   : > { %p28_p1 = scmp.ge.s32.totalorder %s26_s18, 2  ;;  %p193_p2 = scmp.lt.s32.totalorder %s3117_s17, 3 }
   0x5   : > { %s3999_s18 = smov (%p28_p1, %s26_s18), 0  ;;  %p194_p3 = pnand %p2359_p0, %p193_p2 }
   0x7   : > { %197 = sbr.rel (%p194_p3) target bundleno = 2091 (0x82b), region = 36 }
   0xc   : > { %p232_p4 = scmp.lt.s32.totalorder %s3109_s15, 1  ;;  %s3119_s23 = smov 80   ;;  %vm396_vm0 = vcmask 130048   ;;  %v259_v41 = vlaneseq  ;;  %v3122_v43 = vmov -1e+30   ;;  %vm2237_vm2 = vcmask 392192  }
   0xd   : > { %s3120_s24 = smov 32   ;;  %s3121_s25 = smov 64  }
   0xe   : > { %s4001_s15 = smov (!%p232_p4, %s3109_s15), 1  ;;  %v260_v42 = vand.u32 127, %v259_v41  ;;  %s3123_s26 = smov 112  }
   0xf   : > { %s3170_s19 = sshll.u32 %s4001_s15, 7  ;;  %s3124_s27 = smov 16  }
  0x10   : > { %s3176_s22 = scalar_lea.vmem %s3971_s0, %s3170_s19  ;;  %vm261_vm1 = vcmp.lt.s32.totalorder %v260_v42, 12  ;;  %s3125_s28 = smov 48  }
  0x11   : > { %v3179_v0 = vld [vmem:[%s3176_s22 + $0x70] ss:$8 sps:$4 sm:$0xff]   ;;  %v3182_v1 = vld [vmem:[%s3176_s22 + $0x60] ss:$8 sps:$4 sm:$0xff]   ;;  %v3286_v44 = vsel %vm261_vm1, 0.0, %v3122_v43  ;;  %s3126_s5 = smov 96   ;;  %s3855_s12 = scalar_lea.vmem %s3972_s1, %s3170_s19 }
  0x12   : > { %394 = vrot.lane.b32.xlu0 %v3179_v0, %s3119_s23  ;;  %v3186_v2 = vld [vmem:[%s3176_s22 + $0x50] ss:$8 sps:$4 sm:$0xff]   ;;  %v3190_v3 = vld [vmem:[%s3176_s22 + $0x40] ss:$8 sps:$4 sm:$0xff]   ;;  %3978 = vst [vmem:[#allocation2_spill] sm:$0xff] %v3286_v44  ;;  %s3872_s21 = scalar_lea.vmem %s3975_s4, %s3170_s19 }
  0x13   : > { %390 = vrot.lane.b32.xlu1 %v3186_v2, %s3119_s23  ;;  %v3194_v4 = vld [vmem:[%s3176_s22 + $0x30] ss:$8 sps:$4 sm:$0xff]   ;;  %v3197_v5 = vld [vmem:[%s3176_s22 + $0x20] ss:$8 sps:$4 sm:$0xff]  }
  0x14   : > { %v3201_v6 = vld [vmem:[%s3176_s22 + $0x10] ss:$8 sps:$4 sm:$0xff]   ;;  %v3205_v7 = vld [vmem:[%s3176_s22] ss:$8 sps:$4 sm:$0xff]  }
  0x15   : > { %v3211_v8 = vld [vmem:[%s3176_s22] ss:$8 sps:$4 sm:$0xff]   ;;  %v3248_v25 = vld [vmem:[%s3176_s22 + $0x10] ss:$8 sps:$4 sm:$0xff]  }
  0x16   : > { %392 = vrot.lane.b32.xlu0 %v3182_v1, %s3119_s23  ;;  %2586 = vmatprep.mubr.msk.bf16.mxu0 %vm396_vm0, %v3211_v8  ;;  %v3251_v26 = vld [vmem:[%s3176_s22 + $0x20] ss:$8 sps:$4 sm:$0xff]   ;;  %v3258_v27 = vld [vmem:[%s3176_s22 + $0x30] ss:$8 sps:$4 sm:$0xff]  }
  0x17   : > { %388 = vrot.lane.b32.xlu1 %v3190_v3, %s3119_s23  ;;  %v3261_v28 = vld [vmem:[%s3176_s22 + $0x40] ss:$8 sps:$4 sm:$0xff]   ;;  %v3268_v29 = vld [vmem:[%s3176_s22 + $0x50] ss:$8 sps:$4 sm:$0xff]  }
  0x18   : > { %v3271_v30 = vld [vmem:[%s3176_s22 + $0x60] ss:$8 sps:$4 sm:$0xff]   ;;  %v3278_v31 = vld [vmem:[%s3176_s22 + $0x70] ss:$8 sps:$4 sm:$0xff]  }
  0x1a   : > { %386 = vrot.lane.b32.xlu0 %v3194_v4, %s3119_s23 }
  0x1b   : > { %384 = vrot.lane.b32.xlu1 %v3197_v5, %s3119_s23 }
  0x1e   : > { %382 = vrot.lane.b32.xlu0 %v3201_v6, %s3119_s23 }
  0x1f   : > { %380 = vrot.lane.b32.xlu1 %v3205_v7, %s3119_s23 }
  0x22   : > { %676 = vrot.lane.b32.xlu0 %v3179_v0, %s3120_s24 }
  0x23   : > { %674 = vrot.lane.b32.xlu1 %v3182_v1, %s3120_s24 }
  0x26   : > { %672 = vrot.lane.b32.xlu0 %v3186_v2, %s3120_s24 }
  0x27   : > { %666 = vrot.lane.b32.xlu1 %v3197_v5, %s3120_s24 }
  0x2a   : > { %670 = vrot.lane.b32.xlu0 %v3190_v3, %s3120_s24 }
  0x2b   : > { %662 = vrot.lane.b32.xlu1 %v3205_v7, %s3120_s24 }
  0x2e   : > { %668 = vrot.lane.b32.xlu0 %v3194_v4, %s3120_s24 }
  0x2f   : > { %851 = vrot.lane.b32.xlu1 %v3186_v2, %s3121_s25 }
  0x32   : > { %664 = vrot.lane.b32.xlu0 %v3201_v6, %s3120_s24 }
  0x36   : > { %855 = vrot.lane.b32.xlu0 %v3179_v0, %s3121_s25 }
  0x3a   : > { %853 = vrot.lane.b32.xlu0 %v3182_v1, %s3121_s25 }
  0x3e   : > { %849 = vrot.lane.b32.xlu0 %v3190_v3, %s3121_s25 }
  0x84   : > { %v395_v9 = vpop.permute.xlu0 %394 }
  0x85   : > { %2816 = vmatprep.subr.msk.bf16.mxu0 %vm396_vm0, %v395_v9  ;;  %v443_v10 = vsel %vm396_vm0, %v395_v9, 0  ;;  %v391_v13 = vpop.permute.xlu1 %390 }
  0x86   : > { %2571 = vmatpush3.bf16.xpose.msra.mxu0 %v443_v10  ;;  %v437_v14 = vsel %vm396_vm0, %v391_v13, 0 }
  0x88   : > { %v393_v11 = vpop.permute.xlu0 %392 }
  0x89   : > { %2817 = vmatprep.subr.msk.bf16.mxu0 %vm396_vm0, %v393_v11  ;;  %v440_v12 = vsel %vm396_vm0, %v393_v11, 0  ;;  %v389_v15 = vpop.permute.xlu1 %388 }
  0x8a   : > { %v434_v16 = vsel %vm396_vm0, %v389_v15, 0 }
  0x8c   : > { %v387_v17 = vpop.permute.xlu0 %386 }
  0x8d   : > { %v431_v18 = vsel %vm396_vm0, %v387_v17, 0  ;;  %v385_v19 = vpop.permute.xlu1 %384 }
  0x8e   : > { %2573 = vmatpush3.bf16.xpose.msra.mxu0 %v440_v12  ;;  %v428_v20 = vsel %vm396_vm0, %v385_v19, 0 }
  0x8f   : > { %2818 = vmatprep.subr.msk.bf16.mxu0 %vm396_vm0, %v391_v13 }
  0x90   : > { %v383_v21 = vpop.permute.xlu0 %382 }
  0x91   : > { %v425_v22 = vsel %vm396_vm0, %v383_v21, 0  ;;  %v381_v23 = vpop.permute.xlu1 %380 }
  0x92   : > { %v422_v24 = vsel %vm396_vm0, %v381_v23, 0 }
  0x94   : > { %v677_v32 = vpop.permute.xlu0 %676 }
  0x95   : > { %v675_v33 = vpop.permute.xlu1 %674  ;;  %2602 = vmatprep.subr.bf16.mxu1 %v677_v32 }
  0x96   : > { %2575 = vmatpush3.bf16.xpose.msra.mxu0 %v437_v14  ;;  %2603 = vmatpush3.bf16.msra.mxu1 %v677_v32 }
  0x97   : > { %2819 = vmatprep.subr.msk.bf16.mxu0 %vm396_vm0, %v389_v15  ;;  %2604 = vmatprep.subr.bf16.mxu1 %v675_v33 }
  0x98   : > { %v673_v34 = vpop.permute.xlu0 %672 }
  0x99   : > { %v667_v37 = vpop.permute.xlu1 %666 }
  0x9a   : > { %2605 = vmatpush3.bf16.msra.mxu1 %v675_v33 }
  0x9b   : > { %2606 = vmatprep.subr.bf16.mxu1 %v673_v34 }
  0x9c   : > { %v671_v35 = vpop.permute.xlu0 %670 }
  0x9d   : > { %v663_v39 = vpop.permute.xlu1 %662 }
  0x9e   : > { %2577 = vmatpush3.bf16.xpose.msra.mxu0 %v434_v16  ;;  %2607 = vmatpush3.bf16.msra.mxu1 %v673_v34 }
  0x9f   : > { %2820 = vmatprep.subr.msk.bf16.mxu0 %vm396_vm0, %v387_v17  ;;  %2608 = vmatprep.subr.bf16.mxu1 %v671_v35 }
  0xa0   : > { %v669_v36 = vpop.permute.xlu0 %668 }
  0xa2   : > { %2609 = vmatpush3.bf16.msra.mxu1 %v671_v35 }
  0xa3   : > { %2610 = vmatprep.subr.bf16.mxu1 %v669_v36 }
  0xa4   : > { %v665_v38 = vpop.permute.xlu0 %664 }
  0xa6   : > { %2579 = vmatpush3.bf16.xpose.msra.mxu0 %v431_v18  ;;  %2611 = vmatpush3.bf16.msra.mxu1 %v669_v36 }
  0xa7   : > { %2821 = vmatprep.subr.msk.bf16.mxu0 %vm396_vm0, %v385_v19  ;;  %2612 = vmatprep.subr.bf16.mxu1 %v667_v37 }
  0xa8   : > { %v3282_v40 = vpop.permute.xlu0 %855 }
  0xaa   : > { %2613 = vmatpush3.bf16.msra.mxu1 %v667_v37 }
  0xab   : > { %2614 = vmatprep.subr.bf16.mxu1 %v665_v38 }
  0xae   : > { %2581 = vmatpush3.bf16.xpose.msra.mxu0 %v428_v20  ;;  %2615 = vmatpush3.bf16.msra.mxu1 %v665_v38 }
  0xaf   : > { %2822 = vmatprep.subr.msk.bf16.mxu0 %vm396_vm0, %v383_v21  ;;  %2616 = vmatprep.subr.bf16.mxu1 %v663_v39 }
  0xb2   : > { %2617 = vmatpush3.bf16.msra.mxu1 %v663_v39 }
  0xb3   : > { %2824 = vmatprep.subr.msk.bf16.mxu1 %vm396_vm0, %v3282_v40 }
  0xb6   : > { %2583 = vmatpush3.bf16.xpose.msra.mxu0 %v425_v22  ;;  %v3368_v22 = vpop.permute.xlu0 %853 }
  0xb7   : > { %2823 = vmatprep.subr.msk.bf16.mxu0 %vm396_vm0, %v381_v23 }
  0xba   : > { %v3372_v23 = vpop.permute.xlu0 %849 }
  0xbe   : > { %2585 = vmatpush3.bf16.xpose.msra.mxu0 %v422_v24 }
  0xc5   : > { %2587 = vmatmul.mubr.msk.bf16.vlgmr.msra.gmra.mxu0 %vm396_vm0, %v3248_v25 }
  0xc6   : > { %2590 = vmatprep.mubr.msk.bf16.mxu0 %vm396_vm0, %v3251_v26 }
  0xcd   : > { %2591 = vmatmul.mubr.msk.bf16.gmra.mxu0 %vm396_vm0, %v3258_v27 }
  0xce   : > { %2594 = vmatprep.mubr.msk.bf16.mxu0 %vm396_vm0, %v3261_v28 }
  0xd5   : > { %2595 = vmatmul.mubr.msk.bf16.gmra.mxu0 %vm396_vm0, %v3268_v29 }
  0xd6   : > { %2598 = vmatprep.mubr.msk.bf16.mxu0 %vm396_vm0, %v3271_v30 }
  0xdd   : > { %2599 = vmatmul.mubr.msk.bf16.gmra.mxu0 %vm396_vm0, %v3278_v31 }
 0x185   : > { %v2588_v45 = vpop.f32.mrf.mxu0 }
 0x186   : > { %v3289_v46 = vadd.f32 %v2588_v45, %v3286_v44 }
 0x187   : > { %v479_v47 = vpop.f32.mrf.mxu0 }
 0x188   : > { %v3292_v48 = vadd.f32 %v479_v47, %v3286_v44  ;;  %546 = vmax.xlane.f32.xlu1 %v3289_v46 }
 0x189   : > { %v2589_v49 = vpop.f32.mrf.mxu0 }
 0x18a   : > { %v3296_v50 = vadd.f32 %v2589_v49, %v3286_v44  ;;  %542 = vmax.xlane.f32.xlu0 %v3292_v48 }
 0x18b   : > { %v482_v51 = vpop.f32.mrf.mxu0 }
 0x18c   : > { %548 = vmax.xlane.f32.xlu1 %v3296_v50  ;;  %v3301_v53 = vadd.f32 %v482_v51, %v3286_v44 }
 0x18d   : > { %v2592_v52 = vpop.f32.mrf.mxu0 }
 0x18e   : > { %v3304_v54 = vadd.f32 %v2592_v52, %v3286_v44 }
 0x18f   : > { %v495_v55 = vpop.f32.mrf.mxu0 }
 0x190   : > { %544 = vmax.xlane.f32.xlu1 %v3301_v53  ;;  %554 = vmax.xlane.f32.xlu0 %v3304_v54  ;;  %v3309_v57 = vadd.f32 %v495_v55, %v3286_v44 }
 0x191   : > { %v2593_v56 = vpop.f32.mrf.mxu0 }
 0x192   : > { %v3316_v60 = vadd.f32 %v2593_v56, %v3286_v44 }
 0x193   : > { %v498_v58 = vpop.f32.mrf.mxu0 }
 0x194   : > { %v3312_v59 = vadd.f32 %v498_v58, %v3286_v44  ;;  %550 = vmax.xlane.f32.xlu1 %v3309_v57 }
 0x195   : > { %v2596_v61 = vpop.f32.mrf.mxu0 }
 0x196   : > { %552 = vmax.xlane.f32.xlu0 %v3312_v59  ;;  %v3320_v62 = vadd.f32 %v2596_v61, %v3286_v44 }
 0x197   : > { %v511_v63 = vpop.f32.mrf.mxu0 }
 0x198   : > { %556 = vmax.xlane.f32.xlu1 %v3316_v60  ;;  %v3325_v9 = vadd.f32 %v511_v63, %v3286_v44 }
 0x199   : > { %v2597_v10 = vpop.f32.mrf.mxu0 }
 0x19a   : > { %v3329_v11 = vadd.f32 %v2597_v10, %v3286_v44 }
 0x19b   : > { %v514_v12 = vpop.f32.mrf.mxu0 }
 0x19c   : > { %562 = vmax.xlane.f32.xlu1 %v3320_v62  ;;  %v3333_v13 = vadd.f32 %v514_v12, %v3286_v44 }
 0x19d   : > { %v2600_v14 = vpop.f32.mrf.mxu0 }
 0x19e   : > { %v3341_v15 = vadd.f32 %v2600_v14, %v3286_v44 }
 0x19f   : > { %v527_v16 = vpop.f32.mrf.mxu0 }
 0x1a0   : > { %558 = vmax.xlane.f32.xlu1 %v3325_v9  ;;  %v3345_v17 = vadd.f32 %v527_v16, %v3286_v44 }
 0x1a1   : > { %v2601_v18 = vpop.f32.mrf.mxu0 }
 0x1a2   : > { %v3349_v19 = vadd.f32 %v2601_v18, %v3286_v44 }
 0x1a3   : > { %v530_v20 = vpop.f32.mrf.mxu0 }
 0x1a4   : > { %564 = vmax.xlane.f32.xlu1 %v3329_v11  ;;  %v3353_v21 = vadd.f32 %v530_v20, %v3286_v44 }
 0x1a8   : > { %560 = vmax.xlane.f32.xlu1 %v3333_v13 }
 0x1ac   : > { %845 = vrot.lane.b32.xlu0 %v3197_v5, %s3121_s25 }
 0x1b9   : > { %847 = vrot.lane.b32.xlu1 %v3194_v4, %s3121_s25 }
 0x1cb   : > { %570 = vmax.xlane.f32.xlu0 %v3341_v15 }
 0x1cf   : > { %566 = vmax.xlane.f32.xlu0 %v3345_v17 }
 0x1d3   : > { %572 = vmax.xlane.f32.xlu0 %v3349_v19 }
 0x1dd   : > { %568 = vmax.xlane.f32.xlu1 %v3353_v21 }
 0x1e9   : > { %843 = vrot.lane.b32.xlu0 %v3201_v6, %s3121_s25 }
 0x1ed   : > { %825 = vrot.lane.b32.xlu0 %v3211_v8, %s3123_s26  ;;  %v3370_v8 = vpop.permute.xlu1 %851 }
 0x1ee   : > { %841 = vrot.lane.b32.xlu1 %v3205_v7, %s3121_s25 }
 0x1f1   : > { %829 = vrot.lane.b32.xlu0 %v3251_v26, %s3123_s26 }
 0x1f2   : > { %827 = vrot.lane.b32.xlu1 %v3248_v25, %s3123_s26 }
 0x1f5   : > { %833 = vrot.lane.b32.xlu0 %v3261_v28, %s3123_s26 }
 0x1f6   : > { %831 = vrot.lane.b32.xlu1 %v3258_v27, %s3123_s26 }
 0x1f9   : > { %837 = vrot.lane.b32.xlu0 %v3271_v30, %s3123_s26 }
 0x1fa   : > { %835 = vrot.lane.b32.xlu1 %v3268_v29, %s3123_s26 }
 0x1fd   : > { %1134 = vrot.lane.b32.xlu0 %v3182_v1, %s3124_s27 }
 0x1fe   : > { %839 = vrot.lane.b32.xlu1 %v3278_v31, %s3123_s26 }
 0x201   : > { %1128 = vrot.lane.b32.xlu0 %v3194_v4, %s3124_s27 }
 0x202   : > { %1136 = vrot.lane.b32.xlu1 %v3179_v0, %s3124_s27 }
 0x206   : > { %1132 = vrot.lane.b32.xlu1 %v3186_v2, %s3124_s27 }
 0x20a   : > { %1130 = vrot.lane.b32.xlu1 %v3190_v3, %s3124_s27 }
 0x20e   : > { %1126 = vrot.lane.b32.xlu1 %v3197_v5, %s3124_s27 }
 0x211   : > { %v547_v24 = vpop.xlane.xlu1 %546 }
 0x212   : > { %v576_v36 = vsub.f32 %v3289_v46, %v547_v24  ;;  %v903_v24 = vsel %vm396_vm0, %v3282_v40, 0 }
 0x213   : > { %v543_v32 = vpop.xlane.xlu0 %542 }
 0x214   : > { %v574_v33 = vsub.f32 %v3292_v48, %v543_v32  ;;  %v594_v43 = vmul.f32 1.442695, %v576_v36 }
 0x215   : > { %v549_v34 = vpop.xlane.xlu1 %548 }
 0x216   : > { %v577_v35 = vsub.f32 %v3296_v50, %v549_v34  ;;  %v590_v37 = vmul.f32 1.442695, %v574_v33 }
 0x218   : > { %v596_v38 = vmul.f32 1.442695, %v577_v35  ;;  %2899 = vpow2.f32 %v590_v37 }
 0x219   : > { %v545_v39 = vpop.xlane.xlu1 %544  ;;  %v555_v42 = vpop.xlane.xlu0 %554 }
 0x21a   : > { %v575_v41 = vsub.f32 %v3301_v53, %v545_v39  ;;  %2901 = vpow2.f32 %v596_v38  ;;  %v580_v47 = vsub.f32 %v3304_v54, %v555_v42 }
 0x21c   : > { %v592_v45 = vmul.f32 1.442695, %v575_v41  ;;  %v602_v52 = vmul.f32 1.442695, %v580_v47  ;;  %v900_v41 = vsel %vm396_vm0, %v3368_v22, 0 }
 0x21d   : > { %v551_v49 = vpop.xlane.xlu1 %550 }
 0x21e   : > { %2903 = vpow2.f32 %v592_v45  ;;  %v578_v48 = vsub.f32 %v3309_v57, %v551_v49 }
 0x21f   : > { %2905 = vpow2.f32 %v594_v43  ;;  %v553_v50 = vpop.xlane.xlu0 %552 }
 0x220   : > { %v598_v51 = vmul.f32 1.442695, %v578_v48  ;;  %v579_v46 = vsub.f32 %v3312_v59, %v553_v50 }
 0x221   : > { %v557_v55 = vpop.xlane.xlu1 %556 }
 0x222   : > { %v600_v56 = vmul.f32 1.442695, %v579_v46  ;;  %v581_v53 = vsub.f32 %v3316_v60, %v557_v55  ;;  %2907 = vpow2.f32 %v598_v51 }
 0x223   : > { %v846_v51 = vpop.permute.xlu0 %845 }
 0x224   : > { %2909 = vpow2.f32 %v600_v56  ;;  %v604_v58 = vmul.f32 1.442695, %v581_v53 }
 0x225   : > { %2911 = vpow2.f32 %v602_v52  ;;  %v563_v61 = vpop.xlane.xlu1 %562  ;;  %v3382_v54 = vpop.eup %2899  ;;  %v888_v52 = vsel %vm396_vm0, %v846_v51, 0 }
 0x226   : > { %2913 = vpow2.f32 %v604_v58  ;;  %v584_v20 = vsub.f32 %v3320_v62, %v563_v61 }
 0x227   : > { %v3384_v57 = vpop.eup %2901 }
 0x228   : > { %v610_v40 = vmul.f32 1.442695, %v584_v20 }
 0x229   : > { %v559_v63 = vpop.xlane.xlu1 %558 }
 0x22a   : > { %v582_v59 = vsub.f32 %v3325_v9, %v559_v63 }
 0x22b   : > { %v3386_v10 = vpop.eup %2903 }
 0x22c   : > { %v3388_v12 = vpop.eup %2905  ;;  %v654_v60 = vpack.c.bf16 %v3386_v10, %v3382_v54  ;;  %v606_v33 = vmul.f32 1.442695, %v582_v59 }
 0x22d   : > { %v565_v14 = vpop.xlane.xlu1 %564  ;;  %v655_v16 = vpack.c.bf16 %v3384_v57, %v3388_v12 }
 0x22e   : > { %v585_v18 = vsub.f32 %v3329_v11, %v565_v14  ;;  %2618 = vmatprep.mubr.bf16.mxu1 %v654_v60  ;;  %2915 = vpow2.f32 %v606_v33 }
 0x22f   : > { %2619 = vmatmul.mubr.bf16.vlgmr.msra.gmra.mxu1 %v655_v16  ;;  %v3399_v32 = vpop.eup %2907 }
 0x230   : > { %2635 = vmatpush3.bf16.xpose.msra.mxu1 %v903_v24  ;;  %v612_v34 = vmul.f32 1.442695, %v585_v18 }
 0x231   : > { %v3401_v9 = vpop.eup %2909  ;;  %2825 = vmatprep.subr.msk.bf16.mxu1 %vm396_vm0, %v3368_v22  ;;  %v561_v35 = vpop.xlane.xlu1 %560 }
 0x232   : > { %v3405_v36 = vpop.eup %2911  ;;  %v583_v11 = vsub.f32 %v3333_v13, %v561_v35  ;;  %v656_v62 = vpack.c.bf16 %v3401_v9, %v3399_v32  ;;  %2917 = vpow2.f32 %v612_v34  ;;  %v897_v13 = vsel %vm396_vm0, %v3370_v8, 0 }
 0x233   : > { %v3410_v37 = vpop.eup %2913 }
 0x234   : > { %v608_v38 = vmul.f32 1.442695, %v583_v11  ;;  %2622 = vmatprep.mubr.bf16.mxu1 %v656_v62  ;;  %v657_v39 = vpack.c.bf16 %v3410_v37, %v3405_v36 }
 0x235   : > { %v848_v48 = vpop.permute.xlu1 %847 }
 0x236   : > { %2919 = vpow2.f32 %v608_v38  ;;  %v891_v50 = vsel %vm396_vm0, %v848_v48, 0 }
 0x237   : > { %2921 = vpow2.f32 %v610_v40  ;;  %2623 = vmatmul.mubr.bf16.gmra.mxu1 %v657_v39 }
 0x238   : > { %2637 = vmatpush3.bf16.xpose.msra.mxu1 %v900_v41 }
 0x239   : > { %2826 = vmatprep.subr.msk.bf16.mxu1 %vm396_vm0, %v3370_v8  ;;  %v894_v8 = vsel %vm396_vm0, %v3372_v23, 0 }
 0x23b   : > { %v3420_v42 = vpop.eup %2915 }
 0x23f   : > { %v3424_v43 = vpop.eup %2917 }
 0x240   : > { %2639 = vmatpush3.bf16.xpose.msra.mxu1 %v897_v13 }
 0x241   : > { %2827 = vmatprep.subr.msk.bf16.mxu1 %vm396_vm0, %v3372_v23 }
 0x243   : > { %v3426_v45 = vpop.eup %2919 }
 0x244   : > { %v3428_v47 = vpop.eup %2921  ;;  %v658_v22 = vpack.c.bf16 %v3426_v45, %v3420_v42 }
 0x245   : > { %v659_v49 = vpack.c.bf16 %v3424_v43, %v3428_v47 }
 0x246   : > { %2626 = vmatprep.mubr.bf16.mxu1 %v658_v22 }
 0x247   : > { %2627 = vmatmul.mubr.bf16.gmra.mxu1 %v659_v49 }
 0x248   : > { %2641 = vmatpush3.bf16.xpose.msra.mxu1 %v894_v8 }
 0x249   : > { %2828 = vmatprep.subr.msk.bf16.mxu1 %vm396_vm0, %v848_v48 }
 0x250   : > { %2643 = vmatpush3.bf16.xpose.msra.mxu1 %v891_v50 }
 0x251   : > { %2829 = vmatprep.subr.msk.bf16.mxu1 %vm396_vm0, %v846_v51 }
 0x254   : > { %v571_v46 = vpop.xlane.xlu0 %570 }
 0x255   : > { %v588_v63 = vsub.f32 %v3341_v15, %v571_v46 }
 0x257   : > { %v618_v18 = vmul.f32 1.442695, %v588_v63 }
 0x258   : > { %2645 = vmatpush3.bf16.xpose.msra.mxu1 %v888_v52  ;;  %v567_v55 = vpop.xlane.xlu0 %566 }
 0x259   : > { %v586_v58 = vsub.f32 %v3345_v17, %v567_v55 }
 0x25b   : > { %v614_v59 = vmul.f32 1.442695, %v586_v58 }
 0x25c   : > { %v573_v56 = vpop.xlane.xlu0 %572 }
 0x25d   : > { %v589_v61 = vsub.f32 %v3349_v19, %v573_v56  ;;  %2923 = vpow2.f32 %v614_v59 }
 0x25f   : > { %v620_v60 = vmul.f32 1.442695, %v589_v61 }
 0x260   : > { %v844_v53 = vpop.permute.xlu0 %843 }
 0x261   : > { %2830 = vmatprep.subr.msk.bf16.mxu1 %vm396_vm0, %v844_v53  ;;  %v885_v23 = vsel %vm396_vm0, %v844_v53, 0  ;;  %2925 = vpow2.f32 %v620_v60 }
 0x262   : > { %2647 = vmatpush3.bf16.xpose.msra.mxu1 %v885_v23 }
 0x264   : > { %v826_v11 = vpop.permute.xlu0 %825 }
 0x266   : > { %v569_v14 = vpop.xlane.xlu1 %568 }
 0x267   : > { %v587_v16 = vsub.f32 %v3353_v21, %v569_v14 }
 0x268   : > { %v830_v40 = vpop.permute.xlu0 %829 }
 0x269   : > { %v616_v20 = vmul.f32 1.442695, %v587_v16 }
 0x26a   : > { %v842_v24 = vpop.permute.xlu1 %841  ;;  %v3448_v19 = vpop.eup %2923 }
 0x26b   : > { %2927 = vpow2.f32 %v616_v20  ;;  %2831 = vmatprep.subr.msk.bf16.mxu1 %vm396_vm0, %v842_v24  ;;  %v882_v17 = vsel %vm396_vm0, %v842_v24, 0 }
 0x26c   : > { %2929 = vpow2.f32 %v618_v18  ;;  %2649 = vmatpush3.bf16.xpose.msra.mxu1 %v882_v17  ;;  %v834_v39 = vpop.permute.xlu0 %833 }
 0x26e   : > { %v3450_v15 = vpop.eup %2925  ;;  %v828_v62 = vpop.permute.xlu1 %827 }
 0x270   : > { %v838_v13 = vpop.permute.xlu0 %837 }
 0x272   : > { %v832_v38 = vpop.permute.xlu1 %831 }
 0x274   : > { %v1135_v8 = vpop.permute.xlu0 %1134 }
 0x276   : > { %v836_v41 = vpop.permute.xlu1 %835 }
 0x278   : > { %v3452_v33 = vpop.eup %2927  ;;  %v1129_v52 = vpop.permute.xlu0 %1128 }
 0x279   : > { %v3454_v34 = vpop.eup %2929  ;;  %v660_v21 = vpack.c.bf16 %v3452_v33, %v3448_v19 }
 0x27a   : > { %v661_v35 = vpack.c.bf16 %v3450_v15, %v3454_v34  ;;  %v840_v22 = vpop.permute.xlu1 %839 }
 0x27b   : > { %2630 = vmatprep.mubr.bf16.mxu1 %v660_v21 }
 0x27c   : > { %2631 = vmatmul.mubr.bf16.gmra.mxu1 %v661_v35 }
 0x27d   : > { %2650 = vmatprep.mubr.msk.bf16.mxu1 %vm396_vm0, %v826_v11 }
 0x27e   : > { %v1137_v49 = vpop.permute.xlu1 %1136 }
 0x27f   : > { %2666 = vmatprep.subr.bf16.mxu0 %v1137_v49 }
 0x280   : > { %2667 = vmatpush3.bf16.msra.mxu0 %v1137_v49 }
 0x281   : > { %2668 = vmatprep.subr.bf16.mxu0 %v1135_v8 }
 0x282   : > { %v1133_v50 = vpop.permute.xlu1 %1132 }
 0x284   : > { %2651 = vmatmul.mubr.msk.bf16.vlgmr.msra.gmra.mxu1 %vm396_vm0, %v828_v62  ;;  %2669 = vmatpush3.bf16.msra.mxu0 %v1135_v8 }
 0x285   : > { %2654 = vmatprep.mubr.msk.bf16.mxu1 %vm396_vm0, %v830_v40  ;;  %2670 = vmatprep.subr.bf16.mxu0 %v1133_v50 }
 0x286   : > { %v1131_v3 = vpop.permute.xlu1 %1130 }
 0x288   : > { %2671 = vmatpush3.bf16.msra.mxu0 %v1133_v50 }
 0x289   : > { %2672 = vmatprep.subr.bf16.mxu0 %v1131_v3 }
 0x28a   : > { %v1127_v56 = vpop.permute.xlu1 %1126 }
 0x28c   : > { %2655 = vmatmul.mubr.msk.bf16.gmra.mxu1 %vm396_vm0, %v832_v38  ;;  %2673 = vmatpush3.bf16.msra.mxu0 %v1131_v3 }
 0x28d   : > { %2658 = vmatprep.mubr.msk.bf16.mxu1 %vm396_vm0, %v834_v39  ;;  %2674 = vmatprep.subr.bf16.mxu0 %v1129_v52 }
 0x290   : > { %2675 = vmatpush3.bf16.msra.mxu0 %v1129_v52 }
 0x291   : > { %2676 = vmatprep.subr.bf16.mxu0 %v1127_v56 }
 0x294   : > { %2659 = vmatmul.mubr.msk.bf16.gmra.mxu1 %vm396_vm0, %v836_v41  ;;  %2677 = vmatpush3.bf16.msra.mxu0 %v1127_v56 }
 0x295   : > { %2662 = vmatprep.mubr.msk.bf16.mxu1 %vm396_vm0, %v838_v13 }
 0x29c   : > { %2663 = vmatmul.mubr.msk.bf16.gmra.mxu1 %vm396_vm0, %v840_v22 }
 0x2ef   : > { %v3480_v48 = vpop.f32.mrf.mxu1 }
 0x2f1   : > { %v3482_v51 = vpop.f32.mrf.mxu1 }
 0x2f3   : > { %v3484_v46 = vpop.f32.mrf.mxu1 }
 0x2f5   : > { %v3486_v55 = vpop.f32.mrf.mxu1 }
 0x2f7   : > { %v3488_v53 = vpop.f32.mrf.mxu1 }
 0x2f9   : > { %v3490_v58 = vpop.f32.mrf.mxu1 }
 0x2fb   : > { %v3492_v23 = vpop.f32.mrf.mxu1 }
 0x2fd   : > { %v3494_v61 = vpop.f32.mrf.mxu1 }
 0x307   : > { %v3496_v63 = vpop.f32.mrf.mxu1 }
 0x308   : > { %3979 = vst [vmem:[#allocation3_spill] sm:$0xff] %v3496_v63 }
 0x309   : > { %v3498_v59 = vpop.f32.mrf.mxu1 }
 0x30a   : > { %3980 = vst [vmem:[#allocation4_spill] sm:$0xff] %v3498_v59 }
 0x30b   : > { %v3500_v60 = vpop.f32.mrf.mxu1 }
 0x30c   : > { %3981 = vst [vmem:[#allocation5_spill] sm:$0xff] %v3500_v60 }
 0x30d   : > { %v3502_v14 = vpop.f32.mrf.mxu1 }
 0x30e   : > { %3982 = vst [vmem:[#allocation6_spill] sm:$0xff] %v3502_v14 }
 0x33c   : > { %v3504_v16 = vpop.f32.mrf.mxu1 }
 0x33d   : > { %3983 = vst [vmem:[#allocation7_spill] sm:$0xff] %v3504_v16 }
 0x33e   : > { %v3506_v18 = vpop.f32.mrf.mxu1 }
 0x33f   : > { %3984 = vst [vmem:[#allocation8_spill] sm:$0xff] %v3506_v18 }
 0x340   : > { %v3508_v20 = vpop.f32.mrf.mxu1 }
 0x341   : > { %3985 = vst [vmem:[#allocation9_spill] sm:$0xff] %v3508_v20 }
 0x342   : > { %v3510_v24 = vpop.f32.mrf.mxu1 }
 0x343   : > { %3986 = vst [vmem:[#allocation10_spill] sm:$0xff] %v3510_v24 }
 0x344   : > { %v2652_v17 = vpop.f32.mrf.mxu1 }
 0x345   : > { %v948_v21 = vadd.f32 %v2652_v17, %v3286_v44 }
 0x346   : > { %v939_v35 = vpop.f32.mrf.mxu1 }
 0x347   : > { %1006 = vmax.xlane.f32.xlu0 %v948_v21  ;;  %v940_v62 = vadd.f32 %v939_v35, %v3286_v44 }
 0x348   : > { %v2653_v11 = vpop.f32.mrf.mxu1 }
 0x349   : > { %v951_v39 = vadd.f32 %v2653_v11, %v3286_v44 }
 0x34a   : > { %v942_v40 = vpop.f32.mrf.mxu1 }
 0x34b   : > { %v943_v38 = vadd.f32 %v942_v40, %v3286_v44  ;;  %1002 = vmax.xlane.f32.xlu0 %v940_v62 }
 0x34c   : > { %v2656_v41 = vpop.f32.mrf.mxu1 }
 0x34d   : > { %1004 = vmax.xlane.f32.xlu1 %v943_v38 }
 0x34e   : > { %v955_v13 = vpop.f32.mrf.mxu1 }
 0x34f   : > { %1008 = vmax.xlane.f32.xlu0 %v951_v39  ;;  %v3524_v17 = vadd.f32 %v955_v13, %v3286_v44 }
 0x350   : > { %v2657_v22 = vpop.f32.mrf.mxu1 }
 0x351   : > { %v3540_v13 = vadd.f32 %v2657_v22, %v3286_v44 }
 0x352   : > { %v958_v49 = vpop.f32.mrf.mxu1 }
 0x353   : > { %v3521_v52 = vadd.f32 %v958_v49, %v3286_v44 }
 0x354   : > { %v2660_v8 = vpop.f32.mrf.mxu1 }
 0x355   : > { %v3535_v11 = vadd.f32 %v2660_v8, %v3286_v44 }
 0x356   : > { %v971_v50 = vpop.f32.mrf.mxu1 }
 0x358   : > { %v2661_v3 = vpop.f32.mrf.mxu1 }
 0x359   : > { %v3556_v22 = vadd.f32 %v2661_v3, %v3286_v44 }
 0x35a   : > { %v974_v56 = vpop.f32.mrf.mxu1 }
 0x35c   : > { %v2664_v35 = vpop.f32.mrf.mxu1 }
 0x35d   : > { %v3551_v8 = vadd.f32 %v2664_v35, %v3286_v44 }
 0x35e   : > { %1122 = vrot.lane.b32.xlu1 %v3205_v7, %s3124_s27  ;;  %v3528_v7 = vadd.f32 %v971_v50, %v3286_v44  ;;  %v987_v40 = vpop.f32.mrf.mxu1 }
 0x35f   : > { %v3544_v49 = vadd.f32 %v987_v40, %v3286_v44 }
 0x360   : > { %v2665_v50 = vpop.f32.mrf.mxu1 }
 0x362   : > { %v990_v40 = vpop.f32.mrf.mxu1 }
 0x363   : > { %v3561_v20 = vadd.f32 %v990_v40, %v3286_v44 }
 0x365   : > { %1124 = vrot.lane.b32.xlu0 %v3201_v6, %s3124_s27  ;;  %v3532_v6 = vadd.f32 %v2656_v41, %v3286_v44  ;;  %v3548_v41 = vadd.f32 %v974_v56, %v3286_v44  ;;  %v3565_v56 = vadd.f32 %v2665_v50, %v3286_v44 }
 0x382   : > { %1012 = vmax.xlane.f32.xlu1 %v3521_v52 }
 0x384   : > { %1010 = vmax.xlane.f32.xlu0 %v3524_v17 }
 0x386   : > { %1018 = vmax.xlane.f32.xlu1 %v3528_v7 }
 0x388   : > { %1014 = vmax.xlane.f32.xlu0 %v3532_v6 }
 0x38a   : > { %1022 = vmax.xlane.f32.xlu1 %v3535_v11 }
 0x38c   : > { %1016 = vmax.xlane.f32.xlu0 %v3540_v13 }
 0x38e   : > { %1026 = vmax.xlane.f32.xlu1 %v3544_v49 }
 0x390   : > { %1020 = vmax.xlane.f32.xlu0 %v3548_v41 }
 0x392   : > { %1030 = vmax.xlane.f32.xlu1 %v3551_v8 }
 0x394   : > { %1024 = vmax.xlane.f32.xlu0 %v3556_v22 }
 0x398   : > { %1028 = vmax.xlane.f32.xlu0 %v3561_v20 }
 0x39c   : > { %1032 = vmax.xlane.f32.xlu0 %v3565_v56 }
 0x3a3   : > { %1585 = vrot.lane.b32.xlu1 %v3179_v0, %s3125_s28 }
 0x3a7   : > { %1581 = vrot.lane.b32.xlu1 %v3186_v2, %s3125_s28 }
 0x3b2   : > { %1583 = vrot.lane.b32.xlu0 %v3182_v1, %s3125_s28 }
 0x3d0   : > { %v1007_v3 = vpop.xlane.xlu0 %1006 }
 0x3d1   : > { %v1036_v35 = vsub.f32 %v948_v21, %v1007_v3 }
 0x3d3   : > { %v1054_v40 = vmul.f32 1.442695, %v1036_v35 }
 0x3d4   : > { %v1003_v16 = vpop.xlane.xlu0 %1002 }
 0x3d5   : > { %2931 = vpow2.f32 %v1054_v40  ;;  %v1034_v24 = vsub.f32 %v940_v62, %v1003_v16 }
 0x3d6   : > { %v1005_v50 = vpop.xlane.xlu1 %1004 }
 0x3d7   : > { %v1050_v44 = vmul.f32 1.442695, %v1034_v24  ;;  %v1035_v18 = vsub.f32 %v943_v38, %v1005_v50 }
 0x3d8   : > { %v1009_v60 = vpop.xlane.xlu0 %1008 }
 0x3d9   : > { %2933 = vpow2.f32 %v1050_v44  ;;  %v1052_v63 = vmul.f32 1.442695, %v1035_v18  ;;  %v1037_v14 = vsub.f32 %v951_v39, %v1009_v60 }
 0x3da   : > { %v1123_v2 = vpop.permute.xlu1 %1122 }
 0x3db   : > { %2935 = vpow2.f32 %v1052_v63  ;;  %v1056_v0 = vmul.f32 1.442695, %v1037_v14  ;;  %v2888_v63 = vld [vmem:[%s3973_s2 + $0x8] sm:$0xff]  }
 0x3dc   : > { %v1125_v59 = vpop.permute.xlu0 %1124 }
 0x3dd   : > { %2937 = vpow2.f32 %v1056_v0  ;;  %2678 = vmatprep.subr.bf16.mxu0 %v1125_v59 }
 0x3de   : > { %2679 = vmatpush3.bf16.msra.mxu0 %v1125_v59 }
 0x3df   : > { %2680 = vmatprep.subr.bf16.mxu0 %v1123_v2 }
 0x3e2   : > { %v2932_v1 = vpop.eup %2931  ;;  %2681 = vmatpush3.bf16.msra.mxu0 %v1123_v2 }
 0x3e3   : > { %1086 = vadd.xlane.f32.xlu1 %v2932_v1  ;;  %2698 = vmatprep.subr.bf16.mxu0 %v2888_v63 }
 0x3e6   : > { %v2934_v21 = vpop.eup %2933 }
 0x3e7   : > { %1082 = vadd.xlane.f32.xlu1 %v2934_v21 }
 0x3e8   : > { %v2936_v16 = vpop.eup %2935 }
 0x3e9   : > { %v1114_v24 = vpack.c.bf16 %v2936_v16, %v2934_v21 }
 0x3ea   : > { %v2938_v62 = vpop.eup %2937 }
 0x3eb   : > { %2682 = vmatprep.mubr.bf16.mxu0 %v1114_v24  ;;  %1088 = vadd.xlane.f32.xlu0 %v2938_v62  ;;  %v1115_v44 = vpack.c.bf16 %v2938_v62, %v2932_v1 }
 0x3ed   : > { %2683 = vmatmul.mubr.bf16.vlgmr.msra.gmra.mxu0 %v1115_v44 }
 0x3ee   : > { %2699 = vmatpush3.bf16.msra.mxu0 %v2888_v63 }
 0x3ef   : > { %1084 = vadd.xlane.f32.xlu0 %v2936_v16 }
 0x405   : > { %1577 = vrot.lane.b32.xlu0 %v3194_v4, %s3125_s28 }
 0x409   : > { %1575 = vrot.lane.b32.xlu0 %v3197_v5, %s3125_s28 }
 0x40b   : > { %v1013_v59 = vpop.xlane.xlu1 %1012 }
 0x40c   : > { %v1039_v60 = vsub.f32 %v3521_v52, %v1013_v59 }
 0x40d   : > { %v1011_v14 = vpop.xlane.xlu0 %1010 }
 0x40e   : > { %v1060_v18 = vmul.f32 1.442695, %v1039_v60  ;;  %v1038_v38 = vsub.f32 %v3524_v17, %v1011_v14 }
 0x40f   : > { %v1019_v39 = vpop.xlane.xlu1 %1018 }
 0x410   : > { %v1058_v3 = vmul.f32 1.442695, %v1038_v38  ;;  %2939 = vpow2.f32 %v1060_v18  ;;  %v1042_v4 = vsub.f32 %v3528_v7, %v1019_v39 }
 0x411   : > { %v1015_v35 = vpop.xlane.xlu0 %1014 }
 0x412   : > { %2941 = vpow2.f32 %v1058_v3  ;;  %v1040_v40 = vsub.f32 %v3532_v6, %v1015_v35  ;;  %v1066_v21 = vmul.f32 1.442695, %v1042_v4 }
 0x413   : > { %v1023_v50 = vpop.xlane.xlu1 %1022 }
 0x414   : > { %v1062_v0 = vmul.f32 1.442695, %v1040_v40  ;;  %v1044_v17 = vsub.f32 %v3535_v11, %v1023_v50 }
 0x415   : > { %v1017_v2 = vpop.xlane.xlu0 %1016 }
 0x416   : > { %2943 = vpow2.f32 %v1062_v0  ;;  %v1041_v5 = vsub.f32 %v3540_v13, %v1017_v2  ;;  %v1070_v6 = vmul.f32 1.442695, %v1044_v17 }
 0x417   : > { %v1027_v52 = vpop.xlane.xlu1 %1026 }
 0x418   : > { %v1064_v1 = vmul.f32 1.442695, %v1041_v5  ;;  %v1046_v63 = vsub.f32 %v3544_v49, %v1027_v52 }
 0x419   : > { %v1021_v16 = vpop.xlane.xlu0 %1020 }
 0x41a   : > { %2945 = vpow2.f32 %v1064_v1  ;;  %v1043_v24 = vsub.f32 %v3548_v41, %v1021_v16  ;;  %v1074_v41 = vmul.f32 1.442695, %v1046_v63  ;;  %v3092_v63 = vld [vmem:[%s3176_s22 + $0x10] ss:$8 sps:$4 sm:$0xff]  }
 0x41b   : > { %v1031_v62 = vpop.xlane.xlu1 %1030  ;;  %2947 = vpow2.f32 %v1066_v21 }
 0x41c   : > { %v1068_v44 = vmul.f32 1.442695, %v1043_v24  ;;  %v1048_v38 = vsub.f32 %v3551_v8, %v1031_v62 }
 0x41d   : > { %v1025_v7 = vpop.xlane.xlu0 %1024  ;;  %v2940_v59 = vpop.eup %2939 }
 0x41e   : > { %2949 = vpow2.f32 %v1068_v44  ;;  %v1045_v13 = vsub.f32 %v3556_v22, %v1025_v7  ;;  %v1078_v22 = vmul.f32 1.442695, %v1048_v38  ;;  %v3093_v7 = vld [vmem:[%s3176_s22] ss:$8 sps:$4 sm:$0xff]  }
 0x41f   : > { %v2942_v60 = vpop.eup %2941  ;;  %v3590_v14 = vpop.permute.xlu1 %1585  ;;  %2951 = vpow2.f32 %v1070_v6  ;;  %v3091_v6 = vld [vmem:[%s3176_s22 + $0x40] ss:$8 sps:$4 sm:$0xff]  }
 0x420   : > { %v1072_v18 = vmul.f32 1.442695, %v1045_v13  ;;  %v1116_v11 = vpack.c.bf16 %v2940_v59, %v2942_v60  ;;  %2832 = vmatprep.subr.msk.bf16.mxu0 %vm396_vm0, %v3590_v14 }
 0x421   : > { %v1029_v39 = vpop.xlane.xlu0 %1028 }
 0x422   : > { %2953 = vpow2.f32 %v1072_v18  ;;  %v1047_v49 = vsub.f32 %v3561_v20, %v1029_v39  ;;  %2686 = vmatprep.mubr.bf16.mxu0 %v1116_v11 }
 0x423   : > { %v2944_v3 = vpop.eup %2943  ;;  %2955 = vpow2.f32 %v1074_v41  ;;  %v1582_v13 = vpop.permute.xlu1 %1581 }
 0x424   : > { %v1076_v35 = vmul.f32 1.442695, %v1047_v49  ;;  %1094 = vadd.xlane.f32.xlu1 %v2944_v3 }
 0x425   : > { %v1033_v40 = vpop.xlane.xlu0 %1032 }
 0x426   : > { %2957 = vpow2.f32 %v1076_v35  ;;  %v1049_v50 = vsub.f32 %v3565_v56, %v1033_v40  ;;  %v1627_v35 = vsel %vm396_vm0, %v1582_v13, 0 }
 0x427   : > { %v2946_v0 = vpop.eup %2945  ;;  %2959 = vpow2.f32 %v1078_v22 }
 0x428   : > { %v1080_v4 = vmul.f32 1.442695, %v1049_v50  ;;  %1090 = vadd.xlane.f32.xlu1 %v2942_v60  ;;  %1096 = vadd.xlane.f32.xlu0 %v2946_v0  ;;  %v1117_v2 = vpack.c.bf16 %v2946_v0, %v2944_v3  ;;  %v2948_v8 = vpop.eup %2947 }
 0x429   : > { %v1584_v60 = vpop.permute.xlu0 %1583 }
 0x42a   : > { %2961 = vpow2.f32 %v1080_v4  ;;  %2687 = vmatmul.mubr.bf16.gmra.mxu0 %v1117_v2  ;;  %v1630_v49 = vsel %vm396_vm0, %v1584_v60, 0 }
 0x42b   : > { %v2950_v20 = vpop.eup %2949 }
 0x42c   : > { %1092 = vadd.xlane.f32.xlu0 %v2940_v59  ;;  %v1118_v5 = vpack.c.bf16 %v2950_v20, %v2948_v8  ;;  %v2952_v52 = vpop.eup %2951  ;;  %v3094_v59 = vld [vmem:[%s3176_s22] ss:$8 sps:$4 sm:$0xff]  }
 0x42e   : > { %2690 = vmatprep.mubr.bf16.mxu0 %v1118_v5 }
 0x42f   : > { %v2954_v1 = vpop.eup %2953 }
 0x430   : > { %1102 = vadd.xlane.f32.xlu0 %v2952_v52  ;;  %v1119_v21 = vpack.c.bf16 %v2954_v1, %v2952_v52  ;;  %v2956_v17 = vpop.eup %2955 }
 0x432   : > { %2691 = vmatmul.mubr.bf16.gmra.mxu0 %v1119_v21 }
 0x433   : > { %v2958_v56 = vpop.eup %2957 }
 0x434   : > { %1098 = vadd.xlane.f32.xlu0 %v2948_v8  ;;  %v1120_v16 = vpack.c.bf16 %v2958_v56, %v2956_v17  ;;  %v2960_v24 = vpop.eup %2959 }
 0x436   : > { %2694 = vmatprep.mubr.bf16.mxu0 %v1120_v16 }
 0x437   : > { %v2962_v62 = vpop.eup %2961 }
 0x438   : > { %1104 = vadd.xlane.f32.xlu0 %v2954_v1  ;;  %v1121_v44 = vpack.c.bf16 %v2962_v62, %v2960_v24 }
 0x439   : > { %1579 = vrot.lane.b32.xlu1 %v3091_v6, %s3125_s28 }
 0x43a   : > { %2695 = vmatmul.mubr.bf16.gmra.mxu0 %v1121_v44 }
 0x43c   : > { %1100 = vadd.xlane.f32.xlu0 %v2950_v20 }
 0x440   : > { %1110 = vadd.xlane.f32.xlu0 %v2960_v24 }
 0x444   : > { %1106 = vadd.xlane.f32.xlu0 %v2956_v17 }
 0x448   : > { %1112 = vadd.xlane.f32.xlu0 %v2962_v62 }
 0x45d   : > { %1108 = vadd.xlane.f32.xlu1 %v2958_v56 }
 0x45e   : > { %1573 = vrot.lane.b32.xlu0 %v3092_v63, %s3125_s28 }
 0x462   : > { %1555 = vrot.lane.b32.xlu0 %v3093_v7, %s3126_s5 }
 0x466   : > { %1557 = vrot.lane.b32.xlu0 %v3248_v25, %s3126_s5 }
 0x46a   : > { %1559 = vrot.lane.b32.xlu0 %v3251_v26, %s3126_s5 }
 0x46c   : > { %v1087_v25 = vpop.xlane.xlu1 %1086 }
 0x46e   : > { %1571 = vrot.lane.b32.xlu1 %v3094_v59, %s3125_s28  ;;  %1561 = vrot.lane.b32.xlu0 %v3258_v27, %s3126_s5 }
 0x470   : > { %v1083_v27 = vpop.xlane.xlu1 %1082 }
 0x471   : > { %2963 = vrcp.f32 %v1083_v27 }
 0x472   : > { %1563 = vrot.lane.b32.xlu1 %v3261_v28, %s3126_s5  ;;  %1565 = vrot.lane.b32.xlu0 %v3268_v29, %s3126_s5 }
 0x474   : > { %v1089_v26 = vpop.xlane.xlu0 %1088 }
 0x475   : > { %2965 = vrcp.f32 %v1089_v26 }
 0x476   : > { %1567 = vrot.lane.b32.xlu1 %v3271_v30, %s3126_s5  ;;  %1569 = vrot.lane.b32.xlu0 %v3278_v31, %s3126_s5 }
 0x478   : > { %v1085_v28 = vpop.xlane.xlu0 %1084 }
 0x479   : > { %2967 = vrcp.f32 %v1085_v28 }
 0x47a   : > { %2969 = vrcp.f32 %v1087_v25 }
 0x47c   : > { %v1578_v29 = vpop.permute.xlu0 %1577 }
 0x47d   : > { %v1621_v4 = vsel %vm396_vm0, %v1578_v29, 0 }
 0x480   : > { %v1576_v31 = vpop.permute.xlu0 %1575 }
 0x481   : > { %v1618_v20 = vsel %vm396_vm0, %v1576_v31, 0 }
 0x495   : > { %624 = vadd.xlane.f32.xlu0 %v3386_v10 }
 0x499   : > { %626 = vadd.xlane.f32.xlu0 %v3388_v12 }
 0x49a   : > { %622 = vadd.xlane.f32.xlu1 %v3382_v54 }
 0x49d   : > { %630 = vadd.xlane.f32.xlu0 %v3399_v32 }
 0x49e   : > { %628 = vadd.xlane.f32.xlu1 %v3384_v57  ;;  %v2964_v57 = vpop.eup %2963 }
 0x49f   : > { %v2966_v12 = vpop.eup %2965 }
 0x4a1   : > { %634 = vadd.xlane.f32.xlu0 %v3405_v36 }
 0x4a2   : > { %632 = vadd.xlane.f32.xlu1 %v3401_v9  ;;  %v2968_v9 = vpop.eup %2967 }
 0x4a5   : > { %638 = vadd.xlane.f32.xlu0 %v3420_v42  ;;  %v2970_v42 = vpop.eup %2969 }
 0x4a6   : > { %636 = vadd.xlane.f32.xlu1 %v3410_v37 }
 0x4a9   : > { %642 = vadd.xlane.f32.xlu0 %v3428_v47 }
 0x4aa   : > { %640 = vadd.xlane.f32.xlu1 %v3426_v45 }
 0x4ad   : > { %v2684_v30 = vpop.f32.mrf.mxu0  ;;  %646 = vadd.xlane.f32.xlu0 %v3448_v19  ;;  %v1095_v39 = vpop.xlane.xlu1 %1094 }
 0x4ae   : > { %644 = vadd.xlane.f32.xlu1 %v3424_v43  ;;  %v1261_v18 = vmul.f32 %v2970_v42, %v2684_v30  ;;  %v2889_v43 = vld [vmem:[%s3973_s2] sm:$0xff]  }
 0x4af   : > { %v1180_v54 = vpop.f32.mrf.mxu0  ;;  %2716 = vmatprep.subr.bf16.mxu1 %v2889_v43 }
 0x4b0   : > { %v1259_v45 = vmul.f32 %v2964_v57, %v1180_v54  ;;  %2717 = vmatpush3.bf16.msra.mxu1 %v2889_v43 }
 0x4b1   : > { %v2685_v10 = vpop.f32.mrf.mxu0  ;;  %650 = vadd.xlane.f32.xlu0 %v3454_v34  ;;  %v1097_v32 = vpop.xlane.xlu0 %1096 }
 0x4b2   : > { %648 = vadd.xlane.f32.xlu1 %v3452_v33  ;;  %v1262_v36 = vmul.f32 %v2966_v12, %v2685_v10  ;;  %v1633_v33 = vsel %vm396_vm0, %v3590_v14, 0  ;;  %v1091_v3 = vpop.xlane.xlu1 %1090 }
 0x4b3   : > { %v1183_v37 = vpop.f32.mrf.mxu0  ;;  %2971 = vrcp.f32 %v1091_v3 }
 0x4b4   : > { %v1260_v47 = vmul.f32 %v2968_v9, %v1183_v37  ;;  %v1276_v34 = vpack.c.bf16 %v1262_v36, %v1261_v18  ;;  %2973 = vrcp.f32 %v1097_v32 }
 0x4b5   : > { %v1093_v11 = vpop.xlane.xlu0 %1092 }
 0x4b6   : > { %v1275_v19 = vpack.c.bf16 %v1260_v47, %v1259_v45  ;;  %652 = vadd.xlane.f32.xlu1 %v3450_v15  ;;  %v1580_v22 = vpop.permute.xlu1 %1579  ;;  %2975 = vrcp.f32 %v1093_v11 }
 0x4b7   : > { %v1624_v50 = vsel %vm396_vm0, %v1580_v22, 0  ;;  %2977 = vrcp.f32 %v1095_v39 }
 0x4b8   : > { %2700 = vmatprep.mubr.msk.bf16.mxu0 %vm396_vm0, %v1275_v19 }
 0x4b9   : > { %2701 = vmatmul.mubr.msk.bf16.vlgmr.msra.gmra.mxu0 %vm396_vm0, %v1276_v34  ;;  %v1103_v41 = vpop.xlane.xlu0 %1102 }
 0x4ba   : > { %2735 = vmatpush3.bf16.xpose.msra.mxu0 %v1633_v33 }
 0x4bb   : > { %2833 = vmatprep.subr.msk.bf16.mxu0 %vm396_vm0, %v1584_v60 }
 0x4bd   : > { %v1099_v38 = vpop.xlane.xlu0 %1098 }
 0x4be   : > { %2979 = vrcp.f32 %v1099_v38 }
 0x4c0   : > { %v2972_v56 = vpop.eup %2971 }
 0x4c1   : > { %v1105_v15 = vpop.xlane.xlu0 %1104  ;;  %v2974_v24 = vpop.eup %2973 }
 0x4c2   : > { %2737 = vmatpush3.bf16.xpose.msra.mxu0 %v1630_v49  ;;  %2981 = vrcp.f32 %v1105_v15 }
 0x4c3   : > { %2834 = vmatprep.subr.msk.bf16.mxu0 %vm396_vm0, %v1582_v13  ;;  %v2976_v44 = vpop.eup %2975 }
 0x4c4   : > { %v2978_v7 = vpop.eup %2977 }
 0x4c5   : > { %v1101_v40 = vpop.xlane.xlu0 %1100 }
 0x4c6   : > { %2983 = vrcp.f32 %v1101_v40 }
 0x4c7   : > { %2985 = vrcp.f32 %v1103_v41 }
 0x4c9   : > { %v1111_v14 = vpop.xlane.xlu0 %1110 }
 0x4ca   : > { %2739 = vmatpush3.bf16.xpose.msra.mxu0 %v1627_v35 }
 0x4cb   : > { %2835 = vmatprep.subr.msk.bf16.mxu0 %vm396_vm0, %v1580_v22 }
 0x4cd   : > { %v1107_v0 = vpop.xlane.xlu0 %1106 }
 0x4ce   : > { %2987 = vrcp.f32 %v1107_v0 }
 0x4d1   : > { %v1113_v2 = vpop.xlane.xlu0 %1112 }
 0x4d2   : > { %2741 = vmatpush3.bf16.xpose.msra.mxu0 %v1624_v50  ;;  %2989 = vrcp.f32 %v1113_v2 }
 0x4d3   : > { %2836 = vmatprep.subr.msk.bf16.mxu0 %vm396_vm0, %v1578_v29  ;;  %v2980_v29 = vpop.eup %2979 }
 0x4d5   : > { %v1574_v8 = vpop.permute.xlu0 %1573 }
 0x4d6   : > { %v1615_v52 = vsel %vm396_vm0, %v1574_v8, 0 }
 0x4d9   : > { %v1556_v42 = vpop.permute.xlu0 %1555 }
 0x4da   : > { %2743 = vmatpush3.bf16.xpose.msra.mxu0 %v1621_v4 }
 0x4db   : > { %2837 = vmatprep.subr.msk.bf16.mxu0 %vm396_vm0, %v1576_v31  ;;  %v2982_v31 = vpop.eup %2981 }
 0x4dc   : > { %v2984_v54 = vpop.eup %2983 }
 0x4dd   : > { %v2986_v12 = vpop.eup %2985  ;;  %v1558_v38 = vpop.permute.xlu0 %1557 }
 0x4de   : > { %v2988_v43 = vpop.eup %2987 }
 0x4df   : > { %v2990_v11 = vpop.eup %2989 }
 0x4e1   : > { %v1560_v40 = vpop.permute.xlu0 %1559 }
 0x4e2   : > { %2745 = vmatpush3.bf16.xpose.msra.mxu0 %v1618_v20 }
 0x4e3   : > { %2838 = vmatprep.subr.msk.bf16.mxu0 %vm396_vm0, %v1574_v8 }
 0x4e6   : > { %v1109_v5 = vpop.xlane.xlu1 %1108 }
 0x4e7   : > { %2991 = vrcp.f32 %v1109_v5 }
 0x4e8   : > { %2993 = vrcp.f32 %v1111_v14  ;;  %v1562_v14 = vpop.permute.xlu0 %1561 }
 0x4ea   : > { %v2688_v1 = vpop.f32.mrf.mxu0  ;;  %2747 = vmatpush3.bf16.xpose.msra.mxu0 %v1615_v52  ;;  %v1572_v21 = vpop.permute.xlu1 %1571 }
 0x4eb   : > { %2839 = vmatprep.subr.msk.bf16.mxu0 %vm396_vm0, %v1572_v21  ;;  %v1612_v62 = vsel %vm396_vm0, %v1572_v21, 0  ;;  %v1265_v60 = vmul.f32 %v2978_v7, %v2688_v1 }
 0x4ec   : > { %v1196_v17 = vpop.f32.mrf.mxu0  ;;  %v1566_v50 = vpop.permute.xlu0 %1565 }
 0x4ed   : > { %v1263_v59 = vmul.f32 %v2972_v56, %v1196_v17 }
 0x4ee   : > { %v2689_v16 = vpop.f32.mrf.mxu0  ;;  %v1564_v0 = vpop.permute.xlu1 %1563 }
 0x4ef   : > { %v1266_v6 = vmul.f32 %v2974_v24, %v2689_v16 }
 0x4f0   : > { %v1199_v63 = vpop.f32.mrf.mxu0  ;;  %v1570_v4 = vpop.permute.xlu0 %1569 }
 0x4f1   : > { %v1264_v13 = vmul.f32 %v2976_v44, %v1199_v63  ;;  %v1278_v27 = vpack.c.bf16 %v1266_v6, %v1265_v60 }
 0x4f2   : > { %v2692_v25 = vpop.f32.mrf.mxu0  ;;  %2749 = vmatpush3.bf16.xpose.msra.mxu0 %v1612_v62  ;;  %v1568_v2 = vpop.permute.xlu1 %1567 }
 0x4f3   : > { %v1277_v26 = vpack.c.bf16 %v1264_v13, %v1263_v59  ;;  %v1269_v36 = vmul.f32 %v2986_v12, %v2692_v25 }
 0x4f4   : > { %v1212_v28 = vpop.f32.mrf.mxu0  ;;  %v2992_v34 = vpop.eup %2991 }
 0x4f5   : > { %2704 = vmatprep.mubr.msk.bf16.mxu0 %vm396_vm0, %v1277_v26  ;;  %v1267_v32 = vmul.f32 %v2980_v29, %v1212_v28  ;;  %v2994_v39 = vpop.eup %2993 }
 0x4f6   : > { %v2693_v30 = vpop.f32.mrf.mxu0  ;;  %2705 = vmatmul.mubr.msk.bf16.gmra.mxu0 %vm396_vm0, %v1278_v27 }
 0x4f7   : > { %v1270_v57 = vmul.f32 %v2982_v31, %v2693_v30 }
 0x4f8   : > { %v1215_v10 = vpop.f32.mrf.mxu0 }
 0x4f9   : > { %v1268_v9 = vmul.f32 %v2984_v54, %v1215_v10  ;;  %v1280_v47 = vpack.c.bf16 %v1270_v57, %v1269_v36 }
 0x4fa   : > { %v2696_v37 = vpop.f32.mrf.mxu0 }
 0x4fb   : > { %v1279_v45 = vpack.c.bf16 %v1268_v9, %v1267_v32  ;;  %v1273_v3 = vmul.f32 %v2994_v39, %v2696_v37  ;;  %v3991_v39 = vld [vmem:[#allocation8_spill] sm:$0xff] }
 0x4fc   : > { %v1228_v18 = vpop.f32.mrf.mxu0 }
 0x4fd   : > { %2708 = vmatprep.mubr.msk.bf16.mxu0 %vm396_vm0, %v1279_v45  ;;  %v1271_v49 = vmul.f32 %v2988_v43, %v1228_v18  ;;  %v3988_v45 = vld [vmem:[#allocation6_spill] sm:$0xff] }
 0x4fe   : > { %v2697_v19 = vpop.f32.mrf.mxu0  ;;  %2709 = vmatmul.mubr.msk.bf16.gmra.mxu0 %vm396_vm0, %v1280_v47 }
 0x4ff   : > { %v1274_v33 = vmul.f32 %v2990_v11, %v2697_v19  ;;  %v3989_v11 = vld [vmem:[#allocation3_spill] sm:$0xff] }
 0x500   : > { %v1231_v41 = vpop.f32.mrf.mxu0 }
 0x501   : > { %v1272_v15 = vmul.f32 %v2992_v34, %v1231_v41  ;;  %v1282_v22 = vpack.c.bf16 %v1274_v33, %v1273_v3  ;;  %v3990_v34 = vld [vmem:[#allocation5_spill] sm:$0xff] }
 0x503   : > { %v1281_v35 = vpack.c.bf16 %v1272_v15, %v1271_v49  ;;  %v3992_v15 = vld [vmem:[#allocation10_spill] sm:$0xff] }
 0x505   : > { %2712 = vmatprep.mubr.msk.bf16.mxu0 %vm396_vm0, %v1281_v35 }
 0x506   : > { %2713 = vmatmul.mubr.msk.bf16.gmra.mxu0 %vm396_vm0, %v1282_v22 }
 0x507   : > { %2750 = vmatprep.mubr.msk.bf16.mxu0 %vm396_vm0, %v1556_v42 }
 0x50e   : > { %2751 = vmatmul.mubr.msk.bf16.vlgmr.msra.gmra.mxu0 %vm396_vm0, %v1558_v38 }
 0x50f   : > { %2754 = vmatprep.mubr.msk.bf16.mxu0 %vm396_vm0, %v1560_v40 }
 0x516   : > { %2755 = vmatmul.mubr.msk.bf16.gmra.mxu0 %vm396_vm0, %v1562_v14  ;;  %v3993_v14 = vld [vmem:[#allocation7_spill] sm:$0xff] }
 0x517   : > { %2758 = vmatprep.mubr.msk.bf16.mxu0 %vm396_vm0, %v1564_v0  ;;  %v3994_v0 = vld [vmem:[#allocation9_spill] sm:$0xff] }
 0x51e   : > { %2759 = vmatmul.mubr.msk.bf16.gmra.mxu0 %vm396_vm0, %v1566_v50  ;;  %v625_v8 = vpop.xlane.xlu0 %624 }
 0x51f   : > { %2762 = vmatprep.mubr.msk.bf16.mxu0 %vm396_vm0, %v1568_v2  ;;  %2995 = vrcp.f32 %v625_v8  ;;  %v2890_v8 = vld [vmem:[%s3176_s22 + $0x74] ss:$8 sps:$4 sm:$0xff]  }
 0x520   : > { %2766 = vmatprep.subr.bf16.mxu1 %v2890_v8 }
 0x522   : > { %v627_v20 = vpop.xlane.xlu0 %626 }
 0x523   : > { %v623_v5 = vpop.xlane.xlu1 %622 }
 0x524   : > { %2997 = vrcp.f32 %v623_v5 }
 0x525   : > { %2999 = vrcp.f32 %v627_v20  ;;  %v2891_v20 = vld [vmem:[%s3176_s22 + $0x64] ss:$8 sps:$4 sm:$0xff]  }
 0x526   : > { %2763 = vmatmul.mubr.msk.bf16.gmra.mxu0 %vm396_vm0, %v1570_v4  ;;  %v631_v52 = vpop.xlane.xlu0 %630 }
 0x527   : > { %v629_v1 = vpop.xlane.xlu1 %628 }
 0x528   : > { %3001 = vrcp.f32 %v629_v1 }
 0x529   : > { %3003 = vrcp.f32 %v631_v52 }
 0x52a   : > { %v635_v21 = vpop.xlane.xlu0 %634 }
 0x52b   : > { %v633_v17 = vpop.xlane.xlu1 %632 }
 0x52c   : > { %3005 = vrcp.f32 %v633_v17  ;;  %v2996_v16 = vpop.eup %2995 }
 0x52d   : > { %3007 = vrcp.f32 %v635_v21  ;;  %v800_v63 = vmul.f32 %v2996_v16, %v3486_v55 }
 0x52e   : > { %v639_v56 = vpop.xlane.xlu0 %638 }
 0x52f   : > { %v637_v24 = vpop.xlane.xlu1 %636 }
 0x530   : > { %3009 = vrcp.f32 %v637_v24 }
 0x531   : > { %v2998_v62 = vpop.eup %2997  ;;  %3011 = vrcp.f32 %v639_v56 }
 0x532   : > { %v643_v44 = vpop.xlane.xlu0 %642  ;;  %v799_v6 = vmul.f32 %v2998_v62, %v3482_v51  ;;  %v3000_v7 = vpop.eup %2999 }
 0x533   : > { %v641_v59 = vpop.xlane.xlu1 %640  ;;  %v801_v25 = vmul.f32 %v3000_v7, %v3480_v48 }
 0x534   : > { %3013 = vrcp.f32 %v641_v59  ;;  %v815_v13 = vpack.c.bf16 %v800_v63, %v799_v6 }
 0x535   : > { %v3002_v60 = vpop.eup %3001  ;;  %3015 = vrcp.f32 %v643_v44 }
 0x536   : > { %v802_v26 = vmul.f32 %v3002_v60, %v3484_v46  ;;  %2718 = vmatprep.mubr.msk.bf16.mxu1 %vm396_vm0, %v815_v13  ;;  %v647_v27 = vpop.xlane.xlu0 %646  ;;  %v3004_v28 = vpop.eup %3003 }
 0x537   : > { %v645_v29 = vpop.xlane.xlu1 %644  ;;  %v803_v55 = vmul.f32 %v3004_v28, %v3490_v58 }
 0x538   : > { %v816_v30 = vpack.c.bf16 %v802_v26, %v801_v25  ;;  %3017 = vrcp.f32 %v645_v29 }
 0x539   : > { %v3006_v51 = vpop.eup %3005  ;;  %3019 = vrcp.f32 %v647_v27  ;;  %v3995_v27 = vld [vmem:[#allocation2_spill] sm:$0xff] }
 0x53a   : > { %2719 = vmatmul.mubr.msk.bf16.vlgmr.msra.gmra.mxu1 %vm396_vm0, %v816_v30  ;;  %v804_v31 = vmul.f32 %v3006_v51, %v3494_v61  ;;  %v3008_v54 = vpop.eup %3007  ;;  %v651_v48 = vpop.xlane.xlu0 %650  ;;  %v3987_v61 = vld [vmem:[#allocation4_spill] sm:$0xff] }
 0x53b   : > { %v649_v57 = vpop.xlane.xlu1 %648  ;;  %v805_v12 = vmul.f32 %v3008_v54, %v3488_v53  ;;  %2767 = vmatpush3.bf16.msra.mxu1 %v2890_v8 }
 0x53c   : > { %3021 = vrcp.f32 %v649_v57  ;;  %v817_v46 = vpack.c.bf16 %v804_v31, %v803_v55  ;;  %2768 = vmatprep.subr.bf16.mxu1 %v2891_v20 }
 0x53d   : > { %v3010_v10 = vpop.eup %3009  ;;  %3023 = vrcp.f32 %v651_v48 }
 0x53e   : > { %2722 = vmatprep.mubr.msk.bf16.mxu1 %vm396_vm0, %v817_v46  ;;  %v806_v32 = vmul.f32 %v3010_v10, %v3492_v23  ;;  %v3012_v9 = vpop.eup %3011 }
 0x53f   : > { %v653_v36 = vpop.xlane.xlu1 %652  ;;  %v807_v42 = vmul.f32 %v3012_v9, %v3987_v61  ;;  %2769 = vmatpush3.bf16.msra.mxu1 %v2891_v20 }
 0x540   : > { %3025 = vrcp.f32 %v653_v36  ;;  %v818_v37 = vpack.c.bf16 %v806_v32, %v805_v12 }
 0x541   : > { %v3014_v58 = vpop.eup %3013 }
 0x542   : > { %2723 = vmatmul.mubr.msk.bf16.gmra.mxu1 %vm396_vm0, %v818_v37  ;;  %v808_v47 = vmul.f32 %v3014_v58, %v3988_v45  ;;  %v3016_v18 = vpop.eup %3015  ;;  %v2892_v37 = vld [vmem:[%s3176_s22 + $0x54] ss:$8 sps:$4 sm:$0xff]  }
 0x543   : > { %v809_v53 = vmul.f32 %v3016_v18, %v3989_v11  ;;  %2770 = vmatprep.subr.bf16.mxu1 %v2892_v37 }
 0x544   : > { %v819_v43 = vpack.c.bf16 %v808_v47, %v807_v42  ;;  %2771 = vmatpush3.bf16.msra.mxu1 %v2892_v37  ;;  %v2893_v47 = vld [vmem:[%s3176_s22 + $0x44] ss:$8 sps:$4 sm:$0xff]  }
 0x545   : > { %v3018_v19 = vpop.eup %3017  ;;  %2772 = vmatprep.subr.bf16.mxu1 %v2893_v47 }
 0x546   : > { %2726 = vmatprep.mubr.msk.bf16.mxu1 %vm396_vm0, %v819_v43  ;;  %v810_v23 = vmul.f32 %v3018_v19, %v3990_v34  ;;  %v3020_v33 = vpop.eup %3019 }
 0x547   : > { %v811_v49 = vmul.f32 %v3020_v33, %v3991_v39 }
 0x548   : > { %v820_v41 = vpack.c.bf16 %v810_v23, %v809_v53  ;;  %2773 = vmatpush3.bf16.msra.mxu1 %v2893_v47  ;;  %v2894_v53 = vld [vmem:[%s3176_s22 + $0x34] ss:$8 sps:$4 sm:$0xff]  }
 0x549   : > { %v3022_v38 = vpop.eup %3021  ;;  %2774 = vmatprep.subr.bf16.mxu1 %v2894_v53 }
 0x54a   : > { %2727 = vmatmul.mubr.msk.bf16.gmra.mxu1 %vm396_vm0, %v820_v41  ;;  %v812_v3 = vmul.f32 %v3022_v38, %v3992_v15  ;;  %v3024_v35 = vpop.eup %3023  ;;  %v2895_v38 = vld [vmem:[%s3176_s22 + $0x24] ss:$8 sps:$4 sm:$0xff]   ;;  %v2896_v15 = vld [vmem:[%s3176_s22 + $0x14] ss:$8 sps:$4 sm:$0xff]  }
 0x54b   : > { %v813_v50 = vmul.f32 %v3024_v35, %v3993_v14  ;;  %v2897_v35 = vld [vmem:[%s3176_s22 + $0x4] ss:$8 sps:$4 sm:$0xff]  }
 0x54c   : > { %v821_v22 = vpack.c.bf16 %v812_v3, %v811_v49  ;;  %2775 = vmatpush3.bf16.msra.mxu1 %v2894_v53 }
 0x54d   : > { %v3026_v40 = vpop.eup %3025  ;;  %2776 = vmatprep.subr.bf16.mxu1 %v2895_v38 }
 0x54e   : > { %2730 = vmatprep.mubr.msk.bf16.mxu1 %vm396_vm0, %v821_v22  ;;  %v814_v4 = vmul.f32 %v3026_v40, %v3994_v0 }
 0x550   : > { %v822_v2 = vpack.c.bf16 %v814_v4, %v813_v50  ;;  %2777 = vmatpush3.bf16.msra.mxu1 %v2895_v38 }
 0x551   : > { %2778 = vmatprep.subr.bf16.mxu1 %v2896_v15 }
 0x552   : > { %2731 = vmatmul.mubr.msk.bf16.gmra.mxu1 %vm396_vm0, %v822_v2 }
 0x554   : > { %2779 = vmatpush3.bf16.msra.mxu1 %v2896_v15 }
 0x555   : > { %2780 = vmatprep.subr.bf16.mxu1 %v2897_v35 }
 0x558   : > { %2781 = vmatpush3.bf16.msra.mxu1 %v2897_v35 }
 0x579   : > { %v3688_v5 = vpop.f32.mrf.mxu0 }
 0x57b   : > { %v3690_v52 = vpop.f32.mrf.mxu0 }
 0x57d   : > { %v3692_v1 = vpop.f32.mrf.mxu0 }
 0x57f   : > { %v3694_v21 = vpop.f32.mrf.mxu0 }
 0x5b6   : > { %v3696_v17 = vpop.f32.mrf.mxu0 }
 0x5b8   : > { %v3698_v56 = vpop.f32.mrf.mxu0 }
 0x5ba   : > { %v3700_v16 = vpop.f32.mrf.mxu0 }
 0x5bc   : > { %v3702_v24 = vpop.f32.mrf.mxu0 }
 0x5be   : > { %v3704_v62 = vpop.f32.mrf.mxu0 }
 0x5c0   : > { %v3706_v44 = vpop.f32.mrf.mxu0 }
 0x5c2   : > { %v3708_v6 = vpop.f32.mrf.mxu0 }
 0x5c4   : > { %v3710_v63 = vpop.f32.mrf.mxu0 }
 0x5c6   : > { %v3712_v7 = vpop.f32.mrf.mxu0 }
 0x5c8   : > { %v3714_v59 = vpop.f32.mrf.mxu0 }
 0x5ca   : > { %v3716_v13 = vpop.f32.mrf.mxu0 }
 0x5cc   : > { %v3718_v60 = vpop.f32.mrf.mxu0 }
 0x5ce   : > { %v2752_v25 = vpop.f32.mrf.mxu0 }
 0x5cf   : > { %v3725_v51 = vadd.f32 %v2752_v25, %v3995_v27 }
 0x5d0   : > { %v1669_v26 = vpop.f32.mrf.mxu0 }
 0x5d1   : > { %v3721_v28 = vadd.f32 %v1669_v26, %v3995_v27 }
 0x5d2   : > { %v2753_v29 = vpop.f32.mrf.mxu0 }
 0x5d3   : > { %1732 = vmax.xlane.f32.xlu0 %v3721_v28  ;;  %v3733_v48 = vadd.f32 %v2753_v29, %v3995_v27 }
 0x5d4   : > { %v1672_v30 = vpop.f32.mrf.mxu0 }
 0x5d5   : > { %v3728_v55 = vadd.f32 %v1672_v30, %v3995_v27 }
 0x5d6   : > { %v2756_v31 = vpop.f32.mrf.mxu0 }
 0x5d7   : > { %1734 = vmax.xlane.f32.xlu1 %v3728_v55  ;;  %1736 = vmax.xlane.f32.xlu0 %v3725_v51  ;;  %v3741_v12 = vadd.f32 %v2756_v31, %v3995_v27 }
 0x5d8   : > { %v1685_v54 = vpop.f32.mrf.mxu0 }
 0x5d9   : > { %v3736_v57 = vadd.f32 %v1685_v54, %v3995_v27 }
 0x5da   : > { %v2757_v46 = vpop.f32.mrf.mxu0 }
 0x5db   : > { %1738 = vmax.xlane.f32.xlu1 %v3733_v48  ;;  %1740 = vmax.xlane.f32.xlu0 %v3736_v57  ;;  %v3750_v58 = vadd.f32 %v2757_v46, %v3995_v27 }
 0x5dc   : > { %v1688_v10 = vpop.f32.mrf.mxu0 }
 0x5dd   : > { %v3744_v32 = vadd.f32 %v1688_v10, %v3995_v27 }
 0x5de   : > { %v2760_v9 = vpop.f32.mrf.mxu0 }
 0x5df   : > { %1742 = vmax.xlane.f32.xlu1 %v3744_v32  ;;  %1744 = vmax.xlane.f32.xlu0 %v3741_v12  ;;  %v3759_v18 = vadd.f32 %v2760_v9, %v3995_v27 }
 0x5e0   : > { %v1701_v36 = vpop.f32.mrf.mxu0 }
 0x5e1   : > { %v3753_v61 = vadd.f32 %v1701_v36, %v3995_v27 }
 0x5e2   : > { %v2761_v42 = vpop.f32.mrf.mxu0 }
 0x5e3   : > { %1746 = vmax.xlane.f32.xlu1 %v3750_v58  ;;  %1748 = vmax.xlane.f32.xlu0 %v3753_v61  ;;  %v3768_v34 = vadd.f32 %v2761_v42, %v3995_v27 }
 0x5e4   : > { %v1704_v45 = vpop.f32.mrf.mxu0 }
 0x5e5   : > { %v3762_v43 = vadd.f32 %v1704_v45, %v3995_v27 }
 0x5e6   : > { %v2764_v19 = vpop.f32.mrf.mxu0 }
 0x5e7   : > { %1750 = vmax.xlane.f32.xlu1 %v3762_v43  ;;  %1752 = vmax.xlane.f32.xlu0 %v3759_v18  ;;  %v3777_v39 = vadd.f32 %v2764_v19, %v3995_v27 }
 0x5e8   : > { %v1717_v11 = vpop.f32.mrf.mxu0 }
 0x5e9   : > { %v3771_v23 = vadd.f32 %v1717_v11, %v3995_v27 }
 0x5ea   : > { %v2765_v33 = vpop.f32.mrf.mxu0 }
 0x5eb   : > { %1754 = vmax.xlane.f32.xlu1 %v3768_v34  ;;  %1756 = vmax.xlane.f32.xlu0 %v3771_v23  ;;  %v3786_v3 = vadd.f32 %v2765_v33, %v3995_v27 }
 0x5ec   : > { %v1720_v41 = vpop.f32.mrf.mxu0 }
 0x5ed   : > { %v3780_v49 = vadd.f32 %v1720_v41, %v3995_v27 }
 0x5ef   : > { %1758 = vmax.xlane.f32.xlu1 %v3780_v49  ;;  %1760 = vmax.xlane.f32.xlu0 %v3777_v39 }
 0x5f3   : > { %1762 = vmax.xlane.f32.xlu1 %v3786_v3 }
 0x65c   : > { %v1733_v22 = vpop.xlane.xlu0 %1732 }
 0x65d   : > { %v1764_v40 = vsub.f32 %v3721_v28, %v1733_v22 }
 0x65f   : > { %v1780_v14 = vmul.f32 1.442695, %v1764_v40 }
 0x660   : > { %v1735_v50 = vpop.xlane.xlu1 %1734  ;;  %v1737_v0 = vpop.xlane.xlu0 %1736 }
 0x661   : > { %3027 = vpow2.f32 %v1780_v14  ;;  %v1765_v4 = vsub.f32 %v3728_v55, %v1735_v50  ;;  %v1766_v2 = vsub.f32 %v3725_v51, %v1737_v0 }
 0x663   : > { %v1782_v8 = vmul.f32 1.442695, %v1765_v4  ;;  %v1784_v20 = vmul.f32 1.442695, %v1766_v2 }
 0x664   : > { %v1739_v25 = vpop.xlane.xlu1 %1738  ;;  %v1741_v26 = vpop.xlane.xlu0 %1740 }
 0x665   : > { %3029 = vpow2.f32 %v1782_v8  ;;  %v1767_v27 = vsub.f32 %v3733_v48, %v1739_v25  ;;  %v1768_v29 = vsub.f32 %v3736_v57, %v1741_v26 }
 0x666   : > { %3031 = vpow2.f32 %v1784_v20 }
 0x667   : > { %v1786_v30 = vmul.f32 1.442695, %v1767_v27  ;;  %v1788_v28 = vmul.f32 1.442695, %v1768_v29 }
 0x668   : > { %v1743_v31 = vpop.xlane.xlu1 %1742  ;;  %v1745_v54 = vpop.xlane.xlu0 %1744 }
 0x669   : > { %3033 = vpow2.f32 %v1786_v30  ;;  %v1769_v46 = vsub.f32 %v3744_v32, %v1743_v31  ;;  %v1770_v55 = vsub.f32 %v3741_v12, %v1745_v54 }
 0x66a   : > { %3035 = vpow2.f32 %v1788_v28 }
 0x66b   : > { %v1790_v51 = vmul.f32 1.442695, %v1769_v46  ;;  %v1792_v10 = vmul.f32 1.442695, %v1770_v55 }
 0x66c   : > { %v1747_v9 = vpop.xlane.xlu1 %1746  ;;  %v1749_v36 = vpop.xlane.xlu0 %1748 }
 0x66d   : > { %3037 = vpow2.f32 %v1790_v51  ;;  %v1771_v48 = vsub.f32 %v3750_v58, %v1747_v9  ;;  %v1772_v57 = vsub.f32 %v3753_v61, %v1749_v36 }
 0x66e   : > { %v3028_v37 = vpop.eup %3027  ;;  %3039 = vpow2.f32 %v1792_v10 }
 0x66f   : > { %v1794_v42 = vmul.f32 1.442695, %v1771_v48  ;;  %v1796_v45 = vmul.f32 1.442695, %v1772_v57  ;;  %1812 = vadd.xlane.f32.xlu0 %v3028_v37  ;;  %v2898_v57 = vld [vmem:[%s3973_s2 + $0x10] sm:$0xff]  }
 0x670   : > { %v1751_v47 = vpop.xlane.xlu1 %1750  ;;  %v1753_v19 = vpop.xlane.xlu0 %1752  ;;  %2798 = vmatprep.subr.bf16.mxu1 %v2898_v57 }
 0x671   : > { %3041 = vpow2.f32 %v1794_v42  ;;  %v1773_v12 = vsub.f32 %v3762_v43, %v1751_v47  ;;  %v1774_v32 = vsub.f32 %v3759_v18, %v1753_v19 }
 0x672   : > { %v3030_v11 = vpop.eup %3029  ;;  %3043 = vpow2.f32 %v1796_v45 }
 0x673   : > { %v3032_v53 = vpop.eup %3031  ;;  %v1798_v33 = vmul.f32 1.442695, %v1773_v12  ;;  %v1800_v41 = vmul.f32 1.442695, %v1774_v32  ;;  %1814 = vadd.xlane.f32.xlu1 %v3030_v11  ;;  %v1844_v58 = vpack.c.bf16 %v3030_v11, %v3028_v37  ;;  %v3809_v37 = vpop.f32.mrf.mxu1 }
 0x674   : > { %1816 = vadd.xlane.f32.xlu0 %v3032_v53  ;;  %v1755_v61 = vpop.xlane.xlu1 %1754  ;;  %v1757_v38 = vpop.xlane.xlu0 %1756 }
 0x675   : > { %3045 = vpow2.f32 %v1798_v33  ;;  %v1775_v15 = vsub.f32 %v3768_v34, %v1755_v61  ;;  %v1776_v35 = vsub.f32 %v3771_v23, %v1757_v38  ;;  %2782 = vmatprep.mubr.bf16.mxu1 %v1844_v58  ;;  %v3811_v42 = vpop.f32.mrf.mxu1 }
 0x676   : > { %v3034_v22 = vpop.eup %3033  ;;  %3047 = vpow2.f32 %v1800_v41 }
 0x677   : > { %v3036_v43 = vpop.eup %3035  ;;  %v1802_v18 = vmul.f32 1.442695, %v1775_v15  ;;  %v1804_v40 = vmul.f32 1.442695, %v1776_v35  ;;  %1818 = vadd.xlane.f32.xlu1 %v3034_v22  ;;  %v1845_v14 = vpack.c.bf16 %v3034_v22, %v3032_v53  ;;  %v3813_v45 = vpop.f32.mrf.mxu1 }
 0x678   : > { %1820 = vadd.xlane.f32.xlu0 %v3036_v43  ;;  %v1759_v50 = vpop.xlane.xlu1 %1758  ;;  %v1761_v0 = vpop.xlane.xlu0 %1760 }
 0x679   : > { %3049 = vpow2.f32 %v1802_v18  ;;  %v1777_v4 = vsub.f32 %v3780_v49, %v1759_v50  ;;  %v1778_v2 = vsub.f32 %v3777_v39, %v1761_v0  ;;  %2783 = vmatmul.mubr.bf16.vlgmr.msra.gmra.mxu1 %v1845_v14  ;;  %v3815_v47 = vpop.f32.mrf.mxu1 }
 0x67a   : > { %v3038_v34 = vpop.eup %3037  ;;  %3051 = vpow2.f32 %v1804_v40  ;;  %2799 = vmatpush3.bf16.msra.mxu1 %v2898_v57 }
 0x67b   : > { %v3040_v23 = vpop.eup %3039  ;;  %v1806_v8 = vmul.f32 1.442695, %v1777_v4  ;;  %v1808_v20 = vmul.f32 1.442695, %v1778_v2  ;;  %1822 = vadd.xlane.f32.xlu1 %v3038_v34  ;;  %v1846_v25 = vpack.c.bf16 %v3038_v34, %v3036_v43  ;;  %v3817_v19 = vpop.f32.mrf.mxu1 }
 0x67c   : > { %1824 = vadd.xlane.f32.xlu0 %v3040_v23  ;;  %v1763_v26 = vpop.xlane.xlu1 %1762 }
 0x67d   : > { %3053 = vpow2.f32 %v1806_v8  ;;  %v1779_v27 = vsub.f32 %v3786_v3, %v1763_v26  ;;  %2786 = vmatprep.mubr.bf16.mxu1 %v1846_v25  ;;  %v3819_v12 = vpop.f32.mrf.mxu1 }
 0x67e   : > { %v3042_v29 = vpop.eup %3041  ;;  %3055 = vpow2.f32 %v1808_v20 }
 0x67f   : > { %v3044_v30 = vpop.eup %3043  ;;  %v1810_v49 = vmul.f32 1.442695, %v1779_v27  ;;  %1826 = vadd.xlane.f32.xlu1 %v3042_v29  ;;  %v1847_v39 = vpack.c.bf16 %v3042_v29, %v3040_v23  ;;  %v3821_v32 = vpop.f32.mrf.mxu1 }
 0x680   : > { %1828 = vadd.xlane.f32.xlu0 %v3044_v30 }
 0x681   : > { %3057 = vpow2.f32 %v1810_v49  ;;  %2787 = vmatmul.mubr.bf16.gmra.mxu1 %v1847_v39  ;;  %v3823_v11 = vpop.f32.mrf.mxu1 }
 0x682   : > { %v3046_v28 = vpop.eup %3045 }
 0x683   : > { %v3048_v31 = vpop.eup %3047  ;;  %1830 = vadd.xlane.f32.xlu1 %v3046_v28  ;;  %v1848_v54 = vpack.c.bf16 %v3046_v28, %v3044_v30  ;;  %v3825_v53 = vpop.f32.mrf.mxu1 }
 0x684   : > { %1832 = vadd.xlane.f32.xlu0 %v3048_v31 }
 0x685   : > { %2790 = vmatprep.mubr.bf16.mxu1 %v1848_v54  ;;  %v3827_v58 = vpop.f32.mrf.mxu1 }
 0x686   : > { %v3050_v46 = vpop.eup %3049 }
 0x687   : > { %v3052_v55 = vpop.eup %3051  ;;  %1834 = vadd.xlane.f32.xlu1 %v3050_v46  ;;  %v1849_v3 = vpack.c.bf16 %v3050_v46, %v3048_v31  ;;  %v3829_v38 = vpop.f32.mrf.mxu1 }
 0x688   : > { %1836 = vadd.xlane.f32.xlu0 %v3052_v55 }
 0x689   : > { %2791 = vmatmul.mubr.bf16.gmra.mxu1 %v1849_v3  ;;  %v3831_v35 = vpop.f32.mrf.mxu1 }
 0x68a   : > { %v3054_v51 = vpop.eup %3053 }
 0x68b   : > { %v3056_v10 = vpop.eup %3055  ;;  %1838 = vadd.xlane.f32.xlu1 %v3054_v51  ;;  %v1850_v9 = vpack.c.bf16 %v3054_v51, %v3052_v55  ;;  %v3833_v18 = vpop.f32.mrf.mxu1 }
 0x68c   : > { %1840 = vadd.xlane.f32.xlu0 %v3056_v10 }
 0x68d   : > { %2794 = vmatprep.mubr.bf16.mxu1 %v1850_v9  ;;  %v3835_v14 = vpop.f32.mrf.mxu1 }
 0x68e   : > { %v3058_v36 = vpop.eup %3057 }
 0x68f   : > { %1842 = vadd.xlane.f32.xlu1 %v3058_v36  ;;  %v1851_v48 = vpack.c.bf16 %v3058_v36, %v3056_v10  ;;  %v3837_v0 = vpop.f32.mrf.mxu1 }
 0x691   : > { %2795 = vmatmul.mubr.bf16.gmra.mxu1 %v1851_v48  ;;  %v3839_v34 = vpop.f32.mrf.mxu1 }
 0x6f8   : > { %v1813_v41 = vpop.xlane.xlu0 %1812 }
 0x6f9   : > { %3059 = vrcp.f32 %v1813_v41 }
 0x6fc   : > { %v1815_v33 = vpop.xlane.xlu1 %1814 }
 0x6fd   : > { %v1817_v15 = vpop.xlane.xlu0 %1816 }
 0x700   : > { %v1819_v61 = vpop.xlane.xlu1 %1818 }
 0x701   : > { %v1821_v43 = vpop.xlane.xlu0 %1820  ;;  %3061 = vrcp.f32 %v1819_v61 }
 0x702   : > { %3063 = vrcp.f32 %v1815_v33 }
 0x703   : > { %3065 = vrcp.f32 %v1817_v15 }
 0x704   : > { %v1823_v22 = vpop.xlane.xlu1 %1822  ;;  %3067 = vrcp.f32 %v1821_v43 }
 0x705   : > { %v1825_v50 = vpop.xlane.xlu0 %1824 }
 0x706   : > { %v3060_v26 = vpop.eup %3059 }
 0x708   : > { %v1827_v40 = vpop.xlane.xlu1 %1826 }
 0x709   : > { %v1829_v2 = vpop.xlane.xlu0 %1828  ;;  %3069 = vrcp.f32 %v1827_v40 }
 0x70a   : > { %3071 = vrcp.f32 %v1823_v22 }
 0x70b   : > { %3073 = vrcp.f32 %v1825_v50 }
 0x70c   : > { %v1831_v4 = vpop.xlane.xlu1 %1830  ;;  %3075 = vrcp.f32 %v1829_v2 }
 0x70d   : > { %v1833_v25 = vpop.xlane.xlu0 %1832 }
 0x70e   : > { %v3062_v29 = vpop.eup %3061 }
 0x70f   : > { %v3064_v30 = vpop.eup %3063 }
 0x710   : > { %v1835_v8 = vpop.xlane.xlu1 %1834  ;;  %v3066_v28 = vpop.eup %3065 }
 0x711   : > { %3077 = vrcp.f32 %v1835_v8  ;;  %v1837_v51 = vpop.xlane.xlu0 %1836  ;;  %v3068_v48 = vpop.eup %3067 }
 0x712   : > { %3079 = vrcp.f32 %v1831_v4 }
 0x713   : > { %3081 = vrcp.f32 %v1833_v25 }
 0x714   : > { %v1839_v31 = vpop.xlane.xlu1 %1838  ;;  %3083 = vrcp.f32 %v1837_v51 }
 0x715   : > { %v1841_v40 = vpop.xlane.xlu0 %1840 }
 0x716   : > { %v3070_v33 = vpop.eup %3069 }
 0x717   : > { %v3072_v61 = vpop.eup %3071 }
 0x718   : > { %v1843_v41 = vpop.xlane.xlu1 %1842  ;;  %v3074_v43 = vpop.eup %3073 }
 0x719   : > { %3085 = vrcp.f32 %v1843_v41 }
 0x71a   : > { %3087 = vrcp.f32 %v1839_v31 }
 0x71b   : > { %3089 = vrcp.f32 %v1841_v40 }
 0x739   : > { %v2784_v23 = vpop.f32.mrf.mxu1 }
 0x73a   : > { %v2015_v55 = vmul.f32 %v3066_v28, %v2784_v23 }
 0x73b   : > { %v1934_v20 = vpop.f32.mrf.mxu1 }
 0x73c   : > { %v2013_v54 = vmul.f32 %v3060_v26, %v1934_v20  ;;  %v3076_v26 = vpop.eup %3075 }
 0x73d   : > { %v2785_v27 = vpop.f32.mrf.mxu1 }
 0x73e   : > { %v2016_v49 = vmul.f32 %v3062_v29, %v2785_v27  ;;  %v3078_v29 = vpop.eup %3077 }
 0x73f   : > { %v1937_v39 = vpop.f32.mrf.mxu1 }
 0x740   : > { %v2014_v46 = vmul.f32 %v3064_v30, %v1937_v39  ;;  %v2030_v9 = vpack.c.bf16 %v2016_v49, %v2015_v55  ;;  %v3080_v30 = vpop.eup %3079 }
 0x741   : > { %v2788_v3 = vpop.f32.mrf.mxu1  ;;  %v3082_v28 = vpop.eup %3081 }
 0x742   : > { %v2029_v10 = vpack.c.bf16 %v2014_v46, %v2013_v54  ;;  %v2019_v2 = vmul.f32 %v3074_v43, %v2788_v3 }
 0x743   : > { %v1950_v36 = vpop.f32.mrf.mxu1 }
 0x744   : > { %2800 = vmatprep.mubr.msk.bf16.mxu1 %vm396_vm0, %v2029_v10  ;;  %v2017_v50 = vmul.f32 %v3068_v48, %v1950_v36 }
 0x745   : > { %v2789_v57 = vpop.f32.mrf.mxu1  ;;  %2801 = vmatmul.mubr.msk.bf16.vlgmr.msra.gmra.mxu1 %vm396_vm0, %v2030_v9  ;;  %v3084_v9 = vpop.eup %3083 }
 0x746   : > { %v2020_v15 = vmul.f32 %v3070_v33, %v2789_v57  ;;  %v3086_v48 = vpop.eup %3085 }
 0x747   : > { %v1953_v22 = vpop.f32.mrf.mxu1  ;;  %v3088_v57 = vpop.eup %3087 }
 0x748   : > { %v2018_v4 = vmul.f32 %v3072_v61, %v1953_v22  ;;  %v2032_v20 = vpack.c.bf16 %v2020_v15, %v2019_v2  ;;  %v3090_v61 = vpop.eup %3089 }
 0x749   : > { %v2792_v23 = vpop.f32.mrf.mxu1 }
 0x74a   : > { %v2031_v8 = vpack.c.bf16 %v2018_v4, %v2017_v50  ;;  %v2023_v55 = vmul.f32 %v3082_v28, %v2792_v23  ;;  %v1485_v4 = vadd.f32 %v3809_v37, %v3688_v5  ;;  %v3860_v23 = vld [vmem:[%s3974_s3] ss:$0 sm:$0xff]  ;;  %v1488_v37 = vadd.f32 %v3813_v45, %v3692_v1 }
 0x74b   : > { %v1966_v25 = vpop.f32.mrf.mxu1  ;;  %v1501_v28 = vadd.f32 %v3817_v19, %v3696_v17  ;;  %v2211_v19 = vld [vmem:[%s3855_s12 + $0x30] sm:$0xff] }
 0x74c   : > { %2804 = vmatprep.mubr.msk.bf16.mxu1 %vm396_vm0, %v2031_v8  ;;  %v2021_v54 = vmul.f32 %v3076_v26, %v1966_v25  ;;  %v1477_v8 = vadd.f32 %v3811_v42, %v3690_v52  ;;  %v2207_v25 = vld [vmem:[%s3855_s12 + $0x10] sm:$0xff]  ;;  %v1480_v42 = vadd.f32 %v3815_v47, %v3694_v21  ;;  %v1493_v47 = vadd.f32 %v3819_v12, %v3698_v56  ;;  %v2209_v12 = vld [vmem:[%s3855_s12 + $0x20] sm:$0xff] }
 0x74d   : > { %v2793_v27 = vpop.f32.mrf.mxu1  ;;  %2805 = vmatmul.mubr.msk.bf16.gmra.mxu1 %vm396_vm0, %v2032_v20 }
 0x74e   : > { %v2024_v49 = vmul.f32 %v3078_v29, %v2793_v27  ;;  %v2205_v29 = vld [vmem:[%s3855_s12] sm:$0xff] }
 0x74f   : > { %v1969_v39 = vpop.f32.mrf.mxu1 }
 0x750   : > { %v2022_v46 = vmul.f32 %v3080_v30, %v1969_v39  ;;  %v2034_v51 = vpack.c.bf16 %v2024_v49, %v2023_v55  ;;  %v2208_v49 = vld [vmem:[%s3855_s12 + $0x18] sm:$0xff] }
 0x751   : > { %v2796_v3 = vpop.f32.mrf.mxu1 }
 0x752   : > { %v2033_v31 = vpack.c.bf16 %v2022_v46, %v2021_v54  ;;  %v2027_v43 = vmul.f32 %v3090_v61, %v2796_v3  ;;  %v2206_v3 = vld [vmem:[%s3855_s12 + $0x8] sm:$0xff] }
 0x753   : > { %v1982_v10 = vpop.f32.mrf.mxu1 }
 0x754   : > { %2808 = vmatprep.mubr.msk.bf16.mxu1 %vm396_vm0, %v2033_v31  ;;  %v2025_v15 = vmul.f32 %v3084_v9, %v1982_v10  ;;  %v1504_v9 = vadd.f32 %v3821_v32, %v3700_v16  ;;  %v2212_v32 = vld [vmem:[%s3855_s12 + $0x38] sm:$0xff] }
 0x755   : > { %v2797_v36 = vpop.f32.mrf.mxu1  ;;  %2809 = vmatmul.mubr.msk.bf16.gmra.mxu1 %vm396_vm0, %v2034_v51 }
 0x756   : > { %v2028_v33 = vmul.f32 %v3086_v48, %v2797_v36 }
 0x757   : > { %v1985_v41 = vpop.f32.mrf.mxu1 }
 0x758   : > { %v2026_v22 = vmul.f32 %v3088_v57, %v1985_v41  ;;  %v2036_v50 = vpack.c.bf16 %v2028_v33, %v2027_v43  ;;  %v1496_v33 = vadd.f32 %v3823_v11, %v3702_v24  ;;  %v2210_v11 = vld [vmem:[%s3855_s12 + $0x28] sm:$0xff] }
 0x75a   : > { %v2035_v40 = vpack.c.bf16 %v2026_v22, %v2025_v15  ;;  %v1517_v22 = vadd.f32 %v3825_v53, %v3704_v62  ;;  %v2215_v53 = vld [vmem:[%s3855_s12 + $0x50] sm:$0xff] }
 0x75c   : > { %2812 = vmatprep.mubr.msk.bf16.mxu1 %vm396_vm0, %v2035_v40 }
 0x75d   : > { %2813 = vmatmul.mubr.msk.bf16.gmra.mxu1 %vm396_vm0, %v2036_v50 }
 0x805   : > { %v2802_v2 = vpop.f32.mrf.mxu1 }
 0x806   : > { %v2168_v20 = vadd.f32 %v2802_v2, %v1485_v4  ;;  %v1509_v4 = vadd.f32 %v3827_v58, %v3706_v44  ;;  %v2213_v58 = vld [vmem:[%s3855_s12 + $0x40] sm:$0xff] }
 0x807   : > { %v2103_v5 = vpop.f32.mrf.mxu1 }
 0x808   : > { %v2191_v26 = vadd.f32 %v3860_v23, %v2168_v20  ;;  %v2166_v27 = vadd.f32 %v2103_v5, %v1477_v8 }
 0x809   : > { %v2803_v52 = vpop.f32.mrf.mxu1 }
 0x80a   : > { %v2223_v30 = vadd.f32 %v2207_v25, %v2191_v26  ;;  %v2189_v1 = vadd.f32 %v3860_v23, %v2166_v27  ;;  %v2169_v45 = vadd.f32 %v2803_v52, %v1488_v37  ;;  %v1520_v25 = vadd.f32 %v3829_v38, %v3708_v6  ;;  %v2216_v38 = vld [vmem:[%s3855_s12 + $0x58] sm:$0xff] }
 0x80b   : > { %v2106_v39 = vpop.f32.mrf.mxu1  ;;  %v1512_v27 = vadd.f32 %v3831_v35, %v3710_v63  ;;  %v2214_v35 = vld [vmem:[%s3855_s12 + $0x48] sm:$0xff] }
 0x80c   : > { %2240 = vst.msk [vmem:[%s3872_s21 + $0x10] sm:$0xff] %vm2237_vm2, %v2223_v30  ;;  %v2221_v54 = vadd.f32 %v2205_v29, %v2189_v1  ;;  %v2192_v46 = vadd.f32 %v3860_v23, %v2169_v45  ;;  %v2167_v55 = vadd.f32 %v2106_v39, %v1480_v42  ;;  %v1533_v30 = vadd.f32 %v3833_v18, %v3712_v7  ;;  %v2219_v18 = vld [vmem:[%s3855_s12 + $0x70] sm:$0xff] }
 0x80d   : > { %v2806_v21 = vpop.f32.mrf.mxu1  ;;  %v1525_v39 = vadd.f32 %v3835_v14, %v3714_v59  ;;  %v2217_v14 = vld [vmem:[%s3855_s12 + $0x60] sm:$0xff] }
 0x80e   : > { %2238 = vst.msk [vmem:[%s3872_s21] sm:$0xff] %vm2237_vm2, %v2221_v54  ;;  %v2224_v31 = vadd.f32 %v2208_v49, %v2192_v46  ;;  %v2190_v51 = vadd.f32 %v3860_v23, %v2167_v55  ;;  %v2172_v17 = vadd.f32 %v2806_v21, %v1501_v28  ;;  %v1536_v55 = vadd.f32 %v3837_v0, %v3716_v13 }
 0x80f   : > { %v2119_v10 = vpop.f32.mrf.mxu1 }
 0x810   : > { %2241 = vst.msk [vmem:[%s3872_s21 + $0x18] sm:$0xff] %vm2237_vm2, %v2224_v31  ;;  %v2222_v36 = vadd.f32 %v2206_v3, %v2190_v51  ;;  %v2195_v48 = vadd.f32 %v3860_v23, %v2172_v17  ;;  %v2170_v56 = vadd.f32 %v2119_v10, %v1493_v47  ;;  %v1528_v31 = vadd.f32 %v3839_v34, %v3718_v60  ;;  %v2220_v17 = vld [vmem:[%s3855_s12 + $0x78] sm:$0xff] }
 0x811   : > { %v2807_v57 = vpop.f32.mrf.mxu1 }
 0x812   : > { %2239 = vst.msk [vmem:[%s3872_s21 + $0x8] sm:$0xff] %vm2237_vm2, %v2222_v36  ;;  %v2227_v41 = vadd.f32 %v2211_v19, %v2195_v48  ;;  %v2193_v61 = vadd.f32 %v3860_v23, %v2170_v56  ;;  %v2173_v16 = vadd.f32 %v2807_v57, %v1504_v9  ;;  %v2218_v48 = vld [vmem:[%s3855_s12 + $0x68] sm:$0xff] }
 0x813   : > { %v2122_v15 = vpop.f32.mrf.mxu1 }
 0x814   : > { %2244 = vst.msk [vmem:[%s3872_s21 + $0x30] sm:$0xff] %vm2237_vm2, %v2227_v41  ;;  %v2225_v43 = vadd.f32 %v2209_v12, %v2193_v61  ;;  %v2196_v40 = vadd.f32 %v3860_v23, %v2173_v16  ;;  %v2171_v24 = vadd.f32 %v2122_v15, %v1496_v33 }
 0x815   : > { %v2810_v50 = vpop.f32.mrf.mxu1 }
 0x816   : > { %2242 = vst.msk [vmem:[%s3872_s21 + $0x20] sm:$0xff] %vm2237_vm2, %v2225_v43  ;;  %v2228_v2 = vadd.f32 %v2212_v32, %v2196_v40  ;;  %v2194_v8 = vadd.f32 %v3860_v23, %v2171_v24  ;;  %v2176_v62 = vadd.f32 %v2810_v50, %v1517_v22 }
 0x817   : > { %v2135_v20 = vpop.f32.mrf.mxu1 }
 0x818   : > { %2245 = vst.msk [vmem:[%s3872_s21 + $0x38] sm:$0xff] %vm2237_vm2, %v2228_v2  ;;  %v2226_v5 = vadd.f32 %v2210_v11, %v2194_v8  ;;  %v2199_v37 = vadd.f32 %v3860_v23, %v2176_v62  ;;  %v2174_v44 = vadd.f32 %v2135_v20, %v1509_v4 }
 0x819   : > { %v2811_v26 = vpop.f32.mrf.mxu1 }
 0x81a   : > { %2243 = vst.msk [vmem:[%s3872_s21 + $0x28] sm:$0xff] %vm2237_vm2, %v2226_v5  ;;  %v2231_v29 = vadd.f32 %v2215_v53, %v2199_v37  ;;  %v2197_v52 = vadd.f32 %v3860_v23, %v2174_v44  ;;  %v2177_v6 = vadd.f32 %v2811_v26, %v1520_v25 }
 0x81b   : > { %v2138_v42 = vpop.f32.mrf.mxu1 }
 0x81c   : > { %2248 = vst.msk [vmem:[%s3872_s21 + $0x50] sm:$0xff] %vm2237_vm2, %v2231_v29  ;;  %v2229_v1 = vadd.f32 %v2213_v58, %v2197_v52  ;;  %v2200_v45 = vadd.f32 %v3860_v23, %v2177_v6  ;;  %v2175_v63 = vadd.f32 %v2138_v42, %v1512_v27 }
 0x81d   : > { %v2814_v49 = vpop.f32.mrf.mxu1 }
 0x81e   : > { %2246 = vst.msk [vmem:[%s3872_s21 + $0x40] sm:$0xff] %vm2237_vm2, %v2229_v1  ;;  %v2232_v28 = vadd.f32 %v2216_v38, %v2200_v45  ;;  %v2198_v54 = vadd.f32 %v3860_v23, %v2175_v63  ;;  %v2180_v7 = vadd.f32 %v2814_v49, %v1533_v30 }
 0x81f   : > { %v2151_v46 = vpop.f32.mrf.mxu1 }
 0x820   : > { %2249 = vst.msk [vmem:[%s3872_s21 + $0x58] sm:$0xff] %vm2237_vm2, %v2232_v28  ;;  %v2230_v3 = vadd.f32 %v2214_v35, %v2198_v54  ;;  %v2203_v21 = vadd.f32 %v3860_v23, %v2180_v7  ;;  %v2178_v59 = vadd.f32 %v2151_v46, %v1525_v39 }
 0x821   : > { %v2815_v47 = vpop.f32.mrf.mxu1 }
 0x822   : > { %2247 = vst.msk [vmem:[%s3872_s21 + $0x48] sm:$0xff] %vm2237_vm2, %v2230_v3  ;;  %v2235_v51 = vadd.f32 %v2219_v18, %v2203_v21  ;;  %v2201_v13 = vadd.f32 %v3860_v23, %v2178_v59  ;;  %v2181_v0 = vadd.f32 %v2815_v47, %v1536_v55 }
 0x823   : > { %v2154_v19 = vpop.f32.mrf.mxu1 }
 0x824   : > { %2252 = vst.msk [vmem:[%s3872_s21 + $0x70] sm:$0xff] %vm2237_vm2, %v2235_v51  ;;  %v2233_v10 = vadd.f32 %v2217_v14, %v2201_v13  ;;  %v2204_v9 = vadd.f32 %v3860_v23, %v2181_v0  ;;  %v2179_v36 = vadd.f32 %v2154_v19, %v1528_v31 }
 0x826   : > { %2250 = vst.msk [vmem:[%s3872_s21 + $0x60] sm:$0xff] %vm2237_vm2, %v2233_v10  ;;  %v2236_v56 = vadd.f32 %v2220_v17, %v2204_v9  ;;  %v2202_v60 = vadd.f32 %v3860_v23, %v2179_v36 }
 0x828   : > { %2253 = vst.msk [vmem:[%s3872_s21 + $0x78] sm:$0xff] %vm2237_vm2, %v2236_v56  ;;  %v2234_v34 = vadd.f32 %v2218_v48, %v2202_v60 }
 0x82a   : > { %2251 = vst.msk [vmem:[%s3872_s21 + $0x68] sm:$0xff] %vm2237_vm2, %v2234_v34 }
 0x82b PF: > { %s14_s17 = sadd.s32 1, %s3117_s17   ;;  %s3996_s15 = smov %s3113_s16 }
 0x82c   : > { %p11_p5 = scmp.ge.s32.totalorder %s14_s17, 4   ;;  %s3997_s16 = smov %s3999_s18 }
 0x82e   :  { %13 = sbr.rel (!%p11_p5) target bundleno = 2 (0x2), region = 70 }

// kernel: ast_forward.14
= control target key start
LH: loop header
LB: loop body
LE: loop exit
PB: predicated region body
PF: predicated region fallthrough
CT: control target
= control target key end

     0   :  { %s812_s15 = smov 0   ;;  %s996_s0 = inlined_call_operand.vmem [shape: bf16[256,192], index: 0, kind: input, shape index: {}]   ;;  %s997_s1 = inlined_call_operand.vmem [shape: bf16[192,48], index: 1, kind: input, shape index: {}]   ;;  %s998_s2 = inlined_call_operand.vmem [shape: f32[1,48], index: 2, kind: input, shape index: {}]   ;;  %s999_s3 = inlined_call_operand.vmem [shape: f32[256,48], index: 3, kind: input, shape index: {}]   ;;  %s1000_s4 = inlined_call_operand.vmem [shape: f32[256,48], index: 4, kind: output, shape index: {}]  }
   0x1 LB: > { %s657_s16 = sadd.s32 4294967295, %s784_s15   ;;  %p661_p0 = scmp.ge.s32.totalorder %s784_s15, 1  ;;  %s784_s15 = sphi %s812_s15, %s14_s15  }
   0x2   : > { %p175_p1 = scmp.lt.s32.totalorder %s784_s15, 3 }
   0x4   : > { %p176_p2 = pnand %p661_p0, %p175_p1 }
   0x5   : > { %s662_s19 = sshll.u32 (!%p176_p2), %s657_s16, 4 }
   0x6   : > { %179 = sbr.rel (%p176_p2) target bundleno = 286 (0x11e), region = 36  ;;  %p208_p3 = scmp.lt.s32.totalorder (!%p176_p2), %s662_s19, 31 }
   0xb   : > { %v742_v0 = vld [vmem:[%s997_s1 + $0x38] sm:$0xff]   ;;  %v786_v1 = vmov 0   ;;  %v743_v2 = vld [vmem:[%s997_s1 + $0x30] sm:$0xff]   ;;  %s1002_s19 = smov (!%p208_p3, %s662_s19), 31  ;;  %v744_v3 = vld [vmem:[%s997_s1 + $0x28] sm:$0xff]   ;;  %vm418_vm0 = vcmask 523264  }
   0xc   : > { %443 = vmatprep.subr.bf16.mxu0 %v786_v1  ;;  %709 = vmatprep.subr.bf16.mxu1 %v786_v1  ;;  %s835_s24 = sshll.u32 %s1002_s19, 3  ;;  %v745_v4 = vld [vmem:[%s997_s1 + $0x20] sm:$0xff]   ;;  %v746_v6 = vld [vmem:[%s997_s1 + $0x18] sm:$0xff]   ;;  %v747_v8 = vld [vmem:[%s997_s1 + $0x10] sm:$0xff]   ;;  %vm572_vm1 = vcmask 392192  }
   0xd   : > { %444 = vmatpush1.bf16.msra.mxu0 %v742_v0  ;;  %721 = vmatpush1.bf16.msra.mxu1 %v742_v0  ;;  %s844_s29 = scalar_lea.vmem %s996_s0, %s835_s24  ;;  %v748_v9 = vld [vmem:[%s997_s1 + $0x8] sm:$0xff]   ;;  %v749_v10 = vld [vmem:[%s997_s1] sm:$0xff]   ;;  %v750_v11 = vld [vmem:[%s997_s1 + $0x58] sm:$0xff]   ;;  %s916_s23 = scalar_lea.vmem %s999_s3, %s835_s24 }
   0xe   : > { %445 = vmatprep.subr.bf16.mxu0 %v786_v1  ;;  %710 = vmatprep.subr.bf16.mxu1 %v786_v1  ;;  %v756_v5 = vld [vmem:[%s844_s29 + $0x4] ss:$8 sps:$4 sm:$0xff]   ;;  %v751_v12 = vld [vmem:[%s997_s1 + $0x50] sm:$0xff]   ;;  %v754_v15 = vld [vmem:[%s844_s29] ss:$8 sps:$4 sm:$0xff]  }
   0xf   : > { %v759_v7 = vld [vmem:[%s844_s29 + $0x44] ss:$8 sps:$4 sm:$0xff]   ;;  %698 = vmatprep.mubr.msk.bf16.mxu0 %vm418_vm0, %v756_v5  ;;  %v757_v16 = vld [vmem:[%s844_s29 + $0x40] ss:$8 sps:$4 sm:$0xff]   ;;  %v760_v17 = vld [vmem:[%s844_s29 + $0x14] ss:$8 sps:$4 sm:$0xff]  }
  0x10   : > { %702 = vmatprep.mubr.msk.bf16.mxu1 %vm418_vm0, %v759_v7  ;;  %v752_v13 = vld [vmem:[%s997_s1 + $0x48] sm:$0xff]   ;;  %v753_v14 = vld [vmem:[%s997_s1 + $0x40] sm:$0xff]   ;;  %v762_v18 = vld [vmem:[%s844_s29 + $0x54] ss:$8 sps:$4 sm:$0xff]  }
  0x11   : > { %446 = vmatpush1.bf16.msra.mxu0 %v743_v2  ;;  %722 = vmatpush1.bf16.msra.mxu1 %v743_v2  ;;  %v764_v19 = vld [vmem:[%s844_s29 + $0x10] ss:$8 sps:$4 sm:$0xff]   ;;  %v766_v21 = vld [vmem:[%s844_s29 + $0x24] ss:$8 sps:$4 sm:$0xff]   ;;  %v770_v23 = vld [vmem:[%s844_s29 + $0x20] ss:$8 sps:$4 sm:$0xff]  }
  0x12   : > { %447 = vmatprep.subr.bf16.mxu0 %v786_v1  ;;  %711 = vmatprep.subr.bf16.mxu1 %v786_v1  ;;  %v765_v20 = vld [vmem:[%s844_s29 + $0x50] ss:$8 sps:$4 sm:$0xff]   ;;  %v768_v22 = vld [vmem:[%s844_s29 + $0x64] ss:$8 sps:$4 sm:$0xff]   ;;  %v771_v24 = vld [vmem:[%s844_s29 + $0x60] ss:$8 sps:$4 sm:$0xff]  }
  0x13   : > { %v772_v25 = vld [vmem:[%s844_s29 + $0x34] ss:$8 sps:$4 sm:$0xff]   ;;  %v776_v27 = vld [vmem:[%s844_s29 + $0x30] ss:$8 sps:$4 sm:$0xff]   ;;  %v921_v29 = vld [vmem:[%s998_s2] ss:$0 sm:$0xff] }
  0x14   : > { %v774_v26 = vld [vmem:[%s844_s29 + $0x74] ss:$8 sps:$4 sm:$0xff]   ;;  %v777_v28 = vld [vmem:[%s844_s29 + $0x70] ss:$8 sps:$4 sm:$0xff]   ;;  %v540_v31 = vld [vmem:[%s916_s23] sm:$0xff]  ;;  %s931_s29 = scalar_lea.vmem %s1000_s4, %s835_s24 }
  0x15   : > { %448 = vmatpush1.bf16.msra.mxu0 %v744_v3  ;;  %723 = vmatpush1.bf16.msra.mxu1 %v744_v3  ;;  %v548_v33 = vld [vmem:[%s916_s23 + $0x40] sm:$0xff]  ;;  %v541_v41 = vld [vmem:[%s916_s23 + $0x8] sm:$0xff]  ;;  %v542_v51 = vld [vmem:[%s916_s23 + $0x10] sm:$0xff] }
  0x16   : > { %449 = vmatprep.subr.bf16.mxu0 %v786_v1  ;;  %712 = vmatprep.subr.bf16.mxu1 %v786_v1  ;;  %v549_v43 = vld [vmem:[%s916_s23 + $0x48] sm:$0xff]  ;;  %v550_v53 = vld [vmem:[%s916_s23 + $0x50] sm:$0xff]  ;;  %v543_v61 = vld [vmem:[%s916_s23 + $0x18] sm:$0xff] }
  0x17   : > { %v551_v63 = vld [vmem:[%s916_s23 + $0x58] sm:$0xff]  ;;  %v544_v7 = vld [vmem:[%s916_s23 + $0x20] sm:$0xff] }
  0x19   : > { %450 = vmatpush1.bf16.msra.mxu0 %v745_v4  ;;  %724 = vmatpush1.bf16.msra.mxu1 %v745_v4 }
  0x1a   : > { %451 = vmatprep.subr.bf16.mxu0 %v786_v1  ;;  %713 = vmatprep.subr.bf16.mxu1 %v786_v1 }
  0x1d   : > { %452 = vmatpush1.bf16.msra.mxu0 %v746_v6  ;;  %725 = vmatpush1.bf16.msra.mxu1 %v746_v6 }
  0x1e   : > { %453 = vmatprep.subr.bf16.mxu0 %v786_v1  ;;  %714 = vmatprep.subr.bf16.mxu1 %v786_v1 }
  0x21   : > { %454 = vmatpush1.bf16.msra.mxu0 %v747_v8  ;;  %726 = vmatpush1.bf16.msra.mxu1 %v747_v8 }
  0x22   : > { %455 = vmatprep.subr.bf16.mxu0 %v786_v1  ;;  %715 = vmatprep.subr.bf16.mxu1 %v786_v1 }
  0x25   : > { %456 = vmatpush1.bf16.msra.mxu0 %v748_v9  ;;  %727 = vmatpush1.bf16.msra.mxu1 %v748_v9  ;;  %v552_v9 = vld [vmem:[%s916_s23 + $0x60] sm:$0xff] }
  0x26   : > { %457 = vmatprep.subr.bf16.mxu0 %v786_v1  ;;  %716 = vmatprep.subr.bf16.mxu1 %v786_v1 }
  0x29   : > { %458 = vmatpush1.bf16.msra.mxu0 %v749_v10  ;;  %728 = vmatpush1.bf16.msra.mxu1 %v749_v10 }
  0x2a   : > { %467 = vmatprep.subr.bf16.mxu0 %v786_v1  ;;  %717 = vmatprep.subr.bf16.mxu1 %v786_v1 }
  0x2d   : > { %468 = vmatpush2.bf16.msra.mxu0 %v750_v11  ;;  %729 = vmatpush2.bf16.msra.mxu1 %v750_v11 }
  0x2e   : > { %469 = vmatprep.subr.bf16.mxu0 %v786_v1  ;;  %718 = vmatprep.subr.bf16.mxu1 %v786_v1 }
  0x31   : > { %470 = vmatpush2.bf16.msra.mxu0 %v751_v12  ;;  %730 = vmatpush2.bf16.msra.mxu1 %v751_v12 }
  0x32   : > { %471 = vmatprep.subr.bf16.mxu0 %v786_v1  ;;  %719 = vmatprep.subr.bf16.mxu1 %v786_v1 }
  0x35   : > { %472 = vmatpush2.bf16.msra.mxu0 %v752_v13  ;;  %731 = vmatpush2.bf16.msra.mxu1 %v752_v13 }
  0x36   : > { %473 = vmatprep.subr.bf16.mxu0 %v786_v1  ;;  %720 = vmatprep.subr.bf16.mxu1 %v786_v1 }
  0x39   : > { %474 = vmatpush2.bf16.msra.mxu0 %v753_v14  ;;  %732 = vmatpush2.bf16.msra.mxu1 %v753_v14 }
  0x3c   : > { %476 = vmatmul.mubr.bf16.vlgmr.msra.gmra.mxu0 %v754_v15  ;;  %508 = vmatmul.mubr.bf16.vlgmr.msra.gmra.mxu1 %v757_v16 }
  0x3d   : > { %699 = vmatprep.mubr.msk.bf16.mxu0 %vm418_vm0, %v760_v17  ;;  %703 = vmatprep.mubr.msk.bf16.mxu1 %vm418_vm0, %v762_v18  ;;  %v545_v17 = vld [vmem:[%s916_s23 + $0x28] sm:$0xff] }
  0x44   : > { %484 = vmatmul.mubr.bf16.gmra.mxu0 %v764_v19  ;;  %516 = vmatmul.mubr.bf16.gmra.mxu1 %v765_v20  ;;  %v553_v19 = vld [vmem:[%s916_s23 + $0x68] sm:$0xff] }
  0x45   : > { %700 = vmatprep.mubr.msk.bf16.mxu0 %vm418_vm0, %v766_v21  ;;  %704 = vmatprep.mubr.msk.bf16.mxu1 %vm418_vm0, %v768_v22 }
  0x4c   : > { %492 = vmatmul.mubr.bf16.gmra.mxu0 %v770_v23  ;;  %524 = vmatmul.mubr.bf16.gmra.mxu1 %v771_v24 }
  0x4d   : > { %701 = vmatprep.mubr.msk.bf16.mxu0 %vm418_vm0, %v772_v25  ;;  %705 = vmatprep.mubr.msk.bf16.mxu1 %vm418_vm0, %v774_v26 }
  0x54   : > { %500 = vmatmul.mubr.bf16.gmra.mxu0 %v776_v27  ;;  %532 = vmatmul.mubr.bf16.gmra.mxu1 %v777_v28  ;;  %v546_v27 = vld [vmem:[%s916_s23 + $0x30] sm:$0xff] }
  0xfc   : > { %v477_v30 = vpop.f32.mrf.mxu0  ;;  %v509_v32 = vpop.f32.mrf.mxu1 }
  0xfd   : > { %v478_v34 = vadd.f32 %v921_v29, %v477_v30  ;;  %v510_v35 = vadd.f32 %v921_v29, %v509_v32  ;;  %v554_v30 = vld [vmem:[%s916_s23 + $0x70] sm:$0xff] }
  0xfe   : > { %v479_v36 = vpop.f32.mrf.mxu0  ;;  %v511_v37 = vpop.f32.mrf.mxu1 }
  0xff   : > { %v556_v38 = vadd.f32 %v540_v31, %v478_v34  ;;  %v564_v39 = vadd.f32 %v548_v33, %v510_v35 }
 0x100   : > { %v480_v40 = vpop.f32.mrf.mxu0  ;;  %v512_v42 = vpop.f32.mrf.mxu1 }
 0x101   : > { %573 = vst.msk [vmem:[%s931_s29] sm:$0xff] %vm572_vm1, %v556_v38  ;;  %581 = vst.msk [vmem:[%s931_s29 + $0x40] sm:$0xff] %vm572_vm1, %v564_v39  ;;  %v481_v44 = vadd.f32 %v921_v29, %v480_v40  ;;  %v513_v45 = vadd.f32 %v921_v29, %v512_v42  ;;  %v547_v38 = vld [vmem:[%s916_s23 + $0x38] sm:$0xff] }
 0x102   : > { %v482_v46 = vpop.f32.mrf.mxu0  ;;  %v514_v47 = vpop.f32.mrf.mxu1  ;;  %v555_v40 = vld [vmem:[%s916_s23 + $0x78] sm:$0xff] }
 0x103   : > { %v557_v48 = vadd.f32 %v541_v41, %v481_v44  ;;  %v565_v49 = vadd.f32 %v549_v43, %v513_v45 }
 0x104   : > { %v485_v50 = vpop.f32.mrf.mxu0  ;;  %v517_v52 = vpop.f32.mrf.mxu1 }
 0x105   : > { %574 = vst.msk [vmem:[%s931_s29 + $0x8] sm:$0xff] %vm572_vm1, %v557_v48  ;;  %582 = vst.msk [vmem:[%s931_s29 + $0x48] sm:$0xff] %vm572_vm1, %v565_v49  ;;  %v486_v54 = vadd.f32 %v921_v29, %v485_v50  ;;  %v518_v55 = vadd.f32 %v921_v29, %v517_v52 }
 0x106   : > { %v487_v56 = vpop.f32.mrf.mxu0  ;;  %v519_v57 = vpop.f32.mrf.mxu1 }
 0x107   : > { %v558_v58 = vadd.f32 %v542_v51, %v486_v54  ;;  %v566_v59 = vadd.f32 %v550_v53, %v518_v55 }
 0x108   : > { %v488_v60 = vpop.f32.mrf.mxu0  ;;  %v520_v62 = vpop.f32.mrf.mxu1 }
 0x109   : > { %575 = vst.msk [vmem:[%s931_s29 + $0x10] sm:$0xff] %vm572_vm1, %v558_v58  ;;  %583 = vst.msk [vmem:[%s931_s29 + $0x50] sm:$0xff] %vm572_vm1, %v566_v59  ;;  %v489_v0 = vadd.f32 %v921_v29, %v488_v60  ;;  %v521_v1 = vadd.f32 %v921_v29, %v520_v62 }
 0x10a   : > { %v490_v2 = vpop.f32.mrf.mxu0  ;;  %v522_v3 = vpop.f32.mrf.mxu1 }
 0x10b   : > { %v559_v4 = vadd.f32 %v543_v61, %v489_v0  ;;  %v567_v5 = vadd.f32 %v551_v63, %v521_v1 }
 0x10c   : > { %v493_v6 = vpop.f32.mrf.mxu0  ;;  %v525_v8 = vpop.f32.mrf.mxu1 }
 0x10d   : > { %576 = vst.msk [vmem:[%s931_s29 + $0x18] sm:$0xff] %vm572_vm1, %v559_v4  ;;  %584 = vst.msk [vmem:[%s931_s29 + $0x58] sm:$0xff] %vm572_vm1, %v567_v5  ;;  %v494_v10 = vadd.f32 %v921_v29, %v493_v6  ;;  %v526_v11 = vadd.f32 %v921_v29, %v525_v8 }
 0x10e   : > { %v495_v12 = vpop.f32.mrf.mxu0  ;;  %v527_v13 = vpop.f32.mrf.mxu1 }
 0x10f   : > { %v560_v14 = vadd.f32 %v544_v7, %v494_v10  ;;  %v568_v15 = vadd.f32 %v552_v9, %v526_v11 }
 0x110   : > { %v496_v16 = vpop.f32.mrf.mxu0  ;;  %v528_v18 = vpop.f32.mrf.mxu1 }
 0x111   : > { %577 = vst.msk [vmem:[%s931_s29 + $0x20] sm:$0xff] %vm572_vm1, %v560_v14  ;;  %585 = vst.msk [vmem:[%s931_s29 + $0x60] sm:$0xff] %vm572_vm1, %v568_v15  ;;  %v497_v20 = vadd.f32 %v921_v29, %v496_v16  ;;  %v529_v21 = vadd.f32 %v921_v29, %v528_v18 }
 0x112   : > { %v498_v22 = vpop.f32.mrf.mxu0  ;;  %v530_v23 = vpop.f32.mrf.mxu1 }
 0x113   : > { %v561_v24 = vadd.f32 %v545_v17, %v497_v20  ;;  %v569_v25 = vadd.f32 %v553_v19, %v529_v21 }
 0x114   : > { %v501_v26 = vpop.f32.mrf.mxu0  ;;  %v533_v28 = vpop.f32.mrf.mxu1 }
 0x115   : > { %578 = vst.msk [vmem:[%s931_s29 + $0x28] sm:$0xff] %vm572_vm1, %v561_v24  ;;  %586 = vst.msk [vmem:[%s931_s29 + $0x68] sm:$0xff] %vm572_vm1, %v569_v25  ;;  %v502_v31 = vadd.f32 %v921_v29, %v501_v26  ;;  %v534_v32 = vadd.f32 %v921_v29, %v533_v28 }
 0x116   : > { %v503_v33 = vpop.f32.mrf.mxu0  ;;  %v535_v34 = vpop.f32.mrf.mxu1 }
 0x117   : > { %v562_v35 = vadd.f32 %v546_v27, %v502_v31  ;;  %v570_v36 = vadd.f32 %v554_v30, %v534_v32 }
 0x118   : > { %v504_v37 = vpop.f32.mrf.mxu0  ;;  %v536_v39 = vpop.f32.mrf.mxu1 }
 0x119   : > { %579 = vst.msk [vmem:[%s931_s29 + $0x30] sm:$0xff] %vm572_vm1, %v562_v35  ;;  %587 = vst.msk [vmem:[%s931_s29 + $0x70] sm:$0xff] %vm572_vm1, %v570_v36  ;;  %v505_v41 = vadd.f32 %v921_v29, %v504_v37  ;;  %v537_v42 = vadd.f32 %v921_v29, %v536_v39 }
 0x11a   : > { %v506_v43 = vpop.f32.mrf.mxu0  ;;  %v538_v44 = vpop.f32.mrf.mxu1 }
 0x11b   : > { %v563_v45 = vadd.f32 %v547_v38, %v505_v41  ;;  %v571_v46 = vadd.f32 %v555_v40, %v537_v42 }
 0x11d   : > { %580 = vst.msk [vmem:[%s931_s29 + $0x38] sm:$0xff] %vm572_vm1, %v563_v45  ;;  %588 = vst.msk [vmem:[%s931_s29 + $0x78] sm:$0xff] %vm572_vm1, %v571_v46 }
 0x11e PF: > { %s14_s15 = sadd.s32 1, %s784_s15  }
 0x11f   : > { %p11_p4 = scmp.ge.s32.totalorder %s14_s15, 4  }
 0x121   :  { %13 = sbr.rel (!%p11_p4) target bundleno = 1 (0x1), region = 69 }

// kernel: ast_forward.19
= control target key start
LH: loop header
LB: loop body
LE: loop exit
PB: predicated region body
PF: predicated region fallthrough
CT: control target
= control target key end

     0   :  { %vm31_vm0 = vcmask 386048   ;;  %vm90_vm1 = vcmask 1041409   ;;  %v264_v49 = vmov 0.0   ;;  %vm265_vm2 = vmmov 0   ;;  %s348_s0 = inlined_call_operand.vmem [shape: f32[2,2,48], index: 0, kind: input, shape index: {}]   ;;  %s349_s1 = inlined_call_operand.vmem [shape: f32[1,1,48], index: 1, kind: input, shape index: {}]   ;;  %s350_s2 = inlined_call_operand.vmem [shape: f32[1,1,48], index: 2, kind: input, shape index: {}]   ;;  %s351_s5 = inlined_call_operand.vmem [shape: bf16[48,1], index: 5, kind: input, shape index: {}]   ;;  %s352_s6 = inlined_call_operand.<no memory space> [shape: f32[1,1], index: 6, kind: input, shape index: {}]   ;;  %s353_s3 = inlined_call_operand.vmem [shape: f32[1,48], index: 3, kind: input, shape index: {}]   ;;  %s354_s4 = inlined_call_operand.vmem [shape: f32[1,48], index: 4, kind: input, shape index: {}]   ;;  %s355_s7 = inlined_call_operand.vmem [shape: f32[2,1], index: 7, kind: output, shape index: {}]  }
   0x1   :  { %v30_v0 = vld [vmem:[%s348_s0 + $0x2] sm:$0x3]  ;;  %v29_v1 = vld [vmem:[%s348_s0] sm:$0x3]  ;;  %243 = vmatprep.subr.bf16.mxu0 %v264_v49  ;;  %v255_v50 = vld [vmem:[%s351_s5 + $0x10] sm:$0xff]   ;;  %249 = vmatprep.mubr.msk.bf16.mxu0 %vm265_vm2, %v264_v49  ;;  %v12_v53 = vstv %s352_s6  ;;  %vm180_vm3 = vcmask 392192  }
   0x2   :  { %v35_v2 = vsel %vm31_vm0, %v30_v0, 0.0  ;;  %v32_v3 = vsel %vm31_vm0, %v29_v1, 0.0  ;;  %v230_v21 = vld [vmem:[%s349_s1] ss:$0 sm:$0xff]  ;;  %244 = vmatpush3.bf16.msra.mxu0 %v255_v50  ;;  %v256_v51 = vld [vmem:[%s351_s5 + $0x8] sm:$0xff]   ;;  %vm224_vm4 = vcmask 1024  }
   0x3   :  { %36 = vadd.xlane.f32.xlu0 %v35_v2  ;;  %v231_v23 = vld [vmem:[%s350_s2] ss:$0 sm:$0xff]  ;;  %245 = vmatprep.subr.bf16.mxu0 %v264_v49  ;;  %13 = vst [vmem:[#allocation2] sm:$0x1] %v12_v53 }
   0x4   :  { %v257_v52 = vld [vmem:[%s351_s5] sm:$0xff]  }
   0x5   :  { %v232_v58 = vld [vmem:[%s353_s3] ss:$0 sm:$0xff] }
   0x6   :  { %246 = vmatpush3.bf16.msra.mxu0 %v256_v51  ;;  %v233_v61 = vld [vmem:[%s354_s4] ss:$0 sm:$0xff] }
   0x7   :  { %33 = vadd.xlane.f32.xlu0 %v32_v3  ;;  %247 = vmatprep.subr.bf16.mxu0 %v264_v49 }
   0xa   :  { %248 = vmatpush3.bf16.msra.mxu0 %v257_v52 }
  0x8c   :  { %v37_v4 = vpop.xlane.xlu0 %36 }
  0x8d   :  { %v40_v5 = vmul.f32 0.020833334, %v37_v4 }
  0x8f   :  { %v42_v6 = vsub.f32 %v30_v0, %v40_v5 }
  0x90   :  { %v34_v7 = vpop.xlane.xlu0 %33 }
  0x91   :  { %v39_v8 = vmul.f32 0.020833334, %v34_v7  ;;  %v44_v9 = vmul.f32 %v42_v6, %v42_v6 }
  0x93   :  { %v41_v10 = vsub.f32 %v29_v1, %v39_v8  ;;  %v48_v11 = vsel %vm31_vm0, %v44_v9, 0.0 }
  0x94   :  { %49 = vadd.xlane.f32.xlu1 %v48_v11 }
  0x95   :  { %v43_v12 = vmul.f32 %v41_v10, %v41_v10 }
  0x97   :  { %v45_v13 = vsel %vm31_vm0, %v43_v12, 0.0 }
  0x98   :  { %46 = vadd.xlane.f32.xlu1 %v45_v13 }
 0x11d   :  { %v50_v14 = vpop.xlane.xlu1 %49 }
 0x11e   :  { %v52_v15 = vmul.f32 0.020833334, %v50_v14 }
 0x120   :  { %v54_v16 = vadd.f32 1e-06, %v52_v15 }
 0x121   :  { %v47_v17 = vpop.xlane.xlu1 %46 }
 0x122   :  { %258 = vrsqrt.f32 %v54_v16  ;;  %v51_v18 = vmul.f32 0.020833334, %v47_v17 }
 0x124   :  { %v53_v19 = vadd.f32 1e-06, %v51_v18 }
 0x126   :  { %260 = vrsqrt.f32 %v53_v19 }
 0x12f   :  { %v259_v20 = vpop.eup %258 }
 0x130   :  { %v58_v22 = vmul.f32 %v259_v20, %v42_v6 }
 0x132   :  { %v67_v24 = vmul.f32 %v230_v21, %v58_v22 }
 0x133   :  { %v261_v25 = vpop.eup %260 }
 0x134   :  { %v57_v26 = vmul.f32 %v261_v25, %v41_v10  ;;  %v76_v27 = vadd.f32 %v231_v23, %v67_v24  ;;  %v234_v10 = vld [vmem:[#allocation2] ss:$0 sm:$0xff] }
 0x136   :  { %v66_v28 = vmul.f32 %v230_v21, %v57_v26  ;;  %v80_v29 = vrot.slane %v76_v27, 1 }
 0x138   :  { %v75_v30 = vadd.f32 %v231_v23, %v66_v28  ;;  %v84_v31 = vadd.f32 %v80_v29, %v76_v27 }
 0x13a   :  { %v79_v32 = vrot.slane %v75_v30, 1  ;;  %v86_v33 = vmul.f32 0.5, %v84_v31 }
 0x13c   :  { %v83_v34 = vadd.f32 %v79_v32, %v75_v30  ;;  %v89_v36 = vrot.slane %v86_v33, 7 }
 0x13e   :  { %v85_v35 = vmul.f32 0.5, %v83_v34 }
 0x140   :  { %v91_v37 = vsel %vm90_vm1, %v89_v36, %v85_v35 }
 0x141   :  { %v93_v38 = vsel %vm31_vm0, %v91_v37, 0.0 }
 0x142   :  { %94 = vadd.xlane.f32.xlu0 %v93_v38 }
 0x1cb   :  { %v95_v39 = vpop.xlane.xlu0 %94 }
 0x1cc   :  { %v96_v40 = vmul.f32 0.020833334, %v95_v39 }
 0x1ce   :  { %v98_v41 = vrot.slane %v96_v40, 1  ;;  %v101_v42 = vsub.f32 %v85_v35, %v96_v40 }
 0x1d0   :  { %v102_v43 = vsub.f32 %v86_v33, %v98_v41  ;;  %v103_v45 = vmul.f32 %v101_v42, %v101_v42 }
 0x1d2   :  { %v104_v44 = vmul.f32 %v102_v43, %v102_v43 }
 0x1d4   :  { %v107_v46 = vrot.slane %v104_v44, 7 }
 0x1d6   :  { %v108_v47 = vsel %vm90_vm1, %v107_v46, %v103_v45 }
 0x1d7   :  { %v110_v48 = vsel %vm31_vm0, %v108_v47, 0.0 }
 0x1d8   :  { %111 = vadd.xlane.f32.xlu1 %v110_v48 }
 0x261   :  { %v112_v54 = vpop.xlane.xlu1 %111 }
 0x262   :  { %v113_v55 = vmul.f32 0.020833334, %v112_v54 }
 0x264   :  { %v114_v56 = vadd.f32 1e-05, %v113_v55 }
 0x266   :  { %262 = vrsqrt.f32 %v114_v56 }
 0x273   :  { %v263_v57 = vpop.eup %262 }
 0x274   :  { %v117_v59 = vrot.slane %v263_v57, 1  ;;  %v120_v60 = vmul.f32 %v263_v57, %v101_v42 }
 0x276   :  { %v121_v62 = vmul.f32 %v117_v59, %v102_v43  ;;  %v129_v63 = vmul.f32 %v232_v58, %v120_v60 }
 0x278   :  { %v130_v0 = vmul.f32 %v232_v58, %v121_v62  ;;  %v138_v1 = vadd.f32 %v233_v61, %v129_v63 }
 0x27a   :  { %v139_v2 = vadd.f32 %v233_v61, %v130_v0  ;;  %v140_v3 = vpack.c.bf16 %v138_v1, %v138_v1 }
 0x27c   :  { %v141_v4 = vpack.c.bf16 %v139_v2, %v139_v2  ;;  %v157_v6 = vunpack.c.l.b16 %v140_v3 }
 0x27e   :  { %v158_v5 = vunpack.c.l.b16 %v141_v4 }
 0x280   :  { %v159_v7 = vrot.slane %v158_v5, 7 }
 0x282   :  { %v160_v8 = vsel %vm90_vm1, %v159_v7, %v157_v6 }
 0x283   :  { %v161_v9 = vpack.c.b16 %v160_v8, %v160_v8 }
 0x285   :  { %250 = vmatmul.mubr.msk.bf16.vlgmr.msra.gmra.mxu0 %vm180_vm3, %v161_v9 }
 0x345   :  { %v218_v11 = vpop.f32.mrf.mxu0 }
 0x346   :  { %v219_v12 = vadd.f32 %v234_v10, %v218_v11 }
 0x347   :  { %v251_v13 = vpop.f32.mrf.mxu0 }
 0x348   :  { %225 = vst.msk [vmem:[%s355_s7] sm:$0x3] %vm224_vm4, %v219_v12 }
 0x349   :  { %v221_v14 = vpop.f32.mrf.mxu0 }
 0x34b   :  { %v252_v15 = vpop.f32.mrf.mxu0 }

</bundles_post_ra>
